<compile_context>
chip_gen: v7x
topology: tpu7x:2x2x1
jax: 0.10.0
libtpu: 0.0.40
codegen_flags: <defaults>
</compile_context>

<pallas_src>
import functools

import numpy as np
import jax
import jax.numpy as jnp
from jax.experimental import pallas as pl
from jax.experimental.pallas import tpu as pltpu


def _res_conv_kernel(x_ref, film_ref, gn1_ref, gn2_ref, cvec_ref,
                     m1_ref, m2_ref, m3_ref,
                     w1_ref, w2_ref, w3_ref, w4_ref, rw_ref,
                     o_ref, tap_ref, *, seg_len, b_tile, conv_dtype):
    f32 = jnp.float32
    n = b_tile * seg_len                      # lane extent of the slab
    c_out = o_ref.shape[0]

    def swish(v):
        # exp -> EUP, approx reciprocal -> EUP; keeps the VALU free for the FiLM math.
        return v * pl.reciprocal(1.0 + jnp.exp(-v), approx=True)

    # ---- per-column bookkeeping (built once per grid step) -------------------
    col = jax.lax.broadcasted_iota(jnp.int32, (1, n), 1)
    pos = col % seg_len
    is_first = pos == 0                       # first position of each batch segment
    is_last = pos == (seg_len - 1)            # last position of each batch segment

    # segment (per-batch) one-hot matrices for GroupNorm stats / FiLM broadcast
    ncol = jax.lax.broadcasted_iota(jnp.int32, (b_tile, n), 1)
    brow = jax.lax.broadcasted_iota(jnp.int32, (b_tile, n), 0)
    seg_r = ((ncol >= brow * seg_len) & (ncol < (brow + 1) * seg_len)).astype(f32)
    nrow = jax.lax.broadcasted_iota(jnp.int32, (n, b_tile), 0)
    bcol = jax.lax.broadcasted_iota(jnp.int32, (n, b_tile), 1)
    seg_c = ((nrow >= bcol * seg_len) & (nrow < (bcol + 1) * seg_len)).astype(f32)

    def bcast_cols(vb):                       # (R, b_tile) -> (R, n), per-batch broadcast
        return jnp.dot(vb, seg_r, preferred_element_type=f32)

    # All per-batch FiLM rows broadcast in ONE matmul: (6*Cout, b_tile) -> (6*Cout, n).
    film = bcast_cols(film_ref[...])
    cond_full = film[0 * c_out:1 * c_out]     # (Wc0+Wc1+Wc2)@s + conv2_b
    cond_c0 = film[1 * c_out:2 * c_out]       # Wc0@s (left tap missing at segment start)
    cond_c2 = film[2 * c_out:3 * c_out]       # Wc2@s (right tap missing at segment end)
    t_scale = film[3 * c_out:4 * c_out]       # time scale (already has +1)
    t_shift = film[4 * c_out:5 * c_out]
    dv = film[5 * c_out:6 * c_out]            # stepsize projection

    def gnorm(v, m_ref, gamma, beta):
        # v: (C, n) f32; m_ref: (C, C) group-membership / (group_size * seg_len).
        s1 = jnp.dot(v, seg_c, preferred_element_type=f32)            # (C, b_tile)
        mu = bcast_cols(jnp.dot(m_ref[...], s1, preferred_element_type=f32))
        d = v - mu
        s2 = jnp.dot(d * d, seg_c, preferred_element_type=f32)        # centered: stable
        var = jnp.dot(m_ref[...], s2, preferred_element_type=f32)     # (C, b_tile)
        scale = jax.lax.rsqrt(var + 1e-5) * gamma                     # fold gamma pre-broadcast
        return d * bcast_cols(scale) + beta

    def conv3(v, w_ref, bias):
        # k=3 'same' conv, all three taps fused into one matmul:
        #   scratch rows [0:C] = v[:, j-1], [C:2C] = v[:, j], [2C:3C] = v[:, j+1]
        #   (zero-padded at per-batch segment boundaries; masks also kill global wrap).
        # pltpu.roll matches jnp.roll: out[:, j] = in[:, j - shift].
        c = v.shape[0]
        vm1 = jnp.where(is_first, 0.0, pltpu.roll(v, 1, axis=1))       # v[:, j-1]
        vp1 = jnp.where(is_last, 0.0, pltpu.roll(v, n - 1, axis=1))    # v[:, j+1]
        tap_ref[0:c, :] = vm1.astype(conv_dtype)
        tap_ref[c:2 * c, :] = v.astype(conv_dtype)
        tap_ref[2 * c:3 * c, :] = vp1.astype(conv_dtype)
        y = jnp.dot(w_ref[...], tap_ref[0:3 * c, :], preferred_element_type=f32)
        return y if bias is None else y + bias

    x = x_ref[...].astype(f32)                # (Cin, n)
    gn1 = gn1_ref[...]                        # (Cin, 2)   [gamma, beta]
    gn2 = gn2_ref[...]                        # (Cout, 2)  [gamma, beta] (y half of norm2)
    cvec = cvec_ref[...]                      # (Cout, 8)
    gn3_w, gn3_b = cvec[:, 0:1], cvec[:, 1:2]
    gn4_w, gn4_b = cvec[:, 2:3], cvec[:, 3:4]
    b1, b3, b4, rb = cvec[:, 4:5], cvec[:, 5:6], cvec[:, 6:7], cvec[:, 7:8]

    # norm1 -> swish -> conv1
    y = conv3(swish(gnorm(x, m1_ref, gn1[:, 0:1], gn1[:, 1:2])), w1_ref, b1)   # (Cout, n)

    # concat + norm2 + swish + conv2:
    # the cond half of the concat is constant along L, so its normalized/swished value
    # and its conv2 contribution are precomputed per batch in the wrapper and applied
    # here as a per-batch bias with segment-boundary corrections.
    y = conv3(swish(gnorm(y, m2_ref, gn2[:, 0:1], gn2[:, 1:2])), w2_ref, None)
    y = (y + cond_full
         - jnp.where(is_first, cond_c0, 0.0)
         - jnp.where(is_last, cond_c2, 0.0))

    # time FiLM (linear projections hoisted to the wrapper; scale already has +1)
    y = y * t_scale + t_shift

    # norm3 -> swish -> conv3
    y = conv3(swish(gnorm(y, m3_ref, gn3_w, gn3_b)), w3_ref, b3)

    # stepsize FiLM (scale AND shift both come from stepsize_scale, as in PyTorch)
    y = y * (dv + 1.0) + dv

    # norm4 -> swish -> dropout (eval: identity) -> conv4
    # (norm3/norm4 share the same group structure, hence the shared m3_ref.)
    y = conv3(swish(gnorm(y, m3_ref, gn4_w, gn4_b)), w4_ref, b4)

    # residual 1x1 conv (in_channels != out_channels)
    res = jnp.dot(rw_ref[...], x.astype(conv_dtype), preferred_element_type=f32) + rb
    o_ref[...] = (y + res).astype(o_ref.dtype)


def prepare_params(p, L, *, conv_dtype=jnp.float32):
    """One-time, parameter-only packing (hoisted out of the per-forward path).

    conv_dtype: dtype of the conv / residual MXU operands.  Use jnp.bfloat16 on
    v6e / v7x; leave f32 on v5e.  GroupNorm stats and elementwise math stay f32.
    """
    f32 = jnp.float32
    c_in = int(p["gn1_w"].shape[0])
    c_out = int(p["conv1_w"].shape[1])
    G1 = c_in // 4
    G2 = max(c_out // 4, 1)
    gs1 = c_in // G1
    gs2 = (2 * c_out) // G2
    gs3 = c_out // G2

    # The hoisted-cond conv2 path is only valid when no gn2 group mixes y and cond channels.
    if c_out % gs2 != 0:
        raise NotImplementedError(
            "gn2 group size must divide out_channels (got group size "
            f"{gs2}, out_channels {c_out}); in-kernel concat fallback not implemented")

    def gmat(C, gs):
        gid = np.arange(C) // gs
        m = (gid[:, None] == gid[None, :]).astype(np.float32) / float(gs * L)
        return jnp.asarray(m)

    def fuse(w):                              # (3, Co, C) -> (Co, 3C): [w0 | w1 | w2]
        return jnp.concatenate([w[0], w[1], w[2]], axis=1).astype(conv_dtype)

    return dict(
        c_in=c_in, c_out=c_out, L=L, conv_dtype=conv_dtype,
        # GroupNorm group-membership matrices (bake 1/(group_size*L) — L is fixed here).
        M1=gmat(c_in, gs1), M2y=gmat(c_out, gs2), M3=gmat(c_out, gs3),
        # Fused 3-tap conv weights and residual 1x1 weight (MXU operand dtype).
        w1=fuse(p["conv1_w"]),
        w2=fuse(p["conv2_w"][:, :, :c_out]),          # y half of conv2 only
        w3=fuse(p["conv3_w"]),
        w4=fuse(p["conv4_w"]),
        rw=p["res_w"].astype(conv_dtype),
        # Per-channel vector packs (f32).
        gn1_pack=jnp.stack([p["gn1_w"], p["gn1_b"]], axis=1).astype(f32),
        gn2y_pack=jnp.stack([p["gn2_w"][:c_out], p["gn2_b"][:c_out]], axis=1).astype(f32),
        cvec_pack=jnp.stack([p["gn3_w"], p["gn3_b"], p["gn4_w"], p["gn4_b"],
                             p["conv1_b"], p["conv3_b"], p["conv4_b"], p["res_b"]],
                            axis=1).astype(f32),
        # Pieces used by the per-forward XLA projections (all f32).
        cond_w=p["cond_w"].astype(f32), cond_b=p["cond_b"].astype(f32),
        gn2c_w=p["gn2_w"][c_out:].astype(f32), gn2c_b=p["gn2_b"][c_out:].astype(f32),
        cond_gs=gs2,
        Wc_full=(p["conv2_w"][0, :, c_out:] + p["conv2_w"][1, :, c_out:]
                 + p["conv2_w"][2, :, c_out:]).astype(f32),
        Wc0=p["conv2_w"][0, :, c_out:].astype(f32),
        Wc2=p["conv2_w"][2, :, c_out:].astype(f32),
        conv2_b=p["conv2_b"].astype(f32),
        ts_w=p["ts_w"].astype(f32), ts_b=p["ts_b"].astype(f32),
        th_w=p["th_w"].astype(f32), th_b=p["th_b"].astype(f32),
        ss_w=p["ss_w"].astype(f32), ss_b=p["ss_b"].astype(f32),
    )


def res_conv_block_forward(x, t_emb, cond, d_emb, prep, *, b_tile=None, grid_multiple=1):
    """x: (B, C_in, L) NCL like PyTorch. Returns (B, C_out, L).

    grid_multiple: set to 2 on v7x so the grid stays shardable across both TensorCores.
    """
    f32 = jnp.float32
    B, c_in, L = x.shape
    c_out = prep["c_out"]
    assert c_in == prep["c_in"] and L == prep["L"], \
        "prepare_params() baked the GroupNorm 1/(group_size*L) for a different shape"
    max_c = max(c_in, c_out)

    swish = lambda v: v * jax.nn.sigmoid(v)

    # ---- hoisted per-batch (M=1) projections: cond / time / stepsize ---------
    t = swish(t_emb.astype(f32))
    t_scale = t @ prep["ts_w"] + prep["ts_b"] + 1.0                     # (B, Cout)
    t_shift = t @ prep["th_w"] + prep["th_b"]
    dv = swish(d_emb.astype(f32)) @ prep["ss_w"] + prep["ss_b"]

    # cond path: projection + the cond half of norm2 + swish + its conv2 contribution
    # (valid because gn2 groups never mix y and cond channels, checked in prepare_params).
    c_row = swish(cond.astype(f32)) @ prep["cond_w"] + prep["cond_b"]   # (B, Cout)
    gs = prep["cond_gs"]
    cg = c_row.reshape(B, c_out // gs, gs)
    mu = cg.mean(axis=2, keepdims=True)
    var = ((cg - mu) ** 2).mean(axis=2, keepdims=True)                  # biased, like GroupNorm
    cn = ((cg - mu) * jax.lax.rsqrt(var + 1e-5)).reshape(B, c_out)
    s = swish(cn * prep["gn2c_w"] + prep["gn2c_b"])                     # (B, Cout), const along L
    cond_full = s @ prep["Wc_full"].T + prep["conv2_b"]                 # conv2 bias folded in
    cond_c0 = s @ prep["Wc0"].T
    cond_c2 = s @ prep["Wc2"].T

    # ---- b_tile: LARGEST batch tile whose slab fits the VMEM budget ----------
    if b_tile is None:
        itemsize = jnp.dtype(prep["conv_dtype"]).itemsize

        def vmem_est(bt):
            nn = bt * L
            io = 2 * (c_in + c_out) * nn * 4        # double-buffered input/output slabs
            scratch = 3 * max_c * nn * itemsize     # fused-tap scratch
            live = 8 * max_c * nn * 4               # rough bound on live intermediates
            return io + scratch + live

        # Budget kept well under the 32 MiB scoped cap (also valid for v7x's 64 MiB/TC).
        budget = 20 * 1024 * 1024
        cands = [d for d in sorted(range(1, B + 1), reverse=True) if B % d == 0]
        valid = [d for d in cands
                 if (B // d) % grid_multiple == 0
                 and (B // d == 1 or (d * L) % 128 == 0)]
        b_tile = next((d for d in valid if vmem_est(d) <= budget),
                      valid[-1] if valid else B)
    assert B % b_tile == 0
    nb = B // b_tile
    n = b_tile * L

    # Activations NCL -> (C, B*L) slab: channels on sublanes, positions on lanes.
    x_slab = jnp.transpose(x.astype(f32), (1, 0, 2)).reshape(c_in, B * L)

    # Per-batch FiLM rows packed into one operand: (nb, 6*Cout, b_tile).
    film = jnp.stack([cond_full, cond_c0, cond_c2, t_scale, t_shift, dv], axis=0)  # (6,B,Cout)
    film = film.astype(f32).transpose(0, 2, 1).reshape(6 * c_out, B)
    film_blocks = film.reshape(6 * c_out, nb, b_tile).transpose(1, 0, 2)

    weights = [prep["M1"], prep["M2y"], prep["M3"],
               prep["w1"], prep["w2"], prep["w3"], prep["w4"], prep["rw"]]

    def full_spec(a):
        nd = a.ndim
        return pl.BlockSpec(a.shape, lambda g, _nd=nd: (0,) * _nd)

    in_specs = ([pl.BlockSpec((c_in, n), lambda g: (0, g)),
                 pl.BlockSpec((None, 6 * c_out, b_tile), lambda g: (g, 0, 0)),
                 full_spec(prep["gn1_pack"]), full_spec(prep["gn2y_pack"]),
                 full_spec(prep["cvec_pack"])]
                + [full_spec(w) for w in weights])

    kernel = functools.partial(_res_conv_kernel, seg_len=L, b_tile=b_tile,
                               conv_dtype=prep["conv_dtype"])

    out_slab = pl.pallas_call(
        kernel,
        out_shape=jax.ShapeDtypeStruct((c_out, B * L), f32),
        grid=(nb,),
        in_specs=in_specs,
        out_specs=pl.BlockSpec((c_out, n), lambda g: (0, g)),
        scratch_shapes=[pltpu.VMEM((3 * max_c, n), prep["conv_dtype"])],
        compiler_params=pltpu.CompilerParams(
            dimension_semantics=("parallel",),
            vmem_limit_bytes=32 * 1024 * 1024),
    )(x_slab, film_blocks, prep["gn1_pack"], prep["gn2y_pack"], prep["cvec_pack"],
      *weights)

    return out_slab.reshape(c_out, B, L).transpose(1, 0, 2)


def init_params(key, in_c, out_c, time_dim, cond_dim, step_dim):
    ks = jax.random.split(key, 26)

    def nrm(k, shape, scale=0.2):
        return (scale * jax.random.normal(k, shape)).astype(jnp.float32)

    return dict(
        gn1_w=1.0 + nrm(ks[0], (in_c,), 0.1), gn1_b=nrm(ks[1], (in_c,), 0.1),
        conv1_w=nrm(ks[2], (3, out_c, in_c)), conv1_b=nrm(ks[3], (out_c,), 0.1),
        cond_w=nrm(ks[4], (cond_dim, out_c)), cond_b=nrm(ks[5], (out_c,), 0.1),
        gn2_w=1.0 + nrm(ks[6], (2 * out_c,), 0.1), gn2_b=nrm(ks[7], (2 * out_c,), 0.1),
        conv2_w=nrm(ks[8], (3, out_c, 2 * out_c)), conv2_b=nrm(ks[9], (out_c,), 0.1),
        ts_w=nrm(ks[10], (time_dim, out_c)), ts_b=nrm(ks[11], (out_c,), 0.1),
        th_w=nrm(ks[12], (time_dim, out_c)), th_b=nrm(ks[13], (out_c,), 0.1),
        gn3_w=1.0 + nrm(ks[14], (out_c,), 0.1), gn3_b=nrm(ks[15], (out_c,), 0.1),
        conv3_w=nrm(ks[16], (3, out_c, out_c)), conv3_b=nrm(ks[17], (out_c,), 0.1),
        ss_w=nrm(ks[18], (step_dim, out_c)), ss_b=nrm(ks[19], (out_c,), 0.1),
        gn4_w=1.0 + nrm(ks[20], (out_c,), 0.1), gn4_b=nrm(ks[21], (out_c,), 0.1),
        conv4_w=nrm(ks[22], (3, out_c, out_c)), conv4_b=nrm(ks[23], (out_c,), 0.1),
        res_w=nrm(ks[24], (out_c, in_c)), res_b=nrm(ks[25], (out_c,), 0.1),
    )


def ref_forward(x, t_emb, cond, d_emb, p):
    """Pure-JAX reference mirroring the PyTorch forward (eval mode), NCL layout."""
    swish = lambda v: v * jax.nn.sigmoid(v)
    B, c_in, L = x.shape
    c_out = p["conv1_w"].shape[1]
    G1 = c_in // 4
    G2 = max(c_out // 4, 1)

    def gn(v, G, w, b):                        # v: (B, C, L)
        Bn, Cn, Ln = v.shape
        vg = v.reshape(Bn, G, Cn // G, Ln)
        mu = vg.mean(axis=(2, 3), keepdims=True)
        var = vg.var(axis=(2, 3), keepdims=True)
        vg = (vg - mu) / jnp.sqrt(var + 1e-5)
        return vg.reshape(Bn, Cn, Ln) * w[None, :, None] + b[None, :, None]

    def conv(v, w3, b):                        # v: (B, C, L); w3: (3, Cout, C)
        Ln = v.shape[2]
        vp = jnp.pad(v, ((0, 0), (0, 0), (1, 1)))
        y = (jnp.einsum("oc,bcl->bol", w3[0], vp[:, :, 0:Ln])
             + jnp.einsum("oc,bcl->bol", w3[1], vp[:, :, 1:Ln + 1])
             + jnp.einsum("oc,bcl->bol", w3[2], vp[:, :, 2:Ln + 2]))
        return y + b[None, :, None]

    y = conv(swish(gn(x, G1, p["gn1_w"], p["gn1_b"])), p["conv1_w"], p["conv1_b"])
    c = swish(cond) @ p["cond_w"] + p["cond_b"]
    c = jnp.broadcast_to(c[:, :, None], (B, c_out, L))
    y = jnp.concatenate([y, c], axis=1)
    y = conv(swish(gn(y, G2, p["gn2_w"], p["gn2_b"])), p["conv2_w"], p["conv2_b"])
    t = swish(t_emb)
    scale = (t @ p["ts_w"] + p["ts_b"])[:, :, None] + 1.0
    shift = (t @ p["th_w"] + p["th_b"])[:, :, None]
    y = y * scale + shift
    y = conv(swish(gn(y, G2, p["gn3_w"], p["gn3_b"])), p["conv3_w"], p["conv3_b"])
    d = swish(d_emb)
    dvv = (d @ p["ss_w"] + p["ss_b"])[:, :, None]
    y = y * (dvv + 1.0) + dvv
    # Dropout(p=0.1) is identity in eval mode.
    y = conv(swish(gn(y, G2, p["gn4_w"], p["gn4_b"])), p["conv4_w"], p["conv4_b"])
    res = jnp.einsum("oc,bcl->bol", p["res_w"], x) + p["res_b"][None, :, None]
    return y + res


if __name__ == "__main__":
    B, in_c, out_c, L = 4, 32, 16, 64
    time_dim, cond_dim, step_dim = 32, 16, 8

    key = jax.random.PRNGKey(0)
    k1, k2, k3, k4, kp = jax.random.split(key, 5)
    x = jax.random.normal(k1, (B, in_c, L), jnp.float32)          # NCL, like PyTorch
    t_emb = jax.random.normal(k2, (B, time_dim), jnp.float32)
    cond = jax.random.normal(k3, (B, cond_dim), jnp.float32)
    d_emb = jax.random.normal(k4, (B, step_dim), jnp.float32)

    params = init_params(kp, in_c, out_c, time_dim, cond_dim, step_dim)
    ref = ref_forward(x, t_emb, cond, d_emb, params)

    # f32 MXU operands (safe default, required on v5e).  Tolerance allows for the
    # EUP approximate-reciprocal swish.
    prep32 = prepare_params(params, L)
    out32 = jax.block_until_ready(res_conv_block_forward(x, t_emb, cond, d_emb, prep32))
    assert out32.shape == (B, out_c, L), out32.shape
    err32 = float(jnp.max(jnp.abs(out32 - ref)))
    assert err32 < 3e-2, f"f32 path max abs err {err32}"

    # bf16 MXU operands (recommended on v6e / v7x); GroupNorm stats + elementwise stay f32.
    prep16 = prepare_params(params, L, conv_dtype=jnp.bfloat16)
    out16 = jax.block_until_ready(res_conv_block_forward(x, t_emb, cond, d_emb, prep16))
    err16 = float(jnp.max(jnp.abs(out16 - ref)))
    assert err16 < 1.5e-1, f"bf16 path max abs err {err16}"

    print("KERNEL_OK")
</pallas_src>

<mosaic_0001>
module attributes {stable_mosaic.version = 11 : i64} {
  func.func @_res_conv_kernel(%arg0: i32, %arg1: memref<32x256xf32, #tpu.memory_space<vmem>>, %arg2: memref<1x96x4xf32, #tpu.memory_space<vmem>>, %arg3: memref<32x2xf32, #tpu.memory_space<vmem>>, %arg4: memref<16x2xf32, #tpu.memory_space<vmem>>, %arg5: memref<16x8xf32, #tpu.memory_space<vmem>>, %arg6: memref<32x32xf32, #tpu.memory_space<vmem>>, %arg7: memref<16x16xf32, #tpu.memory_space<vmem>>, %arg8: memref<16x16xf32, #tpu.memory_space<vmem>>, %arg9: memref<16x96xf32, #tpu.memory_space<vmem>>, %arg10: memref<16x48xf32, #tpu.memory_space<vmem>>, %arg11: memref<16x48xf32, #tpu.memory_space<vmem>>, %arg12: memref<16x48xf32, #tpu.memory_space<vmem>>, %arg13: memref<16x32xf32, #tpu.memory_space<vmem>>, %arg14: memref<16x256xf32, #tpu.memory_space<vmem>>, %arg15: memref<96x256xf32, #tpu.memory_space<vmem>>) attributes {dimension_semantics = [#tpu.dimension_semantics<parallel>], iteration_bounds = array<i64: 1>, scalar_prefetch = 0 : i64, scratch_operands = 1 : i64, tpu.core_type = #tpu.core_type<tc>, window_params = [{transform_indices = @transform_0, window_bounds = array<i64: 32, 256>}, {transform_indices = @transform_1, window_bounds = array<i64: 1, 96, 4>}, {pipeline_mode = #tpu.pipeline_mode<synchronous>, transform_indices = @transform_2, window_bounds = array<i64: 32, 2>}, {pipeline_mode = #tpu.pipeline_mode<synchronous>, transform_indices = @transform_3, window_bounds = array<i64: 16, 2>}, {pipeline_mode = #tpu.pipeline_mode<synchronous>, transform_indices = @transform_4, window_bounds = array<i64: 16, 8>}, {pipeline_mode = #tpu.pipeline_mode<synchronous>, transform_indices = @transform_5, window_bounds = array<i64: 32, 32>}, {pipeline_mode = #tpu.pipeline_mode<synchronous>, transform_indices = @transform_6, window_bounds = array<i64: 16, 16>}, {pipeline_mode = #tpu.pipeline_mode<synchronous>, transform_indices = @transform_7, window_bounds = array<i64: 16, 16>}, {pipeline_mode = #tpu.pipeline_mode<synchronous>, transform_indices = @transform_8, window_bounds = array<i64: 16, 96>}, {pipeline_mode = #tpu.pipeline_mode<synchronous>, transform_indices = @transform_9, window_bounds = array<i64: 16, 48>}, {pipeline_mode = #tpu.pipeline_mode<synchronous>, transform_indices = @transform_10, window_bounds = array<i64: 16, 48>}, {pipeline_mode = #tpu.pipeline_mode<synchronous>, transform_indices = @transform_11, window_bounds = array<i64: 16, 48>}, {pipeline_mode = #tpu.pipeline_mode<synchronous>, transform_indices = @transform_12, window_bounds = array<i64: 16, 32>}, {transform_indices = @transform_13, window_bounds = array<i64: 16, 256>}]} {
    %0 = tpu.iota {dimensions = array<i32: 1>} : vector<1x256xi32>
    %c64_i32 = arith.constant 64 : i32
    %c0_i32 = arith.constant 0 : i32
    %1 = arith.cmpi eq, %c64_i32, %c0_i32 : i32
    %c1_i32 = arith.constant 1 : i32
    %2 = arith.select %1, %c1_i32, %c64_i32 : i32
    %3 = vector.broadcast %2 : i32 to vector<1x256xi32>
    %4 = arith.remsi %0, %3 : vector<1x256xi32>
    %c0_i32_0 = arith.constant 0 : i32
    %5 = vector.broadcast %c0_i32_0 : i32 to vector<1x256xi32>
    %6 = arith.cmpi ne, %4, %5 : vector<1x256xi32>
    %c0_i32_1 = arith.constant 0 : i32
    %7 = vector.broadcast %c0_i32_1 : i32 to vector<1x256xi32>
    %8 = arith.cmpi slt, %4, %7 : vector<1x256xi32>
    %c0_i32_2 = arith.constant 0 : i32
    %9 = arith.cmpi slt, %2, %c0_i32_2 : i32
    %10 = vector.broadcast %9 : i1 to vector<1x256xi1>
    %11 = vector.broadcast %10 : vector<1x256xi1> to vector<1x256xi1>
    %12 = arith.xori %8, %11 : vector<1x256xi1>
    %13 = arith.andi %12, %6 : vector<1x256xi1>
    %14 = vector.broadcast %2 : i32 to vector<1x256xi32>
    %15 = arith.addi %4, %14 : vector<1x256xi32>
    %16 = arith.select %13, %15, %4 : vector<1x256xi1>, vector<1x256xi32>
    %c0_i32_3 = arith.constant 0 : i32
    %17 = vector.broadcast %c0_i32_3 : i32 to vector<1x256xi32>
    %18 = arith.cmpi eq, %16, %17 : vector<1x256xi32>
    %c63_i32 = arith.constant 63 : i32
    %19 = vector.broadcast %c63_i32 : i32 to vector<1x256xi32>
    %20 = arith.cmpi eq, %16, %19 : vector<1x256xi32>
    %21 = tpu.iota {dimensions = array<i32: 1>} : vector<4x256xi32>
    %22 = tpu.iota {dimensions = array<i32: 0>} : vector<4x256xi32>
    %c64_i32_4 = arith.constant 64 : i32
    %23 = vector.broadcast %c64_i32_4 : i32 to vector<4x256xi32>
    %24 = arith.muli %22, %23 : vector<4x256xi32>
    %25 = arith.cmpi sge, %21, %24 : vector<4x256xi32>
    %c1_i32_5 = arith.constant 1 : i32
    %26 = vector.broadcast %c1_i32_5 : i32 to vector<4x256xi32>
    %27 = arith.addi %22, %26 : vector<4x256xi32>
    %c64_i32_6 = arith.constant 64 : i32
    %28 = vector.broadcast %c64_i32_6 : i32 to vector<4x256xi32>
    %29 = arith.muli %27, %28 : vector<4x256xi32>
    %30 = arith.cmpi slt, %21, %29 : vector<4x256xi32>
    %31 = arith.andi %25, %30 : vector<4x256xi1>
    %32 = arith.extui %31 : vector<4x256xi1> to vector<4x256xi32>
    %33 = arith.sitofp %32 : vector<4x256xi32> to vector<4x256xf32>
    %34 = tpu.iota {dimensions = array<i32: 0>} : vector<256x4xi32>
    %35 = tpu.iota {dimensions = array<i32: 1>} : vector<256x4xi32>
    %c64_i32_7 = arith.constant 64 : i32
    %36 = vector.broadcast %c64_i32_7 : i32 to vector<256x4xi32>
    %37 = arith.muli %35, %36 : vector<256x4xi32>
    %38 = arith.cmpi sge, %34, %37 : vector<256x4xi32>
    %c1_i32_8 = arith.constant 1 : i32
    %39 = vector.broadcast %c1_i32_8 : i32 to vector<256x4xi32>
    %40 = arith.addi %35, %39 : vector<256x4xi32>
    %c64_i32_9 = arith.constant 64 : i32
    %41 = vector.broadcast %c64_i32_9 : i32 to vector<256x4xi32>
    %42 = arith.muli %40, %41 : vector<256x4xi32>
    %43 = arith.cmpi slt, %34, %42 : vector<256x4xi32>
    %44 = arith.andi %38, %43 : vector<256x4xi1>
    %45 = arith.extui %44 : vector<256x4xi1> to vector<256x4xi32>
    %46 = arith.sitofp %45 : vector<256x4xi32> to vector<256x4xf32>
    %c0 = arith.constant 0 : index
    %c0_10 = arith.constant 0 : index
    %c0_11 = arith.constant 0 : index
    %47 = vector.load %arg2[%c0, %c0_10, %c0_11] : memref<1x96x4xf32, #tpu.memory_space<vmem>>, vector<1x96x4xf32>
    %48 = vector.shape_cast %47 : vector<1x96x4xf32> to vector<96x4xf32>
    %cst = arith.constant dense<0.000000e+00> : vector<96x256xf32>
    %49 = tpu.matmul %48, %33, %cst {dimension_numbers = #tpu.dot_dimension_numbers<[1], [0], [0], [1], [0, 0, 1, 1], [], []>} : vector<96x4xf32>, vector<4x256xf32>, vector<96x256xf32> -> vector<96x256xf32>
    %50 = vector.extract_strided_slice %49 {offsets = [0, 0], sizes = [16, 256], strides = [1, 1]} : vector<96x256xf32> to vector<16x256xf32>
    %51 = vector.extract_strided_slice %49 {offsets = [16, 0], sizes = [16, 256], strides = [1, 1]} : vector<96x256xf32> to vector<16x256xf32>
    %52 = vector.extract_strided_slice %49 {offsets = [32, 0], sizes = [16, 256], strides = [1, 1]} : vector<96x256xf32> to vector<16x256xf32>
    %53 = vector.extract_strided_slice %49 {offsets = [48, 0], sizes = [16, 256], strides = [1, 1]} : vector<96x256xf32> to vector<16x256xf32>
    %54 = vector.extract_strided_slice %49 {offsets = [64, 0], sizes = [16, 256], strides = [1, 1]} : vector<96x256xf32> to vector<16x256xf32>
    %55 = vector.extract_strided_slice %49 {offsets = [80, 0], sizes = [16, 256], strides = [1, 1]} : vector<96x256xf32> to vector<16x256xf32>
    %c0_12 = arith.constant 0 : index
    %c0_13 = arith.constant 0 : index
    %56 = vector.load %arg1[%c0_12, %c0_13] : memref<32x256xf32, #tpu.memory_space<vmem>>, vector<32x256xf32>
    %c0_14 = arith.constant 0 : index
    %c0_15 = arith.constant 0 : index
    %57 = vector.load %arg3[%c0_14, %c0_15] : memref<32x2xf32, #tpu.memory_space<vmem>>, vector<32x2xf32>
    %c0_16 = arith.constant 0 : index
    %c0_17 = arith.constant 0 : index
    %58 = vector.load %arg4[%c0_16, %c0_17] : memref<16x2xf32, #tpu.memory_space<vmem>>, vector<16x2xf32>
    %c0_18 = arith.constant 0 : index
    %c0_19 = arith.constant 0 : index
    %59 = vector.load %arg5[%c0_18, %c0_19] : memref<16x8xf32, #tpu.memory_space<vmem>>, vector<16x8xf32>
    %60 = vector.extract_strided_slice %59 {offsets = [0, 0], sizes = [16, 1], strides = [1, 1]} : vector<16x8xf32> to vector<16x1xf32>
    %61 = vector.extract_strided_slice %59 {offsets = [0, 1], sizes = [16, 1], strides = [1, 1]} : vector<16x8xf32> to vector<16x1xf32>
    %62 = vector.extract_strided_slice %59 {offsets = [0, 2], sizes = [16, 1], strides = [1, 1]} : vector<16x8xf32> to vector<16x1xf32>
    %63 = vector.extract_strided_slice %59 {offsets = [0, 3], sizes = [16, 1], strides = [1, 1]} : vector<16x8xf32> to vector<16x1xf32>
    %64 = vector.extract_strided_slice %59 {offsets = [0, 4], sizes = [16, 1], strides = [1, 1]} : vector<16x8xf32> to vector<16x1xf32>
    %65 = vector.extract_strided_slice %59 {offsets = [0, 5], sizes = [16, 1], strides = [1, 1]} : vector<16x8xf32> to vector<16x1xf32>
    %66 = vector.extract_strided_slice %59 {offsets = [0, 6], sizes = [16, 1], strides = [1, 1]} : vector<16x8xf32> to vector<16x1xf32>
    %67 = vector.extract_strided_slice %59 {offsets = [0, 7], sizes = [16, 1], strides = [1, 1]} : vector<16x8xf32> to vector<16x1xf32>
    %68 = vector.extract_strided_slice %57 {offsets = [0, 0], sizes = [32, 1], strides = [1, 1]} : vector<32x2xf32> to vector<32x1xf32>
    %69 = vector.extract_strided_slice %57 {offsets = [0, 1], sizes = [32, 1], strides = [1, 1]} : vector<32x2xf32> to vector<32x1xf32>
    %cst_20 = arith.constant dense<0.000000e+00> : vector<32x4xf32>
    %70 = tpu.matmul %56, %46, %cst_20 {dimension_numbers = #tpu.dot_dimension_numbers<[1], [0], [0], [1], [0, 0, 1, 1], [], []>} : vector<32x256xf32>, vector<256x4xf32>, vector<32x4xf32> -> vector<32x4xf32>
    %c0_21 = arith.constant 0 : index
    %c0_22 = arith.constant 0 : index
    %71 = vector.load %arg6[%c0_21, %c0_22] : memref<32x32xf32, #tpu.memory_space<vmem>>, vector<32x32xf32>
    %cst_23 = arith.constant dense<0.000000e+00> : vector<32x4xf32>
    %72 = tpu.matmul %71, %70, %cst_23 {dimension_numbers = #tpu.dot_dimension_numbers<[1], [0], [0], [1], [0, 0, 1, 1], [], []>} : vector<32x32xf32>, vector<32x4xf32>, vector<32x4xf32> -> vector<32x4xf32>
    %cst_24 = arith.constant dense<0.000000e+00> : vector<32x256xf32>
    %73 = tpu.matmul %72, %33, %cst_24 {dimension_numbers = #tpu.dot_dimension_numbers<[1], [0], [0], [1], [0, 0, 1, 1], [], []>} : vector<32x4xf32>, vector<4x256xf32>, vector<32x256xf32> -> vector<32x256xf32>
    %74 = arith.subf %56, %73 : vector<32x256xf32>
    %75 = arith.mulf %74, %74 : vector<32x256xf32>
    %cst_25 = arith.constant dense<0.000000e+00> : vector<32x4xf32>
    %76 = tpu.matmul %75, %46, %cst_25 {dimension_numbers = #tpu.dot_dimension_numbers<[1], [0], [0], [1], [0, 0, 1, 1], [], []>} : vector<32x256xf32>, vector<256x4xf32>, vector<32x4xf32> -> vector<32x4xf32>
    %c0_26 = arith.constant 0 : index
    %c0_27 = arith.constant 0 : index
    %77 = vector.load %arg6[%c0_26, %c0_27] : memref<32x32xf32, #tpu.memory_space<vmem>>, vector<32x32xf32>
    %cst_28 = arith.constant dense<0.000000e+00> : vector<32x4xf32>
    %78 = tpu.matmul %77, %76, %cst_28 {dimension_numbers = #tpu.dot_dimension_numbers<[1], [0], [0], [1], [0, 0, 1, 1], [], []>} : vector<32x32xf32>, vector<32x4xf32>, vector<32x4xf32> -> vector<32x4xf32>
    %cst_29 = arith.constant 9.99999974E-6 : f32
    %79 = vector.broadcast %cst_29 : f32 to vector<32x4xf32>
    %80 = arith.addf %78, %79 : vector<32x4xf32>
    %81 = math.rsqrt %80 : vector<32x4xf32>
    %82 = vector.broadcast %68 : vector<32x1xf32> to vector<32x4xf32>
    %83 = arith.mulf %81, %82 : vector<32x4xf32>
    %cst_30 = arith.constant dense<0.000000e+00> : vector<32x256xf32>
    %84 = tpu.matmul %83, %33, %cst_30 {dimension_numbers = #tpu.dot_dimension_numbers<[1], [0], [0], [1], [0, 0, 1, 1], [], []>} : vector<32x4xf32>, vector<4x256xf32>, vector<32x256xf32> -> vector<32x256xf32>
    %85 = arith.mulf %74, %84 : vector<32x256xf32>
    %86 = vector.broadcast %69 : vector<32x1xf32> to vector<32x256xf32>
    %87 = arith.addf %85, %86 : vector<32x256xf32>
    %cst_31 = arith.constant 0.000000e+00 : f32
    %88 = vector.broadcast %cst_31 : f32 to vector<32x256xf32>
    %89 = arith.subf %88, %87 : vector<32x256xf32>
    %90 = math.exp %89 : vector<32x256xf32>
    %cst_32 = arith.constant 1.000000e+00 : f32
    %91 = vector.broadcast %cst_32 : f32 to vector<32x256xf32>
    %92 = arith.addf %91, %90 : vector<32x256xf32>
    %93 = tpu.reciprocal %92 {approx = true} : vector<32x256xf32> -> vector<32x256xf32>
    %94 = arith.mulf %87, %93 : vector<32x256xf32>
    %c1_i32_33 = arith.constant 1 : i32
    %95 = tpu.dynamic_rotate %94 by %c1_i32_33 dim 1 : vector<32x256xf32>, i32 -> vector<32x256xf32>
    %cst_34 = arith.constant 0.000000e+00 : f32
    %96 = vector.shape_cast %18 : vector<1x256xi1> to vector<1x256xi1>
    %97 = vector.broadcast %96 : vector<1x256xi1> to vector<32x256xi1>
    %98 = vector.broadcast %cst_34 : f32 to vector<32x256xf32>
    %99 = arith.select %97, %98, %95 : vector<32x256xi1>, vector<32x256xf32>
    %c255_i32 = arith.constant 255 : i32
    %100 = tpu.dynamic_rotate %94 by %c255_i32 dim 1 : vector<32x256xf32>, i32 -> vector<32x256xf32>
    %cst_35 = arith.constant 0.000000e+00 : f32
    %101 = vector.shape_cast %20 : vector<1x256xi1> to vector<1x256xi1>
    %102 = vector.broadcast %101 : vector<1x256xi1> to vector<32x256xi1>
    %103 = vector.broadcast %cst_35 : f32 to vector<32x256xf32>
    %104 = arith.select %102, %103, %100 : vector<32x256xi1>, vector<32x256xf32>
    %c0_36 = arith.constant 0 : index
    %c0_37 = arith.constant 0 : index
    %105 = vector.load %arg15[%c0_36, %c0_37] : memref<96x256xf32, #tpu.memory_space<vmem>>, vector<32x256xf32>
    tpu.vector_store %arg15[%c0_36, %c0_37], %99 {strides = array<i32>} : memref<96x256xf32, #tpu.memory_space<vmem>>, vector<32x256xf32>,
    %c32 = arith.constant 32 : index
    %c0_38 = arith.constant 0 : index
    %106 = vector.load %arg15[%c32, %c0_38] : memref<96x256xf32, #tpu.memory_space<vmem>>, vector<32x256xf32>
    tpu.vector_store %arg15[%c32, %c0_38], %94 {strides = array<i32>} : memref<96x256xf32, #tpu.memory_space<vmem>>, vector<32x256xf32>,
    %c64 = arith.constant 64 : index
    %c0_39 = arith.constant 0 : index
    %107 = vector.load %arg15[%c64, %c0_39] : memref<96x256xf32, #tpu.memory_space<vmem>>, vector<32x256xf32>
    tpu.vector_store %arg15[%c64, %c0_39], %104 {strides = array<i32>} : memref<96x256xf32, #tpu.memory_space<vmem>>, vector<32x256xf32>,
    %c0_40 = arith.constant 0 : index
    %c0_41 = arith.constant 0 : index
    %108 = vector.load %arg9[%c0_40, %c0_41] : memref<16x96xf32, #tpu.memory_space<vmem>>, vector<16x96xf32>
    %c0_42 = arith.constant 0 : index
    %c0_43 = arith.constant 0 : index
    %109 = vector.load %arg15[%c0_42, %c0_43] : memref<96x256xf32, #tpu.memory_space<vmem>>, vector<96x256xf32>
    %cst_44 = arith.constant dense<0.000000e+00> : vector<16x256xf32>
    %110 = tpu.matmul %108, %109, %cst_44 {dimension_numbers = #tpu.dot_dimension_numbers<[1], [0], [0], [1], [0, 0, 1, 1], [], []>} : vector<16x96xf32>, vector<96x256xf32>, vector<16x256xf32> -> vector<16x256xf32>
    %111 = vector.broadcast %64 : vector<16x1xf32> to vector<16x256xf32>
    %112 = arith.addf %110, %111 : vector<16x256xf32>
    %113 = vector.extract_strided_slice %58 {offsets = [0, 0], sizes = [16, 1], strides = [1, 1]} : vector<16x2xf32> to vector<16x1xf32>
    %114 = vector.extract_strided_slice %58 {offsets = [0, 1], sizes = [16, 1], strides = [1, 1]} : vector<16x2xf32> to vector<16x1xf32>
    %cst_45 = arith.constant dense<0.000000e+00> : vector<16x4xf32>
    %115 = tpu.matmul %112, %46, %cst_45 {dimension_numbers = #tpu.dot_dimension_numbers<[1], [0], [0], [1], [0, 0, 1, 1], [], []>} : vector<16x256xf32>, vector<256x4xf32>, vector<16x4xf32> -> vector<16x4xf32>
    %c0_46 = arith.constant 0 : index
    %c0_47 = arith.constant 0 : index
    %116 = vector.load %arg7[%c0_46, %c0_47] : memref<16x16xf32, #tpu.memory_space<vmem>>, vector<16x16xf32>
    %cst_48 = arith.constant dense<0.000000e+00> : vector<16x4xf32>
    %117 = tpu.matmul %116, %115, %cst_48 {dimension_numbers = #tpu.dot_dimension_numbers<[1], [0], [0], [1], [0, 0, 1, 1], [], []>} : vector<16x16xf32>, vector<16x4xf32>, vector<16x4xf32> -> vector<16x4xf32>
    %cst_49 = arith.constant dense<0.000000e+00> : vector<16x256xf32>
    %118 = tpu.matmul %117, %33, %cst_49 {dimension_numbers = #tpu.dot_dimension_numbers<[1], [0], [0], [1], [0, 0, 1, 1], [], []>} : vector<16x4xf32>, vector<4x256xf32>, vector<16x256xf32> -> vector<16x256xf32>
    %119 = arith.subf %112, %118 : vector<16x256xf32>
    %120 = arith.mulf %119, %119 : vector<16x256xf32>
    %cst_50 = arith.constant dense<0.000000e+00> : vector<16x4xf32>
    %121 = tpu.matmul %120, %46, %cst_50 {dimension_numbers = #tpu.dot_dimension_numbers<[1], [0], [0], [1], [0, 0, 1, 1], [], []>} : vector<16x256xf32>, vector<256x4xf32>, vector<16x4xf32> -> vector<16x4xf32>
    %c0_51 = arith.constant 0 : index
    %c0_52 = arith.constant 0 : index
    %122 = vector.load %arg7[%c0_51, %c0_52] : memref<16x16xf32, #tpu.memory_space<vmem>>, vector<16x16xf32>
    %cst_53 = arith.constant dense<0.000000e+00> : vector<16x4xf32>
    %123 = tpu.matmul %122, %121, %cst_53 {dimension_numbers = #tpu.dot_dimension_numbers<[1], [0], [0], [1], [0, 0, 1, 1], [], []>} : vector<16x16xf32>, vector<16x4xf32>, vector<16x4xf32> -> vector<16x4xf32>
    %cst_54 = arith.constant 9.99999974E-6 : f32
    %124 = vector.broadcast %cst_54 : f32 to vector<16x4xf32>
    %125 = arith.addf %123, %124 : vector<16x4xf32>
    %126 = math.rsqrt %125 : vector<16x4xf32>
    %127 = vector.broadcast %113 : vector<16x1xf32> to vector<16x4xf32>
    %128 = arith.mulf %126, %127 : vector<16x4xf32>
    %cst_55 = arith.constant dense<0.000000e+00> : vector<16x256xf32>
    %129 = tpu.matmul %128, %33, %cst_55 {dimension_numbers = #tpu.dot_dimension_numbers<[1], [0], [0], [1], [0, 0, 1, 1], [], []>} : vector<16x4xf32>, vector<4x256xf32>, vector<16x256xf32> -> vector<16x256xf32>
    %130 = arith.mulf %119, %129 : vector<16x256xf32>
    %131 = vector.broadcast %114 : vector<16x1xf32> to vector<16x256xf32>
    %132 = arith.addf %130, %131 : vector<16x256xf32>
    %cst_56 = arith.constant 0.000000e+00 : f32
    %133 = vector.broadcast %cst_56 : f32 to vector<16x256xf32>
    %134 = arith.subf %133, %132 : vector<16x256xf32>
    %135 = math.exp %134 : vector<16x256xf32>
    %cst_57 = arith.constant 1.000000e+00 : f32
    %136 = vector.broadcast %cst_57 : f32 to vector<16x256xf32>
    %137 = arith.addf %136, %135 : vector<16x256xf32>
    %138 = tpu.reciprocal %137 {approx = true} : vector<16x256xf32> -> vector<16x256xf32>
    %139 = arith.mulf %132, %138 : vector<16x256xf32>
    %c1_i32_58 = arith.constant 1 : i32
    %140 = tpu.dynamic_rotate %139 by %c1_i32_58 dim 1 : vector<16x256xf32>, i32 -> vector<16x256xf32>
    %cst_59 = arith.constant 0.000000e+00 : f32
    %141 = vector.shape_cast %18 : vector<1x256xi1> to vector<1x256xi1>
    %142 = vector.broadcast %141 : vector<1x256xi1> to vector<16x256xi1>
    %143 = vector.broadcast %cst_59 : f32 to vector<16x256xf32>
    %144 = arith.select %142, %143, %140 : vector<16x256xi1>, vector<16x256xf32>
    %c255_i32_60 = arith.constant 255 : i32
    %145 = tpu.dynamic_rotate %139 by %c255_i32_60 dim 1 : vector<16x256xf32>, i32 -> vector<16x256xf32>
    %cst_61 = arith.constant 0.000000e+00 : f32
    %146 = vector.shape_cast %20 : vector<1x256xi1> to vector<1x256xi1>
    %147 = vector.broadcast %146 : vector<1x256xi1> to vector<16x256xi1>
    %148 = vector.broadcast %cst_61 : f32 to vector<16x256xf32>
    %149 = arith.select %147, %148, %145 : vector<16x256xi1>, vector<16x256xf32>
    %c0_62 = arith.constant 0 : index
    %c0_63 = arith.constant 0 : index
    %150 = vector.load %arg15[%c0_62, %c0_63] : memref<96x256xf32, #tpu.memory_space<vmem>>, vector<16x256xf32>
    tpu.vector_store %arg15[%c0_62, %c0_63], %144 {strides = array<i32>} : memref<96x256xf32, #tpu.memory_space<vmem>>, vector<16x256xf32>,
    %c16 = arith.constant 16 : index
    %c0_64 = arith.constant 0 : index
    %151 = vector.load %arg15[%c16, %c0_64] : memref<96x256xf32, #tpu.memory_space<vmem>>, vector<16x256xf32>
    tpu.vector_store %arg15[%c16, %c0_64], %139 {strides = array<i32>} : memref<96x256xf32, #tpu.memory_space<vmem>>, vector<16x256xf32>,
    %c32_65 = arith.constant 32 : index
    %c0_66 = arith.constant 0 : index
    %152 = vector.load %arg15[%c32_65, %c0_66] : memref<96x256xf32, #tpu.memory_space<vmem>>, vector<16x256xf32>
    tpu.vector_store %arg15[%c32_65, %c0_66], %149 {strides = array<i32>} : memref<96x256xf32, #tpu.memory_space<vmem>>, vector<16x256xf32>,
    %c0_67 = arith.constant 0 : index
    %c0_68 = arith.constant 0 : index
    %153 = vector.load %arg10[%c0_67, %c0_68] : memref<16x48xf32, #tpu.memory_space<vmem>>, vector<16x48xf32>
    %c0_69 = arith.constant 0 : index
    %c0_70 = arith.constant 0 : index
    %154 = vector.load %arg15[%c0_69, %c0_70] : memref<96x256xf32, #tpu.memory_space<vmem>>, vector<48x256xf32>
    %cst_71 = arith.constant dense<0.000000e+00> : vector<16x256xf32>
    %155 = tpu.matmul %153, %154, %cst_71 {dimension_numbers = #tpu.dot_dimension_numbers<[1], [0], [0], [1], [0, 0, 1, 1], [], []>} : vector<16x48xf32>, vector<48x256xf32>, vector<16x256xf32> -> vector<16x256xf32>
    %156 = arith.addf %155, %50 : vector<16x256xf32>
    %cst_72 = arith.constant 0.000000e+00 : f32
    %157 = vector.shape_cast %18 : vector<1x256xi1> to vector<1x256xi1>
    %158 = vector.broadcast %157 : vector<1x256xi1> to vector<16x256xi1>
    %159 = vector.broadcast %cst_72 : f32 to vector<16x256xf32>
    %160 = arith.select %158, %51, %159 : vector<16x256xi1>, vector<16x256xf32>
    %161 = arith.subf %156, %160 : vector<16x256xf32>
    %cst_73 = arith.constant 0.000000e+00 : f32
    %162 = vector.shape_cast %20 : vector<1x256xi1> to vector<1x256xi1>
    %163 = vector.broadcast %162 : vector<1x256xi1> to vector<16x256xi1>
    %164 = vector.broadcast %cst_73 : f32 to vector<16x256xf32>
    %165 = arith.select %163, %52, %164 : vector<16x256xi1>, vector<16x256xf32>
    %166 = arith.subf %161, %165 : vector<16x256xf32>
    %167 = arith.mulf %166, %53 : vector<16x256xf32>
    %168 = arith.addf %167, %54 : vector<16x256xf32>
    %cst_74 = arith.constant dense<0.000000e+00> : vector<16x4xf32>
    %169 = tpu.matmul %168, %46, %cst_74 {dimension_numbers = #tpu.dot_dimension_numbers<[1], [0], [0], [1], [0, 0, 1, 1], [], []>} : vector<16x256xf32>, vector<256x4xf32>, vector<16x4xf32> -> vector<16x4xf32>
    %c0_75 = arith.constant 0 : index
    %c0_76 = arith.constant 0 : index
    %170 = vector.load %arg8[%c0_75, %c0_76] : memref<16x16xf32, #tpu.memory_space<vmem>>, vector<16x16xf32>
    %cst_77 = arith.constant dense<0.000000e+00> : vector<16x4xf32>
    %171 = tpu.matmul %170, %169, %cst_77 {dimension_numbers = #tpu.dot_dimension_numbers<[1], [0], [0], [1], [0, 0, 1, 1], [], []>} : vector<16x16xf32>, vector<16x4xf32>, vector<16x4xf32> -> vector<16x4xf32>
    %cst_78 = arith.constant dense<0.000000e+00> : vector<16x256xf32>
    %172 = tpu.matmul %171, %33, %cst_78 {dimension_numbers = #tpu.dot_dimension_numbers<[1], [0], [0], [1], [0, 0, 1, 1], [], []>} : vector<16x4xf32>, vector<4x256xf32>, vector<16x256xf32> -> vector<16x256xf32>
    %173 = arith.subf %168, %172 : vector<16x256xf32>
    %174 = arith.mulf %173, %173 : vector<16x256xf32>
    %cst_79 = arith.constant dense<0.000000e+00> : vector<16x4xf32>
    %175 = tpu.matmul %174, %46, %cst_79 {dimension_numbers = #tpu.dot_dimension_numbers<[1], [0], [0], [1], [0, 0, 1, 1], [], []>} : vector<16x256xf32>, vector<256x4xf32>, vector<16x4xf32> -> vector<16x4xf32>
    %c0_80 = arith.constant 0 : index
    %c0_81 = arith.constant 0 : index
    %176 = vector.load %arg8[%c0_80, %c0_81] : memref<16x16xf32, #tpu.memory_space<vmem>>, vector<16x16xf32>
    %cst_82 = arith.constant dense<0.000000e+00> : vector<16x4xf32>
    %177 = tpu.matmul %176, %175, %cst_82 {dimension_numbers = #tpu.dot_dimension_numbers<[1], [0], [0], [1], [0, 0, 1, 1], [], []>} : vector<16x16xf32>, vector<16x4xf32>, vector<16x4xf32> -> vector<16x4xf32>
    %cst_83 = arith.constant 9.99999974E-6 : f32
    %178 = vector.broadcast %cst_83 : f32 to vector<16x4xf32>
    %179 = arith.addf %177, %178 : vector<16x4xf32>
    %180 = math.rsqrt %179 : vector<16x4xf32>
    %181 = vector.broadcast %60 : vector<16x1xf32> to vector<16x4xf32>
    %182 = arith.mulf %180, %181 : vector<16x4xf32>
    %cst_84 = arith.constant dense<0.000000e+00> : vector<16x256xf32>
    %183 = tpu.matmul %182, %33, %cst_84 {dimension_numbers = #tpu.dot_dimension_numbers<[1], [0], [0], [1], [0, 0, 1, 1], [], []>} : vector<16x4xf32>, vector<4x256xf32>, vector<16x256xf32> -> vector<16x256xf32>
    %184 = arith.mulf %173, %183 : vector<16x256xf32>
    %185 = vector.broadcast %61 : vector<16x1xf32> to vector<16x256xf32>
    %186 = arith.addf %184, %185 : vector<16x256xf32>
    %cst_85 = arith.constant 0.000000e+00 : f32
    %187 = vector.broadcast %cst_85 : f32 to vector<16x256xf32>
    %188 = arith.subf %187, %186 : vector<16x256xf32>
    %189 = math.exp %188 : vector<16x256xf32>
    %cst_86 = arith.constant 1.000000e+00 : f32
    %190 = vector.broadcast %cst_86 : f32 to vector<16x256xf32>
    %191 = arith.addf %190, %189 : vector<16x256xf32>
    %192 = tpu.reciprocal %191 {approx = true} : vector<16x256xf32> -> vector<16x256xf32>
    %193 = arith.mulf %186, %192 : vector<16x256xf32>
    %c1_i32_87 = arith.constant 1 : i32
    %194 = tpu.dynamic_rotate %193 by %c1_i32_87 dim 1 : vector<16x256xf32>, i32 -> vector<16x256xf32>
    %cst_88 = arith.constant 0.000000e+00 : f32
    %195 = vector.shape_cast %18 : vector<1x256xi1> to vector<1x256xi1>
    %196 = vector.broadcast %195 : vector<1x256xi1> to vector<16x256xi1>
    %197 = vector.broadcast %cst_88 : f32 to vector<16x256xf32>
    %198 = arith.select %196, %197, %194 : vector<16x256xi1>, vector<16x256xf32>
    %c255_i32_89 = arith.constant 255 : i32
    %199 = tpu.dynamic_rotate %193 by %c255_i32_89 dim 1 : vector<16x256xf32>, i32 -> vector<16x256xf32>
    %cst_90 = arith.constant 0.000000e+00 : f32
    %200 = vector.shape_cast %20 : vector<1x256xi1> to vector<1x256xi1>
    %201 = vector.broadcast %200 : vector<1x256xi1> to vector<16x256xi1>
    %202 = vector.broadcast %cst_90 : f32 to vector<16x256xf32>
    %203 = arith.select %201, %202, %199 : vector<16x256xi1>, vector<16x256xf32>
    %c0_91 = arith.constant 0 : index
    %c0_92 = arith.constant 0 : index
    %204 = vector.load %arg15[%c0_91, %c0_92] : memref<96x256xf32, #tpu.memory_space<vmem>>, vector<16x256xf32>
    tpu.vector_store %arg15[%c0_91, %c0_92], %198 {strides = array<i32>} : memref<96x256xf32, #tpu.memory_space<vmem>>, vector<16x256xf32>,
    %c16_93 = arith.constant 16 : index
    %c0_94 = arith.constant 0 : index
    %205 = vector.load %arg15[%c16_93, %c0_94] : memref<96x256xf32, #tpu.memory_space<vmem>>, vector<16x256xf32>
    tpu.vector_store %arg15[%c16_93, %c0_94], %193 {strides = array<i32>} : memref<96x256xf32, #tpu.memory_space<vmem>>, vector<16x256xf32>,
    %c32_95 = arith.constant 32 : index
    %c0_96 = arith.constant 0 : index
    %206 = vector.load %arg15[%c32_95, %c0_96] : memref<96x256xf32, #tpu.memory_space<vmem>>, vector<16x256xf32>
    tpu.vector_store %arg15[%c32_95, %c0_96], %203 {strides = array<i32>} : memref<96x256xf32, #tpu.memory_space<vmem>>, vector<16x256xf32>,
    %c0_97 = arith.constant 0 : index
    %c0_98 = arith.constant 0 : index
    %207 = vector.load %arg11[%c0_97, %c0_98] : memref<16x48xf32, #tpu.memory_space<vmem>>, vector<16x48xf32>
    %c0_99 = arith.constant 0 : index
    %c0_100 = arith.constant 0 : index
    %208 = vector.load %arg15[%c0_99, %c0_100] : memref<96x256xf32, #tpu.memory_space<vmem>>, vector<48x256xf32>
    %cst_101 = arith.constant dense<0.000000e+00> : vector<16x256xf32>
    %209 = tpu.matmul %207, %208, %cst_101 {dimension_numbers = #tpu.dot_dimension_numbers<[1], [0], [0], [1], [0, 0, 1, 1], [], []>} : vector<16x48xf32>, vector<48x256xf32>, vector<16x256xf32> -> vector<16x256xf32>
    %210 = vector.broadcast %65 : vector<16x1xf32> to vector<16x256xf32>
    %211 = arith.addf %209, %210 : vector<16x256xf32>
    %cst_102 = arith.constant 1.000000e+00 : f32
    %212 = vector.broadcast %cst_102 : f32 to vector<16x256xf32>
    %213 = arith.addf %55, %212 : vector<16x256xf32>
    %214 = arith.mulf %211, %213 : vector<16x256xf32>
    %215 = arith.addf %214, %55 : vector<16x256xf32>
    %cst_103 = arith.constant dense<0.000000e+00> : vector<16x4xf32>
    %216 = tpu.matmul %215, %46, %cst_103 {dimension_numbers = #tpu.dot_dimension_numbers<[1], [0], [0], [1], [0, 0, 1, 1], [], []>} : vector<16x256xf32>, vector<256x4xf32>, vector<16x4xf32> -> vector<16x4xf32>
    %c0_104 = arith.constant 0 : index
    %c0_105 = arith.constant 0 : index
    %217 = vector.load %arg8[%c0_104, %c0_105] : memref<16x16xf32, #tpu.memory_space<vmem>>, vector<16x16xf32>
    %cst_106 = arith.constant dense<0.000000e+00> : vector<16x4xf32>
    %218 = tpu.matmul %217, %216, %cst_106 {dimension_numbers = #tpu.dot_dimension_numbers<[1], [0], [0], [1], [0, 0, 1, 1], [], []>} : vector<16x16xf32>, vector<16x4xf32>, vector<16x4xf32> -> vector<16x4xf32>
    %cst_107 = arith.constant dense<0.000000e+00> : vector<16x256xf32>
    %219 = tpu.matmul %218, %33, %cst_107 {dimension_numbers = #tpu.dot_dimension_numbers<[1], [0], [0], [1], [0, 0, 1, 1], [], []>} : vector<16x4xf32>, vector<4x256xf32>, vector<16x256xf32> -> vector<16x256xf32>
    %220 = arith.subf %215, %219 : vector<16x256xf32>
    %221 = arith.mulf %220, %220 : vector<16x256xf32>
    %cst_108 = arith.constant dense<0.000000e+00> : vector<16x4xf32>
    %222 = tpu.matmul %221, %46, %cst_108 {dimension_numbers = #tpu.dot_dimension_numbers<[1], [0], [0], [1], [0, 0, 1, 1], [], []>} : vector<16x256xf32>, vector<256x4xf32>, vector<16x4xf32> -> vector<16x4xf32>
    %c0_109 = arith.constant 0 : index
    %c0_110 = arith.constant 0 : index
    %223 = vector.load %arg8[%c0_109, %c0_110] : memref<16x16xf32, #tpu.memory_space<vmem>>, vector<16x16xf32>
    %cst_111 = arith.constant dense<0.000000e+00> : vector<16x4xf32>
    %224 = tpu.matmul %223, %222, %cst_111 {dimension_numbers = #tpu.dot_dimension_numbers<[1], [0], [0], [1], [0, 0, 1, 1], [], []>} : vector<16x16xf32>, vector<16x4xf32>, vector<16x4xf32> -> vector<16x4xf32>
    %cst_112 = arith.constant 9.99999974E-6 : f32
    %225 = vector.broadcast %cst_112 : f32 to vector<16x4xf32>
    %226 = arith.addf %224, %225 : vector<16x4xf32>
    %227 = math.rsqrt %226 : vector<16x4xf32>
    %228 = vector.broadcast %62 : vector<16x1xf32> to vector<16x4xf32>
    %229 = arith.mulf %227, %228 : vector<16x4xf32>
    %cst_113 = arith.constant dense<0.000000e+00> : vector<16x256xf32>
    %230 = tpu.matmul %229, %33, %cst_113 {dimension_numbers = #tpu.dot_dimension_numbers<[1], [0], [0], [1], [0, 0, 1, 1], [], []>} : vector<16x4xf32>, vector<4x256xf32>, vector<16x256xf32> -> vector<16x256xf32>
    %231 = arith.mulf %220, %230 : vector<16x256xf32>
    %232 = vector.broadcast %63 : vector<16x1xf32> to vector<16x256xf32>
    %233 = arith.addf %231, %232 : vector<16x256xf32>
    %cst_114 = arith.constant 0.000000e+00 : f32
    %234 = vector.broadcast %cst_114 : f32 to vector<16x256xf32>
    %235 = arith.subf %234, %233 : vector<16x256xf32>
    %236 = math.exp %235 : vector<16x256xf32>
    %cst_115 = arith.constant 1.000000e+00 : f32
    %237 = vector.broadcast %cst_115 : f32 to vector<16x256xf32>
    %238 = arith.addf %237, %236 : vector<16x256xf32>
    %239 = tpu.reciprocal %238 {approx = true} : vector<16x256xf32> -> vector<16x256xf32>
    %240 = arith.mulf %233, %239 : vector<16x256xf32>
    %c1_i32_116 = arith.constant 1 : i32
    %241 = tpu.dynamic_rotate %240 by %c1_i32_116 dim 1 : vector<16x256xf32>, i32 -> vector<16x256xf32>
    %cst_117 = arith.constant 0.000000e+00 : f32
    %242 = vector.shape_cast %18 : vector<1x256xi1> to vector<1x256xi1>
    %243 = vector.broadcast %242 : vector<1x256xi1> to vector<16x256xi1>
    %244 = vector.broadcast %cst_117 : f32 to vector<16x256xf32>
    %245 = arith.select %243, %244, %241 : vector<16x256xi1>, vector<16x256xf32>
    %c255_i32_118 = arith.constant 255 : i32
    %246 = tpu.dynamic_rotate %240 by %c255_i32_118 dim 1 : vector<16x256xf32>, i32 -> vector<16x256xf32>
    %cst_119 = arith.constant 0.000000e+00 : f32
    %247 = vector.shape_cast %20 : vector<1x256xi1> to vector<1x256xi1>
    %248 = vector.broadcast %247 : vector<1x256xi1> to vector<16x256xi1>
    %249 = vector.broadcast %cst_119 : f32 to vector<16x256xf32>
    %250 = arith.select %248, %249, %246 : vector<16x256xi1>, vector<16x256xf32>
    %c0_120 = arith.constant 0 : index
    %c0_121 = arith.constant 0 : index
    %251 = vector.load %arg15[%c0_120, %c0_121] : memref<96x256xf32, #tpu.memory_space<vmem>>, vector<16x256xf32>
    tpu.vector_store %arg15[%c0_120, %c0_121], %245 {strides = array<i32>} : memref<96x256xf32, #tpu.memory_space<vmem>>, vector<16x256xf32>,
    %c16_122 = arith.constant 16 : index
    %c0_123 = arith.constant 0 : index
    %252 = vector.load %arg15[%c16_122, %c0_123] : memref<96x256xf32, #tpu.memory_space<vmem>>, vector<16x256xf32>
    tpu.vector_store %arg15[%c16_122, %c0_123], %240 {strides = array<i32>} : memref<96x256xf32, #tpu.memory_space<vmem>>, vector<16x256xf32>,
    %c32_124 = arith.constant 32 : index
    %c0_125 = arith.constant 0 : index
    %253 = vector.load %arg15[%c32_124, %c0_125] : memref<96x256xf32, #tpu.memory_space<vmem>>, vector<16x256xf32>
    tpu.vector_store %arg15[%c32_124, %c0_125], %250 {strides = array<i32>} : memref<96x256xf32, #tpu.memory_space<vmem>>, vector<16x256xf32>,
    %c0_126 = arith.constant 0 : index
    %c0_127 = arith.constant 0 : index
    %254 = vector.load %arg12[%c0_126, %c0_127] : memref<16x48xf32, #tpu.memory_space<vmem>>, vector<16x48xf32>
    %c0_128 = arith.constant 0 : index
    %c0_129 = arith.constant 0 : index
    %255 = vector.load %arg15[%c0_128, %c0_129] : memref<96x256xf32, #tpu.memory_space<vmem>>, vector<48x256xf32>
    %cst_130 = arith.constant dense<0.000000e+00> : vector<16x256xf32>
    %256 = tpu.matmul %254, %255, %cst_130 {dimension_numbers = #tpu.dot_dimension_numbers<[1], [0], [0], [1], [0, 0, 1, 1], [], []>} : vector<16x48xf32>, vector<48x256xf32>, vector<16x256xf32> -> vector<16x256xf32>
    %257 = vector.broadcast %66 : vector<16x1xf32> to vector<16x256xf32>
    %258 = arith.addf %256, %257 : vector<16x256xf32>
    %c0_131 = arith.constant 0 : index
    %c0_132 = arith.constant 0 : index
    %259 = vector.load %arg13[%c0_131, %c0_132] : memref<16x32xf32, #tpu.memory_space<vmem>>, vector<16x32xf32>
    %cst_133 = arith.constant dense<0.000000e+00> : vector<16x256xf32>
    %260 = tpu.matmul %259, %56, %cst_133 {dimension_numbers = #tpu.dot_dimension_numbers<[1], [0], [0], [1], [0, 0, 1, 1], [], []>} : vector<16x32xf32>, vector<32x256xf32>, vector<16x256xf32> -> vector<16x256xf32>
    %261 = vector.broadcast %67 : vector<16x1xf32> to vector<16x256xf32>
    %262 = arith.addf %260, %261 : vector<16x256xf32>
    %263 = arith.addf %258, %262 : vector<16x256xf32>
    %c0_134 = arith.constant 0 : index
    %c0_135 = arith.constant 0 : index
    %264 = vector.load %arg14[%c0_134, %c0_135] : memref<16x256xf32, #tpu.memory_space<vmem>>, vector<16x256xf32>
    tpu.vector_store %arg14[%c0_134, %c0_135], %263 {strides = array<i32>} : memref<16x256xf32, #tpu.memory_space<vmem>>, vector<16x256xf32>,
    return
  }
  func.func @transform_0(%arg0: i32) -> (i32, i32) {
    %c0_i32 = arith.constant 0 : i32
    %c0_i32_0 = arith.constant 0 : i32
    return %c0_i32, %arg0 : i32, i32
  }
  func.func @transform_1(%arg0: i32) -> (i32, i32, i32) {
    %c0_i32 = arith.constant 0 : i32
    %c0_i32_0 = arith.constant 0 : i32
    %c0_i32_1 = arith.constant 0 : i32
    return %arg0, %c0_i32, %c0_i32_0 : i32, i32, i32
  }
  func.func @transform_2(%arg0: i32) -> (i32, i32) {
    %c0_i32 = arith.constant 0 : i32
    %c0_i32_0 = arith.constant 0 : i32
    %c0_i32_1 = arith.constant 0 : i32
    return %c0_i32, %c0_i32_0 : i32, i32
  }
  func.func @transform_3(%arg0: i32) -> (i32, i32) {
    %c0_i32 = arith.constant 0 : i32
    %c0_i32_0 = arith.constant 0 : i32
    %c0_i32_1 = arith.constant 0 : i32
    return %c0_i32, %c0_i32_0 : i32, i32
  }
  func.func @transform_4(%arg0: i32) -> (i32, i32) {
    %c0_i32 = arith.constant 0 : i32
    %c0_i32_0 = arith.constant 0 : i32
    %c0_i32_1 = arith.constant 0 : i32
    return %c0_i32, %c0_i32_0 : i32, i32
  }
  func.func @transform_5(%arg0: i32) -> (i32, i32) {
    %c0_i32 = arith.constant 0 : i32
    %c0_i32_0 = arith.constant 0 : i32
    %c0_i32_1 = arith.constant 0 : i32
    return %c0_i32, %c0_i32_0 : i32, i32
  }
  func.func @transform_6(%arg0: i32) -> (i32, i32) {
    %c0_i32 = arith.constant 0 : i32
    %c0_i32_0 = arith.constant 0 : i32
    %c0_i32_1 = arith.constant 0 : i32
    return %c0_i32, %c0_i32_0 : i32, i32
  }
  func.func @transform_7(%arg0: i32) -> (i32, i32) {
    %c0_i32 = arith.constant 0 : i32
    %c0_i32_0 = arith.constant 0 : i32
    %c0_i32_1 = arith.constant 0 : i32
    return %c0_i32, %c0_i32_0 : i32, i32
  }
  func.func @transform_8(%arg0: i32) -> (i32, i32) {
    %c0_i32 = arith.constant 0 : i32
    %c0_i32_0 = arith.constant 0 : i32
    %c0_i32_1 = arith.constant 0 : i32
    return %c0_i32, %c0_i32_0 : i32, i32
  }
  func.func @transform_9(%arg0: i32) -> (i32, i32) {
    %c0_i32 = arith.constant 0 : i32
    %c0_i32_0 = arith.constant 0 : i32
    %c0_i32_1 = arith.constant 0 : i32
    return %c0_i32, %c0_i32_0 : i32, i32
  }
  func.func @transform_10(%arg0: i32) -> (i32, i32) {
    %c0_i32 = arith.constant 0 : i32
    %c0_i32_0 = arith.constant 0 : i32
    %c0_i32_1 = arith.constant 0 : i32
    return %c0_i32, %c0_i32_0 : i32, i32
  }
  func.func @transform_11(%arg0: i32) -> (i32, i32) {
    %c0_i32 = arith.constant 0 : i32
    %c0_i32_0 = arith.constant 0 : i32
    %c0_i32_1 = arith.constant 0 : i32
    return %c0_i32, %c0_i32_0 : i32, i32
  }
  func.func @transform_12(%arg0: i32) -> (i32, i32) {
    %c0_i32 = arith.constant 0 : i32
    %c0_i32_0 = arith.constant 0 : i32
    %c0_i32_1 = arith.constant 0 : i32
    return %c0_i32, %c0_i32_0 : i32, i32
  }
  func.func @transform_13(%arg0: i32) -> (i32, i32) {
    %c0_i32 = arith.constant 0 : i32
    %c0_i32_0 = arith.constant 0 : i32
    return %c0_i32, %arg0 : i32, i32
  }
}

</mosaic_0001>

<bundles_post_ra>
// kernel: tpu_custom_call.1
= control target key start
LH: loop header
LB: loop body
LE: loop exit
PB: predicated region body
PF: predicated region fallthrough
CT: control target
= control target key end

     0   :  { %v45_v0 = vlaneseq  ;;  %s6630_s0 = inlined_call_operand.vmem [shape: f32[32,256], index: 0, kind: input, shape index: {}]   ;;  %s6631_s1 = inlined_call_operand.vmem [shape: f32[1,96,4], index: 1, kind: input, shape index: {}]   ;;  %s6632_s2 = inlined_call_operand.vmem [shape: f32[32,2], index: 2, kind: input, shape index: {}]   ;;  %s6633_s3 = inlined_call_operand.vmem [shape: f32[16,2], index: 3, kind: input, shape index: {}]   ;;  %s6634_s4 = inlined_call_operand.vmem [shape: f32[16,8], index: 4, kind: input, shape index: {}]   ;;  %s6635_s5 = inlined_call_operand.vmem [shape: f32[32,32], index: 5, kind: input, shape index: {}]   ;;  %s6636_s6 = inlined_call_operand.vmem [shape: f32[16,16], index: 6, kind: input, shape index: {}]   ;;  %s6637_s7 = inlined_call_operand.vmem [shape: f32[16,16], index: 7, kind: input, shape index: {}]   ;;  %s6638_s8 = inlined_call_operand.vmem [shape: f32[16,96], index: 8, kind: input, shape index: {}]   ;;  %s6639_s9 = inlined_call_operand.vmem [shape: f32[16,48], index: 9, kind: input, shape index: {}]   ;;  %s6640_s10 = inlined_call_operand.vmem [shape: f32[16,48], index: 10, kind: input, shape index: {}]   ;;  %s6641_s11 = inlined_call_operand.vmem [shape: f32[16,48], index: 11, kind: input, shape index: {}]   ;;  %s6642_s12 = inlined_call_operand.vmem [shape: f32[16,32], index: 12, kind: input, shape index: {}]   ;;  %s6643_s13 = inlined_call_operand.hbm [shape: f32[16,256], index: 13, kind: output, shape index: {}]  }
   0x1   :  { %v5227_v1 = vld [vmem:[%s6630_s0 + $0x8] sm:$0xff] }
   0x2   :  { %558 = vmatprep.mubr.f32.mxu1 %v5227_v1  ;;  %v5230_v2 = vand.u32 127, %v45_v0  ;;  %v5232_v3 = vshrl.u32 %v45_v0, 7 }
   0x3   :  { %18 = vsyncpa [#allocation4], 0  ;;  %v6717_v12 = vmov 0  ;;  %v6685_v14 = vmov 1.0|1.0   ;;  %v6721_v19 = vmov 0 }
   0x4   :  { %v106_v4 = vadd.s32 128, %v5232_v3  ;;  %v107_v5 = vadd.s32 136, %v5232_v3  ;;  %v5237_v6 = vmul.u32 64, %v5230_v2  ;;  %v155_v7 = vadd.s32 1, %v5230_v2  ;;  %v5452_v55 = vld [vmem:[%s6630_s0] sm:$0xff]  ;;  %v5457_v56 = vld [vmem:[%s6630_s0 + $0x18] sm:$0xff] }
   0x5   :  { %v91_v9 = vadd.s32 8, %v5232_v3  ;;  %v108_v10 = vadd.s32 144, %v5232_v3  ;;  %v109_v11 = vadd.s32 152, %v5232_v3  ;;  %v92_v13 = vadd.s32 16, %v5232_v3  ;;  %v5464_v57 = vld [vmem:[%s6630_s0 + $0x10] sm:$0xff]  ;;  %v5469_v58 = vld [vmem:[%s6630_s0 + $0x28] sm:$0xff] }
   0x6   :  { %vm139_vm0 = vcmp.ge.s32.totalorder %v106_v4, %v5237_v6  ;;  %v5241_v8 = vmul.u32 64, %v155_v7  ;;  %vm140_vm1 = vcmp.ge.s32.totalorder %v107_v5, %v5237_v6  ;;  %vm123_vm5 = vcmp.ge.s32.totalorder %v5232_v3, %v5237_v6  ;;  %v5476_v59 = vld [vmem:[%s6630_s0 + $0x20] sm:$0xff]  ;;  %v5481_v60 = vld [vmem:[%s6630_s0 + $0x38] sm:$0xff]  ;;  %v5488_v61 = vld [vmem:[%s6630_s0 + $0x30] sm:$0xff]  ;;  %s5144_s28 = smov 127  }
   0x7   :  { %vm124_vm8 = vcmp.ge.s32.totalorder %v91_v9, %v5237_v6  ;;  %vm141_vm12 = vcmp.ge.s32.totalorder %v108_v10, %v5237_v6  ;;  %v93_v15 = vadd.s32 24, %v5232_v3  ;;  %vm142_vm15 = vcmp.ge.s32.totalorder %v109_v11, %v5237_v6  ;;  %v5494_v62 = vld [vmem:[%s6635_s5] sm:$0xff] }
   0x8   :  { %vm173_vm2 = vcmp.lt.s32.totalorder %v106_v4, %v5241_v8  ;;  %vm174_vm3 = vcmp.lt.s32.totalorder %v107_v5, %v5241_v8  ;;  %vm157_vm6 = vcmp.lt.s32.totalorder %v5232_v3, %v5241_v8  ;;  %vm158_vm9 = vcmp.lt.s32.totalorder %v91_v9, %v5241_v8  ;;  %v286_v9 = vld [vmem:[%s6631_s1 + $0x8] sm:$0xff] }
   0x9   :  { %vm205_vm4 = vmand %vm139_vm0, %vm173_vm2  ;;  %vm175_vm13 = vcmp.lt.s32.totalorder %v108_v10, %v5241_v8  ;;  %vm176_vm0 = vcmp.lt.s32.totalorder %v109_v11, %v5241_v8  ;;  %v110_v17 = vadd.s32 160, %v5232_v3  ;;  %v111_v18 = vadd.s32 168, %v5232_v3  ;;  %v287_v10 = vld [vmem:[%s6631_s1 + $0x10] sm:$0xff]  ;;  %v288_v11 = vld [vmem:[%s6631_s1 + $0x18] sm:$0xff] }
   0xa   :  { %vm206_vm7 = vmand %vm140_vm1, %vm174_vm3  ;;  %vm125_vm3 = vcmp.ge.s32.totalorder %v92_v13, %v5237_v6  ;;  %v94_v20 = vadd.s32 32, %v5232_v3  ;;  %v95_v21 = vadd.s32 40, %v5232_v3  ;;  %v6723_v22 = vmov 0 }
   0xb   :  { %vm5255_vm10 = vmpackc.low %vm206_vm7, %vm205_vm4  ;;  %vm159_vm4 = vcmp.lt.s32.totalorder %v92_v13, %v5241_v8  ;;  %vm160_vm7 = vcmp.lt.s32.totalorder %v93_v15, %v5241_v8  ;;  %v112_v23 = vadd.s32 176, %v5232_v3  ;;  %v113_v24 = vadd.s32 184, %v5232_v3  ;;  %v289_v13 = vld [vmem:[%s6631_s1 + $0x20] sm:$0xff] }
   0xc   :  { %v6718_v12 = vsel %vm5255_vm10, 4294967295, %v6717_v12  ;;  %4470 = vmatprep.subr.msk.bf16.mxu1 %vm5255_vm10, %v6685_v14  ;;  %vm189_vm11 = vmand %vm123_vm5, %vm157_vm6  ;;  %vm126_vm6 = vcmp.ge.s32.totalorder %v93_v15, %v5237_v6  ;;  %v6725_v25 = vmov 0  ;;  %v96_v26 = vadd.s32 48, %v5232_v3  ;;  %v290_v15 = vld [vmem:[%s6631_s1 + $0x28] sm:$0xff] }
   0xd   :  { %vm190_vm14 = vmand %vm124_vm8, %vm158_vm9  ;;  %v97_v27 = vadd.s32 56, %v5232_v3  ;;  %v6727_v28 = vmov 0  ;;  %v114_v29 = vadd.s32 192, %v5232_v3  ;;  %v115_v30 = vadd.s32 200, %v5232_v3 }
   0xe   :  { %vm5268_vm1 = vmpackc.low %vm190_vm14, %vm189_vm11  ;;  %vm143_vm11 = vcmp.ge.s32.totalorder %v110_v17, %v5237_v6  ;;  %vm144_vm14 = vcmp.ge.s32.totalorder %v111_v18, %v5237_v6  ;;  %v6729_v31 = vmov 0  ;;  %v98_v32 = vadd.s32 64, %v5232_v3 }
   0xf   :  { %4472 = vmatpush3.bf16.msk.msra.mxu1 %vm5268_vm1, %v6685_v14  ;;  %vm207_vm2 = vmand %vm141_vm12, %vm175_vm13  ;;  %vm177_vm12 = vcmp.lt.s32.totalorder %v110_v17, %v5241_v8  ;;  %v99_v33 = vadd.s32 72, %v5232_v3  ;;  %v6731_v34 = vmov 0  ;;  %v116_v35 = vadd.s32 208, %v5232_v3  ;;  %v291_v17 = vld [vmem:[%s6631_s1 + $0x30] sm:$0xff] }
  0x10   :  { %vm208_vm5 = vmand %vm142_vm15, %vm176_vm0  ;;  %vm178_vm15 = vcmp.lt.s32.totalorder %v111_v18, %v5241_v8  ;;  %v117_v36 = vadd.s32 216, %v5232_v3  ;;  %v6733_v37 = vmov 0  ;;  %v100_v38 = vadd.s32 80, %v5232_v3  ;;  %v292_v18 = vld [vmem:[%s6631_s1 + $0x38] sm:$0xff] }
  0x11   :  { %vm5281_vm8 = vmpackc.low %vm208_vm5, %vm207_vm2  ;;  %v101_v39 = vadd.s32 88, %v5232_v3  ;;  %v6735_v40 = vmov 0  ;;  %v118_v41 = vadd.s32 224, %v5232_v3  ;;  %v119_v42 = vadd.s32 232, %v5232_v3 }
  0x12   :  { %v6722_v19 = vsel %vm5281_vm8, 4294967295, %v6721_v19  ;;  %4474 = vmatprep.subr.msk.bf16.mxu1 %vm5281_vm8, %v6685_v14  ;;  %vm191_vm9 = vmand %vm125_vm3, %vm159_vm4  ;;  %vm127_vm3 = vcmp.ge.s32.totalorder %v94_v20, %v5237_v6  ;;  %vm161_vm4 = vcmp.lt.s32.totalorder %v94_v20, %v5241_v8  ;;  %v6737_v43 = vmov 0  ;;  %v293_v20 = vld [vmem:[%s6631_s1 + $0x40] sm:$0xff] }
  0x13   :  { %vm192_vm13 = vmand %vm126_vm6, %vm160_vm7  ;;  %vm128_vm6 = vcmp.ge.s32.totalorder %v95_v21, %v5237_v6  ;;  %vm162_vm7 = vcmp.lt.s32.totalorder %v95_v21, %v5241_v8  ;;  %v102_v44 = vadd.s32 96, %v5232_v3  ;;  %v103_v45 = vadd.s32 104, %v5232_v3  ;;  %v294_v21 = vld [vmem:[%s6631_s1 + $0x48] sm:$0xff] }
  0x14   :  { %vm5294_vm0 = vmpackc.low %vm192_vm13, %vm191_vm9  ;;  %vm179_vm13 = vcmp.lt.s32.totalorder %v112_v23, %v5241_v8  ;;  %v6739_v46 = vmov 0  ;;  %v120_v47 = vadd.s32 240, %v5232_v3  ;;  %v121_v48 = vadd.s32 248, %v5232_v3 }
  0x15   :  { %v6724_v22 = vsel %vm5294_vm0, 4294967295, %v6723_v22  ;;  %4476 = vmatpush3.bf16.msk.msra.mxu1 %vm5294_vm0, %v6685_v14  ;;  %vm209_vm2 = vmand %vm143_vm11, %vm177_vm12  ;;  %vm145_vm12 = vcmp.ge.s32.totalorder %v112_v23, %v5237_v6  ;;  %v6741_v49 = vmov 0  ;;  %v104_v50 = vadd.s32 112, %v5232_v3  ;;  %v295_v23 = vld [vmem:[%s6631_s1 + $0x50] sm:$0xff] }
  0x16   :  { %vm210_vm5 = vmand %vm144_vm14, %vm178_vm15  ;;  %vm146_vm15 = vcmp.ge.s32.totalorder %v113_v24, %v5237_v6  ;;  %v105_v51 = vadd.s32 120, %v5232_v3  ;;  %v6743_v52 = vmov 0  ;;  %v6745_v53 = vmov 0 }
  0x17   :  { %vm5307_vm9 = vmpackc.low %vm210_vm5, %vm209_vm2  ;;  %vm180_vm2 = vcmp.lt.s32.totalorder %v113_v24, %v5241_v8  ;;  %v6747_v54 = vmov 0  ;;  %v5499_v63 = vadd.s32 128, %v5230_v2  ;;  %v78_v0 = vmul.u32 64, %v5232_v3  ;;  %v296_v24 = vld [vmem:[%s6631_s1 + $0x58] sm:$0xff] }
  0x18   :  { %v6726_v25 = vsel %vm5307_vm9, 4294967295, %v6725_v25  ;;  %4478 = vmatprep.subr.msk.bf16.mxu1 %vm5307_vm9, %v6685_v14  ;;  %vm193_vm11 = vmand %vm127_vm3, %vm161_vm4  ;;  %vm129_vm4 = vcmp.ge.s32.totalorder %v96_v26, %v5237_v6  ;;  %vm163_vm9 = vcmp.lt.s32.totalorder %v96_v26, %v5241_v8  ;;  %v81_v4 = vadd.s32 1, %v5232_v3  ;;  %v285_v3 = vld [vmem:[%s6631_s1] sm:$0xff] }
  0x19   :  { %vm194_vm14 = vmand %vm128_vm6, %vm162_vm7  ;;  %vm130_vm7 = vcmp.ge.s32.totalorder %v97_v27, %v5237_v6  ;;  %v6687_v5 = vmov 0.0  }
  0x1a   :  { %vm5320_vm5 = vmpackc.low %vm194_vm14, %vm193_vm11  ;;  %vm164_vm11 = vcmp.lt.s32.totalorder %v97_v27, %v5241_v8  ;;  %405 = vmatprep.mubr.f32.mxu0 %v6687_v5 }
  0x1b   :  { %v6728_v28 = vsel %vm5320_vm5, 4294967295, %v6727_v28  ;;  %4480 = vmatpush3.bf16.msk.msra.mxu1 %vm5320_vm5, %v6685_v14  ;;  %vm211_vm3 = vmand %vm145_vm12, %vm179_vm13  ;;  %vm147_vm13 = vcmp.ge.s32.totalorder %v114_v29, %v5237_v6  ;;  %vm181_vm5 = vcmp.lt.s32.totalorder %v114_v29, %v5241_v8 }
  0x1c   :  { %vm212_vm6 = vmand %vm146_vm15, %vm180_vm2  ;;  %vm148_vm2 = vcmp.ge.s32.totalorder %v115_v30, %v5237_v6 }
  0x1d   :  { %vm5333_vm14 = vmpackc.low %vm212_vm6, %vm211_vm3  ;;  %vm182_vm3 = vcmp.lt.s32.totalorder %v115_v30, %v5241_v8 }
  0x1e   :  { %v6730_v31 = vsel %vm5333_vm14, 4294967295, %v6729_v31  ;;  %4482 = vmatprep.subr.msk.bf16.mxu1 %vm5333_vm14, %v6685_v14  ;;  %vm195_vm12 = vmand %vm129_vm4, %vm163_vm9  ;;  %vm131_vm4 = vcmp.ge.s32.totalorder %v98_v32, %v5237_v6  ;;  %vm165_vm14 = vcmp.lt.s32.totalorder %v98_v32, %v5241_v8 }
  0x1f   :  { %vm196_vm15 = vmand %vm130_vm7, %vm164_vm11  ;;  %vm132_vm11 = vcmp.ge.s32.totalorder %v99_v33, %v5237_v6 }
  0x20   :  { %vm5346_vm6 = vmpackc.low %vm196_vm15, %vm195_vm12  ;;  %vm166_vm12 = vcmp.lt.s32.totalorder %v99_v33, %v5241_v8 }
  0x21   :  { %v6732_v34 = vsel %vm5346_vm6, 4294967295, %v6731_v34  ;;  %4484 = vmatpush3.bf16.msk.msra.mxu1 %vm5346_vm6, %v6685_v14  ;;  %vm213_vm9 = vmand %vm147_vm13, %vm181_vm5  ;;  %vm149_vm13 = vcmp.ge.s32.totalorder %v116_v35, %v5237_v6  ;;  %vm183_vm6 = vcmp.lt.s32.totalorder %v116_v35, %v5241_v8 }
  0x22   :  { %vm214_vm7 = vmand %vm148_vm2, %vm182_vm3  ;;  %vm150_vm3 = vcmp.ge.s32.totalorder %v117_v36, %v5237_v6 }
  0x23   :  { %vm5359_vm15 = vmpackc.low %vm214_vm7, %vm213_vm9  ;;  %vm184_vm9 = vcmp.lt.s32.totalorder %v117_v36, %v5241_v8 }
  0x24   :  { %v6734_v37 = vsel %vm5359_vm15, 4294967295, %v6733_v37  ;;  %4486 = vmatprep.subr.msk.bf16.mxu1 %vm5359_vm15, %v6685_v14  ;;  %vm197_vm5 = vmand %vm131_vm4, %vm165_vm14  ;;  %vm133_vm4 = vcmp.ge.s32.totalorder %v100_v38, %v5237_v6  ;;  %vm167_vm15 = vcmp.lt.s32.totalorder %v100_v38, %v5241_v8 }
  0x25   :  { %vm198_vm2 = vmand %vm132_vm11, %vm166_vm12  ;;  %vm134_vm12 = vcmp.ge.s32.totalorder %v101_v39, %v5237_v6 }
  0x26   :  { %vm5372_vm7 = vmpackc.low %vm198_vm2, %vm197_vm5  ;;  %vm168_vm5 = vcmp.lt.s32.totalorder %v101_v39, %v5241_v8 }
  0x27   :  { %v6736_v40 = vsel %vm5372_vm7, 4294967295, %v6735_v40  ;;  %4488 = vmatpush3.bf16.msk.msra.mxu1 %vm5372_vm7, %v6685_v14  ;;  %vm215_vm14 = vmand %vm149_vm13, %vm183_vm6  ;;  %vm151_vm13 = vcmp.ge.s32.totalorder %v118_v41, %v5237_v6  ;;  %vm185_vm7 = vcmp.lt.s32.totalorder %v118_v41, %v5241_v8 }
  0x28   :  { %vm216_vm11 = vmand %vm150_vm3, %vm184_vm9  ;;  %vm152_vm9 = vcmp.ge.s32.totalorder %v119_v42, %v5237_v6 }
  0x29   :  { %vm5385_vm2 = vmpackc.low %vm216_vm11, %vm215_vm14  ;;  %vm186_vm14 = vcmp.lt.s32.totalorder %v119_v42, %v5241_v8 }
  0x2a   :  { %v6738_v43 = vsel %vm5385_vm2, 4294967295, %v6737_v43  ;;  %4490 = vmatprep.subr.msk.bf16.mxu1 %vm5385_vm2, %v6685_v14  ;;  %vm199_vm6 = vmand %vm133_vm4, %vm167_vm15  ;;  %vm135_vm4 = vcmp.ge.s32.totalorder %v102_v44, %v5237_v6  ;;  %vm169_vm2 = vcmp.lt.s32.totalorder %v102_v44, %v5241_v8 }
  0x2b   :  { %vm200_vm3 = vmand %vm134_vm12, %vm168_vm5  ;;  %vm136_vm5 = vcmp.ge.s32.totalorder %v103_v45, %v5237_v6 }
  0x2c   :  { %vm5398_vm11 = vmpackc.low %vm200_vm3, %vm199_vm6  ;;  %vm170_vm6 = vcmp.lt.s32.totalorder %v103_v45, %v5241_v8 }
  0x2d   :  { %v6740_v46 = vsel %vm5398_vm11, 4294967295, %v6739_v46  ;;  %4492 = vmatpush3.bf16.msk.msra.mxu1 %vm5398_vm11, %v6685_v14  ;;  %vm217_vm15 = vmand %vm151_vm13, %vm185_vm7  ;;  %vm153_vm13 = vcmp.ge.s32.totalorder %v120_v47, %v5237_v6  ;;  %vm187_vm11 = vcmp.lt.s32.totalorder %v120_v47, %v5241_v8  ;;  %v5585_v47 = vld [vmem:[%s6635_s5 + $0x8] sm:$0xff] }
  0x2e   :  { %vm218_vm12 = vmand %vm152_vm9, %vm186_vm14  ;;  %vm154_vm14 = vcmp.ge.s32.totalorder %v121_v48, %v5237_v6 }
  0x2f   :  { %vm5411_vm3 = vmpackc.low %vm218_vm12, %vm217_vm15  ;;  %vm188_vm15 = vcmp.lt.s32.totalorder %v121_v48, %v5241_v8  ;;  %v5590_v48 = vld [vmem:[%s6635_s5 + $0x10] sm:$0xff] }
  0x30   :  { %v6742_v49 = vsel %vm5411_vm3, 4294967295, %v6741_v49  ;;  %4494 = vmatprep.subr.msk.bf16.mxu1 %vm5411_vm3, %v6685_v14  ;;  %vm201_vm7 = vmand %vm135_vm4, %vm169_vm2  ;;  %vm137_vm4 = vcmp.ge.s32.totalorder %v104_v50, %v5237_v6  ;;  %vm171_vm3 = vcmp.lt.s32.totalorder %v104_v50, %v5241_v8  ;;  %v5602_v50 = vld [vmem:[%s6635_s5 + $0x18] sm:$0xff] }
  0x31   :  { %vm202_vm9 = vmand %vm136_vm5, %vm170_vm6  ;;  %vm138_vm5 = vcmp.ge.s32.totalorder %v105_v51, %v5237_v6  ;;  %vm172_vm6 = vcmp.lt.s32.totalorder %v105_v51, %v5241_v8  ;;  %v82_v6 = vmul.u32 64, %v81_v4  ;;  %v52_v51 = vand.u32 63, %v5230_v2 }
  0x32   :  { %vm5424_vm12 = vmpackc.low %vm202_vm9, %vm201_vm7  ;;  %v6760_v4 = vmov 0 }
  0x33   :  { %v6744_v52 = vsel %vm5424_vm12, 4294967295, %v6743_v52  ;;  %4496 = vmatpush3.bf16.msk.msra.mxu1 %vm5424_vm12, %v6685_v14  ;;  %vm219_vm2 = vmand %vm153_vm13, %vm187_vm11  ;;  %vm79_vm13 = vcmp.ge.s32.totalorder %v5230_v2, %v78_v0 }
  0x34   :  { %vm220_vm0 = vmand %vm154_vm14, %vm188_vm15  ;;  %vm84_vm14 = vcmp.lt.s32.totalorder %v5499_v63, %v82_v6  ;;  %vm6666_vm15 = vcmask 1043456  }
  0x35   :  { %vm5435_vm8 = vmpackc.low %vm220_vm0, %vm219_vm2  ;;  %vm6667_vm0 = vcmask 261120   ;;  %vm83_vm2 = vcmp.lt.s32.totalorder %v5230_v2, %v82_v6  ;;  %v6762_v6 = vmov 0 }
  0x36   :  { %v6746_v53 = vsel %vm5435_vm8, 4294967295, %v6745_v53  ;;  %4498 = vmatprep.subr.msk.bf16.mxu1 %vm5435_vm8, %v6685_v14  ;;  %vm203_vm7 = vmand %vm137_vm4, %vm171_vm3  ;;  %vm80_vm3 = vcmp.ge.s32.totalorder %v5499_v63, %v78_v0  ;;  %v59_v0 = vand.u32 63, %v5499_v63 }
  0x37   :  { %vm204_vm9 = vmand %vm138_vm5, %vm172_vm6  ;;  %vm6668_vm6 = vcmask 31744  }
  0x38   :  { %vm5442_vm11 = vmpackc.low %vm204_vm9, %vm203_vm7  ;;  %vm6749_vm7 = vnez %v6722_v19  ;;  %vm6750_vm9 = vnez %v6724_v22 }
  0x39   :  { %v6748_v54 = vsel %vm5442_vm11, 4294967295, %v6747_v54  ;;  %4500 = vmatpush3.bf16.msk.msra.mxu1 %vm5442_vm11, %v6685_v14  ;;  %vm86_vm4 = vmand %vm80_vm3, %vm84_vm14  ;;  %vm6751_vm3 = vnez %v6726_v25  ;;  %vm6753_vm14 = vnez %v6730_v31 }
  0x3a   :  { %v5509_v7 = vsel %vm86_vm4, 1.0, %v6687_v5  ;;  %vm85_vm5 = vmand %vm79_vm13, %vm83_vm2  ;;  %vm6752_vm13 = vnez %v6728_v28  ;;  %vm6754_vm2 = vnez %v6732_v34  ;;  %vm6755_vm4 = vnez %v6734_v37 }
  0x3b   :  { %3627 = vmatprep.subr.msk.mxu0 %vm6666_vm15, %v5509_v7  ;;  %v5517_v8 = vsel %vm85_vm5, 1.0, %v6687_v5  ;;  %vm6756_vm5 = vnez %v6736_v40 }
  0x3c   :  { %559 = vmatmul.mubr.f32.vlgmr.msra.gmra.mrb[0].mxu1 %v5452_v55  ;;  %3628 = vmatpush1.msk.msra.mxu0 %vm6666_vm15, %v5517_v8 }
  0x3d   :  { %563 = vmatprep.mubr.f32.mxu1 %v5457_v56  ;;  %3629 = vmatmul.mubr.msk.f32.vlgmr.msra.gmra.mrb[0].mxu0 %vm6668_vm6, %v285_v3 }
  0x3e   :  { %3677 = vmatprep.subr.msk.mxu0 %vm6666_vm15, %v5509_v7  ;;  %411 = vmatprep.mubr.f32.mxu0 %v6687_v5 }
  0x3f   :  { %3678 = vmatpush1.msk.msra.mxu0 %vm6666_vm15, %v5517_v8  ;;  %vm6757_vm15 = vnez %v6738_v43 }
  0x40   :  { %564 = vmatmul.mubr.f32.gmra.mrb[2].mxu1 %v5464_v57 }
  0x41   :  { %568 = vmatprep.mubr.f32.mxu1 %v5469_v58  ;;  %3630 = vmatmul.mubr.msk.f32.gmra.mrb[2].mxu0 %vm6668_vm6, %v286_v9 }
  0x42   :  { %417 = vmatprep.mubr.f32.mxu0 %v6687_v5 }
  0x44   :  { %569 = vmatmul.mubr.f32.gmra.mrb[4].mxu1 %v5476_v59 }
  0x45   :  { %573 = vmatprep.mubr.f32.mxu1 %v5481_v60  ;;  %3631 = vmatmul.mubr.msk.f32.gmra.mrb[4].mxu0 %vm6668_vm6, %v287_v10 }
  0x46   :  { %423 = vmatprep.mubr.f32.mxu0 %v6687_v5 }
  0x48   :  { %574 = vmatmul.mubr.f32.gmra.mrb[6].mxu1 %v5488_v61 }
  0x49   :  { %4407 = vmatprep.mubr.msk.f32.mxu1 %vm6667_vm0, %v5494_v62  ;;  %3632 = vmatmul.mubr.msk.f32.gmra.mrb[6].mxu0 %vm6668_vm6, %v288_v11 }
  0x4a   :  { %429 = vmatprep.mubr.f32.mxu0 %v6687_v5 }
  0x4d   :  { %3633 = vmatmul.mubr.msk.f32.gmra.mrb[8].mxu0 %vm6668_vm6, %v289_v13 }
  0x4e   :  { %435 = vmatprep.mubr.f32.mxu0 %v6687_v5 }
  0x51   :  { %3634 = vmatmul.mubr.msk.f32.gmra.mrb[10].mxu0 %vm6668_vm6, %v290_v15 }
  0x52   :  { %441 = vmatprep.mubr.f32.mxu0 %v6687_v5 }
  0x55   :  { %3635 = vmatmul.mubr.msk.f32.gmra.mrb[12].mxu0 %vm6668_vm6, %v291_v17 }
  0x56   :  { %447 = vmatprep.mubr.f32.mxu0 %v6687_v5 }
  0x59   :  { %3636 = vmatmul.mubr.msk.f32.gmra.mrb[14].mxu0 %vm6668_vm6, %v292_v18  ;;  %v6764_v18 = vmov 0 }
  0x5a   :  { %453 = vmatprep.mubr.f32.mxu0 %v6687_v5 }
  0x5d   :  { %3637 = vmatmul.mubr.msk.f32.gmra.mrb[16].mxu0 %vm6668_vm6, %v293_v20  ;;  %v6766_v20 = vmov 0 }
  0x5e   :  { %459 = vmatprep.mubr.f32.mxu0 %v6687_v5 }
  0x61   :  { %3638 = vmatmul.mubr.msk.f32.gmra.mrb[18].mxu0 %vm6668_vm6, %v294_v21 }
  0x62   :  { %465 = vmatprep.mubr.f32.mxu0 %v6687_v5 }
  0x65   :  { %3639 = vmatmul.mubr.msk.f32.gmra.mrb[20].mxu0 %vm6668_vm6, %v295_v23 }
  0x66   :  { %471 = vmatprep.mubr.f32.mxu0 %v6687_v5 }
  0x69   :  { %3640 = vmatmul.mubr.msk.f32.gmra.mrb[22].mxu0 %vm6668_vm6, %v296_v24  ;;  %vm6759_vm6 = vnez %v6742_v49 }
  0x6a   :  { %757 = vmatprep.mubr.f32.mxu0 %v6687_v5 }
 0x10f   :  { %v4075_v26 = vpop.f32.mrb[0].mxu1 }
 0x110   :  { %v4076_v27 = vpop.f32.mrb[1].mxu1 }
 0x111   :  { %v4077_v29 = vadd.f32 %v4076_v27, %v4075_v26 }
 0x113   :  { %v4078_v30 = vpop.f32.mrb[2].mxu1 }
 0x114   :  { %v4079_v32 = vpop.f32.mrb[3].mxu1 }
 0x115   :  { %v4080_v33 = vadd.f32 %v4079_v32, %v4078_v30 }
 0x117   :  { %v4501_v35 = vpack.c.bf16 %v4080_v33, %v4077_v29  ;;  %v4081_v36 = vpop.f32.mrb[4].mxu1 }
 0x118   :  { %v4082_v38 = vpop.f32.mrb[5].mxu1  ;;  %v5664_v3 = vpop.f32.mrb[4].mxu0 }
 0x119   :  { %v4083_v39 = vadd.f32 %v4082_v38, %v4081_v36  ;;  %4502 = vmatprep.subr.bf16.mxu1 %v4501_v35  ;;  %v5669_v10 = vpop.f32.mrb[5].mxu0 }
 0x11a   :  { %4504 = vmatpush3.bf16.msra.mxu1 %v4501_v35 }
 0x11b   :  { %v4084_v41 = vpop.f32.mrb[6].mxu1 }
 0x11c   :  { %v4085_v42 = vpop.f32.mrb[7].mxu1  ;;  %v5674_v11 = vpop.f32.mrb[6].mxu0 }
 0x11d   :  { %v4086_v44 = vadd.f32 %v4085_v42, %v4084_v41  ;;  %v5679_v15 = vpop.f32.mrb[7].mxu0 }
 0x11f   :  { %v4505_v45 = vpack.c.bf16 %v4086_v44, %v4083_v39 }
 0x120   :  { %v5692_v21 = vpop.f32.mrb[8].mxu0 }
 0x121   :  { %4506 = vmatprep.subr.bf16.mxu1 %v4505_v45  ;;  %v5697_v24 = vpop.f32.mrb[9].mxu0 }
 0x122   :  { %4508 = vmatpush3.bf16.msra.mxu1 %v4505_v45 }
 0x123   :  { %4510 = vmatprep.subr.msk.bf16.mxu1 %vm5255_vm10, %v6685_v14 }
 0x124   :  { %v5702_v27 = vpop.f32.mrb[10].mxu0 }
 0x125   :  { %4408 = vmatmul.mubr.msk.f32.vlgmr.msra.gmra.mrb[8].mxu1 %vm6667_vm0, %v5585_v47  ;;  %6768 = vst [vmem:[#allocation6_spill] sm:$0xff] %v5702_v27  ;;  %v5707_v30 = vpop.f32.mrb[11].mxu0 }
 0x126   :  { %4410 = vmatprep.mubr.msk.f32.mxu1 %vm6667_vm0, %v5590_v48  ;;  %4512 = vmatpush3.bf16.msk.msra.mxu1 %vm5268_vm1, %v6685_v14  ;;  %6769 = vst [vmem:[#allocation7_spill] sm:$0xff] %v5707_v30 }
 0x127   :  { %4514 = vmatprep.subr.msk.bf16.mxu1 %vm6749_vm7, %v6685_v14 }
 0x128   :  { %v5712_v33 = vpop.f32.mrb[12].mxu0 }
 0x129   :  { %4411 = vmatmul.mubr.msk.f32.gmra.mrb[10].mxu1 %vm6667_vm0, %v5602_v50  ;;  %vm6758_vm0 = vnez %v6740_v46  ;;  %v5714_v35 = vpop.f32.mrb[13].mxu0 }
 0x12a   :  { %4516 = vmatpush3.bf16.msk.msra.mxu1 %vm6750_vm9, %v6685_v14 }
 0x12b   :  { %4518 = vmatprep.subr.msk.bf16.mxu1 %vm6751_vm3, %v6685_v14 }
 0x12c   :  { %v5716_v36 = vpop.f32.mrb[14].mxu0 }
 0x12d   :  { %6770 = vst [vmem:[#allocation8_spill] sm:$0xff] %v5716_v36  ;;  %v5718_v38 = vpop.f32.mrb[15].mxu0 }
 0x12e   :  { %4520 = vmatpush3.bf16.msk.msra.mxu1 %vm6752_vm13, %v6685_v14  ;;  %6771 = vst [vmem:[#allocation9_spill] sm:$0xff] %v5718_v38 }
 0x12f   :  { %4522 = vmatprep.subr.msk.bf16.mxu1 %vm6753_vm14, %v6685_v14 }
 0x130   :  { %v5720_v39 = vpop.f32.mrb[16].mxu0 }
 0x131   :  { %6772 = vst [vmem:[#allocation10_spill] sm:$0xff] %v5720_v39  ;;  %v5722_v41 = vpop.f32.mrb[17].mxu0 }
 0x132   :  { %4524 = vmatpush3.bf16.msk.msra.mxu1 %vm6754_vm2, %v6685_v14  ;;  %6773 = vst [vmem:[#allocation11_spill] sm:$0xff] %v5722_v41 }
 0x133   :  { %4526 = vmatprep.subr.msk.bf16.mxu1 %vm6755_vm4, %v6685_v14 }
 0x134   :  { %v5724_v42 = vpop.f32.mrb[18].mxu0 }
 0x135   :  { %6774 = vst [vmem:[#allocation12_spill] sm:$0xff] %v5724_v42  ;;  %v5726_v44 = vpop.f32.mrb[19].mxu0 }
 0x136   :  { %4528 = vmatpush3.bf16.msk.msra.mxu1 %vm6756_vm5, %v6685_v14  ;;  %6775 = vst [vmem:[#allocation13_spill] sm:$0xff] %v5726_v44 }
 0x137   :  { %4530 = vmatprep.subr.msk.bf16.mxu1 %vm6757_vm15, %v6685_v14 }
 0x138   :  { %v5728_v45 = vpop.f32.mrb[20].mxu0 }
 0x139   :  { %6776 = vst [vmem:[#allocation14_spill] sm:$0xff] %v5728_v45 }
 0x13a   :  { %4532 = vmatpush3.bf16.msk.msra.mxu1 %vm6758_vm0, %v6685_v14 }
 0x13b   :  { %4534 = vmatprep.subr.msk.bf16.mxu1 %vm6759_vm6, %v6685_v14  ;;  %vm5656_vm6 = vcmp.eq.s32.totalorder %v52_v51, 0 }
 0x13c   :  { %v6761_v4 = vsel %vm5656_vm6, 4294967295, %v6760_v4 }
 0x13e   :  { %4536 = vmatpush3.bf16.msk.msra.mxu1 %vm5424_vm12, %v6685_v14  ;;  %vm5660_vm12 = vcmp.eq.s32.totalorder %v59_v0, 0 }
 0x13f   :  { %4538 = vmatprep.subr.msk.bf16.mxu1 %vm5435_vm8, %v6685_v14  ;;  %v6763_v6 = vsel %vm5660_vm12, 4294967295, %v6762_v6  ;;  %vm6784_vm8 = vcmask 261120  }
 0x142   :  { %4540 = vmatpush3.bf16.msk.msra.mxu1 %vm5442_vm11, %v6685_v14  ;;  %vm5688_vm11 = vcmp.eq.s32.totalorder %v59_v0, 63 }
 0x143   :  { %4582 = vmatprep.subr.msk.bf16.mxu1 %vm5255_vm10, %v6685_v14  ;;  %vm5684_vm10 = vcmp.eq.s32.totalorder %v52_v51, 63  ;;  %v6767_v20 = vsel %vm5688_vm11, 4294967295, %v6766_v20  ;;  %v5730_v51 = vpop.f32.mrb[21].mxu0 }
 0x144   :  { %v6765_v18 = vsel %vm5684_vm10, 4294967295, %v6764_v18  ;;  %6777 = vst [vmem:[#allocation15_spill] sm:$0xff] %v5730_v51  ;;  %v5732_v0 = vpop.f32.mrb[22].mxu0  ;;  %vm6780_vm10 = vcmask 31744  }
 0x145   :  { %6778 = vst [vmem:[#allocation16_spill] sm:$0xff] %v5732_v0  ;;  %v5734_v32 = vpop.f32.mrb[23].mxu0  ;;  %vm6781_vm11 = vmmov %vm6780_vm10 }
 0x146   :  { %6779 = vst [vmem:[#allocation17_spill] sm:$0xff] %v5734_v32  ;;  %vm6782_vm6 = vmmov %vm6780_vm10 }
 0x147   :  { %vm6783_vm12 = vmmov %vm6782_vm6 }
 0x1f8   :  { %v4409_v29 = vpop.f32.mrb[8].mxu1 }
 0x1f9   :  { %v662_v17 = vpop.f32.mrb[9].mxu1 }
 0x1fa   :  { %3679 = vmatmul.mubr.msk.f32.vlgmr.msra.gmra.mrb[24].mxu0 %vm6780_vm10, %v662_v17  ;;  %vm6786_vm10 = vnez %v6742_v49 }
 0x1fb   :  { %763 = vmatprep.mubr.f32.mxu0 %v6687_v5 }
 0x1fc   :  { %v4412_v13 = vpop.f32.mrb[10].mxu1 }
 0x1fd   :  { %v672_v26 = vpop.f32.mrb[11].mxu1 }
 0x1fe   :  { %3680 = vmatmul.mubr.msk.f32.gmra.mrb[26].mxu0 %vm6781_vm11, %v4409_v29  ;;  %vm6789_vm11 = vnez %v6748_v54 }
 0x1ff   :  { %769 = vmatprep.mubr.f32.mxu0 %v6687_v5 }
 0x202   :  { %3681 = vmatmul.mubr.msk.f32.gmra.mrb[28].mxu0 %vm6782_vm6, %v672_v26  ;;  %vm6790_vm6 = vcmask 1043456  }
 0x203   :  { %775 = vmatprep.mubr.f32.mxu0 %v6687_v5 }
 0x206   :  { %3682 = vmatmul.mubr.msk.f32.gmra.mrb[30].mxu0 %vm6783_vm12, %v4412_v13  ;;  %vm6788_vm12 = vnez %v6746_v53 }
 0x207   :  { %4421 = vmatprep.mubr.msk.f32.mxu0 %vm6784_vm8, %v5494_v62  ;;  %vm6787_vm8 = vnez %v6744_v52 }
 0x2cd   :  { %v759_v23 = vpop.f32.mrb[24].mxu0 }
 0x2ce   :  { %v5746_v17 = vsub.f32 %v5452_v55, %v759_v23  ;;  %v761_v63 = vpop.f32.mrb[25].mxu0 }
 0x2cf   :  { %v5749_v9 = vsub.f32 %v5227_v1, %v761_v63  ;;  %v6785_v63 = vmov 1.0|1.0  }
 0x2d0   :  { %v790_v26 = vmul.f32 %v5746_v17, %v5746_v17 }
 0x2d1   :  { %v791_v29 = vmul.f32 %v5749_v9, %v5749_v9  ;;  %v765_v14 = vpop.f32.mrb[26].mxu0 }
 0x2d2   :  { %v5756_v13 = vsub.f32 %v5464_v57, %v765_v14  ;;  %v767_v5 = vpop.f32.mrb[27].mxu0 }
 0x2d3   :  { %v5759_v62 = vsub.f32 %v5457_v56, %v767_v5  ;;  %862 = vmatprep.mubr.f32.mxu1 %v791_v29 }
 0x2d4   :  { %863 = vmatmul.mubr.f32.vlgmr.msra.gmra.mrb[12].mxu1 %v790_v26  ;;  %v792_v23 = vmul.f32 %v5756_v13, %v5756_v13 }
 0x2d5   :  { %v793_v1 = vmul.f32 %v5759_v62, %v5759_v62  ;;  %v771_v55 = vpop.f32.mrb[28].mxu0  ;;  %4584 = vmatpush3.bf16.msk.msra.mxu1 %vm5268_vm1, %v6785_v63 }
 0x2d6   :  { %v5769_v14 = vsub.f32 %v5476_v59, %v771_v55  ;;  %v773_v57 = vpop.f32.mrb[29].mxu0  ;;  %4586 = vmatprep.subr.msk.bf16.mxu1 %vm6749_vm7, %v6785_v63 }
 0x2d7   :  { %v5775_v56 = vsub.f32 %v5469_v58, %v773_v57  ;;  %867 = vmatprep.mubr.f32.mxu1 %v793_v1  ;;  %v6692_v57 = vmov 0  }
 0x2d8   :  { %868 = vmatmul.mubr.f32.gmra.mrb[14].mxu1 %v792_v23  ;;  %v794_v59 = vmul.f32 %v5769_v14, %v5769_v14  ;;  %v488_v23 = vld [vmem:[%s6632_s2 + $0x10] sm:$0xff]  ;;  %4884 = vset.pattern.permute.xlu0 %v6692_v57 }
 0x2d9   :  { %v795_v5 = vmul.f32 %v5775_v56, %v5775_v56  ;;  %v777_v29 = vpop.f32.mrb[30].mxu0  ;;  %4588 = vmatpush3.bf16.msk.msra.mxu1 %vm6750_vm9, %v6785_v63  ;;  %4885 = vset.pattern.permute.xlu1 %v6692_v57 }
 0x2da   :  { %v5785_v26 = vsub.f32 %v5488_v61, %v777_v29  ;;  %v779_v55 = vpop.f32.mrb[31].mxu0  ;;  %4590 = vmatprep.subr.msk.bf16.mxu1 %vm6751_vm3, %v6785_v63  ;;  %984 = vperm.xlu1 %4885, %v488_v23   ;;  %v489_v29 = vld [vmem:[%s6632_s2 + $0x18] sm:$0xff] }
 0x2db   :  { %v5791_v58 = vsub.f32 %v5481_v60, %v779_v55  ;;  %872 = vmatprep.mubr.f32.mxu1 %v795_v5  ;;  %v486_v60 = vld [vmem:[%s6632_s2] sm:$0xff]  ;;  %v487_v5 = vld [vmem:[%s6632_s2 + $0x8] sm:$0xff]  ;;  %s5143_s2 = smov 1  }
 0x2dc   :  { %873 = vmatmul.mubr.f32.gmra.mrb[16].mxu1 %v794_v59  ;;  %v796_v61 = vmul.f32 %v5785_v26, %v5785_v26  ;;  %974 = vperm.xlu0 %4884, %v486_v60  }
 0x2dd   :  { %v797_v1 = vmul.f32 %v5791_v58, %v5791_v58  ;;  %4592 = vmatpush3.bf16.msk.msra.mxu1 %vm6752_vm13, %v6785_v63 }
 0x2de   :  { %4594 = vmatprep.subr.msk.bf16.mxu1 %vm6753_vm14, %v6785_v63  ;;  %989 = vperm.xlu1 %4885, %v489_v29  }
 0x2df   :  { %877 = vmatprep.mubr.f32.mxu1 %v797_v1 }
 0x2e0   :  { %878 = vmatmul.mubr.f32.gmra.mrb[18].mxu1 %v796_v61  ;;  %979 = vperm.xlu0 %4884, %v487_v5  }
 0x2e1   :  { %4596 = vmatpush3.bf16.msk.msra.mxu1 %vm6754_vm2, %v6785_v63 }
 0x2e2   :  { %4598 = vmatprep.subr.msk.bf16.mxu1 %vm6755_vm4, %v6785_v63 }
 0x2e5   :  { %4600 = vmatpush3.bf16.msk.msra.mxu1 %vm6756_vm5, %v6785_v63 }
 0x2e6   :  { %4602 = vmatprep.subr.msk.bf16.mxu1 %vm6757_vm15, %v6785_v63 }
 0x2e9   :  { %4604 = vmatpush3.bf16.msk.msra.mxu1 %vm6758_vm0, %v6785_v63 }
 0x2ea   :  { %4606 = vmatprep.subr.msk.bf16.mxu1 %vm6786_vm10, %v6785_v63 }
 0x2ed   :  { %4608 = vmatpush3.bf16.msk.msra.mxu1 %vm6787_vm8, %v6785_v63  ;;  %vm6793_vm8 = vmmov %vm6790_vm6 }
 0x2ee   :  { %4610 = vmatprep.subr.msk.bf16.mxu1 %vm6788_vm12, %v6785_v63 }
 0x2f1   :  { %4612 = vmatpush3.bf16.msk.msra.mxu1 %vm6789_vm11, %v6785_v63  ;;  %vm6791_vm11 = vcmask 261120  }
 0x2f2   :  { %vm6792_vm12 = vmmov %vm6791_vm11 }
 0x2f3   :  { %vm6794_vm10 = vmmov %vm6791_vm11 }
 0x3a7   :  { %v4127_v59 = vpop.f32.mrb[12].mxu1 }
 0x3a8   :  { %v4128_v55 = vpop.f32.mrb[13].mxu1 }
 0x3a9   :  { %v4129_v1 = vadd.f32 %v4128_v55, %v4127_v59 }
 0x3ab   :  { %v4130_v61 = vpop.f32.mrb[14].mxu1 }
 0x3ac   :  { %v4131_v32 = vpop.f32.mrb[15].mxu1 }
 0x3ad   :  { %v4132_v0 = vadd.f32 %v4131_v32, %v4130_v61  ;;  %v6795_v32 = vmov 0.0  }
 0x3af   :  { %v4541_v51 = vpack.c.bf16 %v4132_v0, %v4129_v1  ;;  %v4133_v57 = vpop.f32.mrb[16].mxu1 }
 0x3b0   :  { %v4134_v45 = vpop.f32.mrb[17].mxu1 }
 0x3b1   :  { %v4135_v44 = vadd.f32 %v4134_v45, %v4133_v57  ;;  %4542 = vmatprep.subr.bf16.mxu0 %v4541_v51 }
 0x3b2   :  { %4544 = vmatpush3.bf16.msra.mxu0 %v4541_v51  ;;  %v975_v51 = vpop.permute.xlu0 %974 }
 0x3b3   :  { %v4136_v42 = vpop.f32.mrb[18].mxu1 }
 0x3b4   :  { %v4137_v38 = vpop.f32.mrb[19].mxu1 }
 0x3b5   :  { %v4138_v36 = vadd.f32 %v4137_v38, %v4136_v42 }
 0x3b7   :  { %v4545_v41 = vpack.c.bf16 %v4138_v36, %v4135_v44  ;;  %v6695_v36 = vmov 1  }
 0x3b8   :  { %4886 = vset.pattern.permute.xlu0 %v6695_v36  ;;  %4887 = vset.pattern.permute.xlu1 %v6695_v36 }
 0x3b9   :  { %4546 = vmatprep.subr.bf16.mxu0 %v4545_v41  ;;  %1106 = vperm.xlu0 %4886, %v486_v60   ;;  %v980_v60 = vpop.permute.xlu0 %979 }
 0x3ba   :  { %4548 = vmatpush3.bf16.msra.mxu0 %v4545_v41  ;;  %1110 = vperm.xlu1 %4887, %v487_v5   ;;  %v985_v5 = vpop.permute.xlu1 %984 }
 0x3bb   :  { %3719 = vmatprep.subr.msk.mxu0 %vm6790_vm6, %v5509_v7  ;;  %vm6802_vm6 = vnez %v6763_v6 }
 0x3bd   :  { %4422 = vmatmul.mubr.msk.f32.vlgmr.msra.gmra.mrb[32].mxu0 %vm6791_vm11, %v5585_v47  ;;  %1118 = vperm.xlu0 %4886, %v489_v29  }
 0x3be   :  { %4424 = vmatprep.mubr.msk.f32.mxu0 %vm6792_vm12, %v5590_v48  ;;  %3720 = vmatpush1.msk.msra.mxu0 %vm6793_vm8, %v5517_v8  ;;  %v990_v61 = vpop.permute.xlu1 %989 }
 0x3bf   :  { %1114 = vperm.xlu1 %4887, %v488_v23  }
 0x3c1   :  { %4425 = vmatmul.mubr.msk.f32.gmra.mrb[34].mxu0 %vm6794_vm10, %v5602_v50  ;;  %vm6796_vm10 = vcmask 31744  }
 0x3c2   :  { %1072 = vmatprep.mubr.f32.mxu0 %v6795_v32  ;;  %vm6797_vm8 = vmmov %vm6796_vm10 }
 0x3c3   :  { %vm6798_vm12 = vmmov %vm6797_vm8 }
 0x3c4   :  { %vm6799_vm11 = vmmov %vm6797_vm8 }
 0x490   :  { %v4423_v47 = vpop.f32.mrb[32].mxu0 }
 0x491   :  { %v949_v38 = vpop.f32.mrb[33].mxu0  ;;  %v955_v48 = vadd.f32 1e-05, %v4423_v47 }
 0x492   :  { %v950_v41 = vadd.f32 1e-05, %v949_v38 }
 0x494   :  { %5005 = vrsqrt.f32 %v950_v41  ;;  %v4426_v42 = vpop.f32.mrb[34].mxu0 }
 0x495   :  { %v959_v44 = vpop.f32.mrb[35].mxu0  ;;  %5007 = vrsqrt.f32 %v955_v48  ;;  %v965_v45 = vadd.f32 1e-05, %v4426_v42  ;;  %v1107_v48 = vpop.permute.xlu0 %1106 }
 0x496   :  { %v960_v50 = vadd.f32 1e-05, %v959_v44 }
 0x498   :  { %5009 = vrsqrt.f32 %v960_v50  ;;  %v1111_v50 = vpop.permute.xlu1 %1110 }
 0x499   :  { %5011 = vrsqrt.f32 %v965_v45 }
 0x49e   :  { %v5006_v0 = vpop.eup %5005 }
 0x49f   :  { %v992_v57 = vmul.f32 %v5006_v0, %v975_v51  ;;  %v5008_v59 = vpop.eup %5007 }
 0x4a0   :  { %v993_v29 = vmul.f32 %v5008_v59, %v980_v60 }
 0x4a1   :  { %3721 = vmatmul.mubr.msk.f32.vlgmr.msra.gmra.mrb[36].mxu0 %vm6796_vm10, %v992_v57  ;;  %vm3963_vm10 = vmneg %vm6802_vm6 }
 0x4a2   :  { %v5010_v23 = vpop.eup %5009  ;;  %1078 = vmatprep.mubr.f32.mxu0 %v6795_v32  ;;  %vm5956_vm0 = vmpackc.low %vm3963_vm10, %vm3963_vm10  ;;  %vm6703_vm10 = vcmp.lt.s32.totalorder %v5230_v2, 127 }
 0x4a3   :  { %v994_v55 = vmul.f32 %v5010_v23, %v985_v5  ;;  %v5012_v1 = vpop.eup %5011 }
 0x4a4   :  { %v995_v47 = vmul.f32 %v5012_v1, %v990_v61  ;;  %v1115_v61 = vpop.permute.xlu1 %1114 }
 0x4a5   :  { %3722 = vmatmul.mubr.msk.f32.gmra.mrb[38].mxu0 %vm6797_vm8, %v993_v29  ;;  %vm6700_vm8 = vcmp.lt.s32.totalorder %v5230_v2, 1 }
 0x4a6   :  { %1084 = vmatprep.mubr.f32.mxu0 %v6795_v32 }
 0x4a9   :  { %3723 = vmatmul.mubr.msk.f32.gmra.mrb[40].mxu0 %vm6798_vm12, %v994_v55  ;;  %vm6803_vm12 = vnez %v6761_v4 }
 0x4aa   :  { %1090 = vmatprep.mubr.f32.mxu0 %v6795_v32 }
 0x4ad   :  { %3724 = vmatmul.mubr.msk.f32.gmra.mrb[42].mxu0 %vm6799_vm11, %v995_v47  ;;  %vm3965_vm11 = vmneg %vm6803_vm12  ;;  %vm6811_vm12 = vnez %v6765_v18 }
 0x4ae   :  { %1382 = vmatprep.mubr.f32.mxu0 %v6795_v32  ;;  %vm5968_vm6 = vmpackc.low %vm3965_vm11, %vm3965_vm11  ;;  %vm6809_vm11 = vnez %v6767_v20 }
 0x574   :  { %v1074_v38 = vpop.f32.mrb[36].mxu0 }
 0x575   :  { %v1097_v41 = vmul.f32 %v1074_v38, %v5746_v17  ;;  %v1076_v42 = vpop.f32.mrb[37].mxu0 }
 0x576   :  { %v1098_v44 = vmul.f32 %v1076_v42, %v5749_v9 }
 0x577   :  { %v5867_v45 = vadd.f32 %v1107_v48, %v1097_v41 }
 0x578   :  { %v5869_v51 = vadd.f32 %v1107_v48, %v1098_v44  ;;  %v1080_v0 = vpop.f32.mrb[38].mxu0 }
 0x579   :  { %v1129_v57 = vsub.f32 0.0, %v5867_v45  ;;  %v1099_v59 = vmul.f32 %v1080_v0, %v5756_v13  ;;  %v1082_v60 = vpop.f32.mrb[39].mxu0 }
 0x57a   :  { %v1130_v23 = vsub.f32 0.0, %v5869_v51  ;;  %v1100_v5 = vmul.f32 %v1082_v60, %v5759_v62 }
 0x57b   :  { %v1137_v29 = vmul.f32 1.442695, %v1129_v57  ;;  %v5875_v17 = vadd.f32 %v1111_v50, %v1099_v59 }
 0x57c   :  { %v1139_v55 = vmul.f32 1.442695, %v1130_v23  ;;  %v5877_v9 = vadd.f32 %v1111_v50, %v1100_v5  ;;  %v1086_v1 = vpop.f32.mrb[40].mxu0  ;;  %v1119_v23 = vpop.permute.xlu0 %1118 }
 0x57d   :  { %5013 = vpow2.f32 %v1137_v29  ;;  %v1131_v47 = vsub.f32 0.0, %v5875_v17  ;;  %v1101_v38 = vmul.f32 %v1086_v1, %v5769_v14  ;;  %v1088_v48 = vpop.f32.mrb[41].mxu0 }
 0x57e   :  { %5015 = vpow2.f32 %v1139_v55  ;;  %v1132_v13 = vsub.f32 0.0, %v5877_v9  ;;  %v1102_v41 = vmul.f32 %v1088_v48, %v5775_v56 }
 0x57f   :  { %v1141_v62 = vmul.f32 1.442695, %v1131_v47  ;;  %v5883_v42 = vadd.f32 %v1115_v61, %v1101_v38 }
 0x580   :  { %v1143_v44 = vmul.f32 1.442695, %v1132_v13  ;;  %v5885_v0 = vadd.f32 %v1115_v61, %v1102_v41  ;;  %v1092_v50 = vpop.f32.mrb[42].mxu0 }
 0x581   :  { %5017 = vpow2.f32 %v1141_v62  ;;  %v1133_v57 = vsub.f32 0.0, %v5883_v42  ;;  %v1103_v59 = vmul.f32 %v1092_v50, %v5785_v26  ;;  %v1094_v60 = vpop.f32.mrb[43].mxu0 }
 0x582   :  { %5019 = vpow2.f32 %v1143_v44  ;;  %v1134_v14 = vsub.f32 0.0, %v5885_v0  ;;  %v1104_v5 = vmul.f32 %v1094_v60, %v5791_v58 }
 0x583   :  { %v1145_v56 = vmul.f32 1.442695, %v1133_v57  ;;  %v1127_v29 = vadd.f32 %v1119_v23, %v1103_v59 }
 0x584   :  { %v1147_v55 = vmul.f32 1.442695, %v1134_v14  ;;  %v1128_v1 = vadd.f32 %v1119_v23, %v1104_v5 }
 0x585   :  { %5021 = vpow2.f32 %v1145_v56  ;;  %v1135_v61 = vsub.f32 0.0, %v1127_v29 }
 0x586   :  { %5023 = vpow2.f32 %v1147_v55  ;;  %v1136_v47 = vsub.f32 0.0, %v1128_v1 }
 0x587   :  { %v5014_v38 = vpop.eup %5013  ;;  %v1149_v48 = vmul.f32 1.442695, %v1135_v61 }
 0x588   :  { %v5016_v13 = vpop.eup %5015  ;;  %v1153_v41 = vadd.f32 1.0, %v5014_v38  ;;  %v1151_v26 = vmul.f32 1.442695, %v1136_v47 }
 0x589   :  { %v1154_v62 = vadd.f32 1.0, %v5016_v13  ;;  %5025 = vpow2.f32 %v1149_v48 }
 0x58a   :  { %5027 = vrcp.f32 %v1153_v41 }
 0x58b   :  { %v5018_v44 = vpop.eup %5017  ;;  %5029 = vpow2.f32 %v1151_v26 }
 0x58c   :  { %v5020_v50 = vpop.eup %5019  ;;  %v1155_v36 = vadd.f32 1.0, %v5018_v44  ;;  %5031 = vrcp.f32 %v1154_v62 }
 0x58d   :  { %v1156_v58 = vadd.f32 1.0, %v5020_v50 }
 0x58e   :  { %5033 = vrcp.f32 %v1155_v36 }
 0x58f   :  { %v5022_v57 = vpop.eup %5021  ;;  %5035 = vrcp.f32 %v1156_v58 }
 0x590   :  { %v5024_v59 = vpop.eup %5023  ;;  %v1157_v60 = vadd.f32 1.0, %v5022_v57 }
 0x591   :  { %v1158_v23 = vadd.f32 1.0, %v5024_v59 }
 0x592   :  { %5037 = vrcp.f32 %v1157_v60 }
 0x593   :  { %v5026_v14 = vpop.eup %5025 }
 0x594   :  { %v1159_v5 = vadd.f32 1.0, %v5026_v14  ;;  %v5028_v56 = vpop.eup %5027 }
 0x595   :  { %v5030_v55 = vpop.eup %5029  ;;  %v5892_v13 = vmul.f32 %v5028_v56, %v5867_v45  ;;  %v5145_v56 = vmov 4  }
 0x596   :  { %5039 = vrcp.f32 %v1159_v5  ;;  %v5032_v61 = vpop.eup %5031  ;;  %v1160_v47 = vadd.f32 1.0, %v5030_v55  ;;  %4928 = vset.pattern.permute.xlu1 %v5145_v56  ;;  %4929 = vset.pattern.permute.xlu0 %v5145_v56  ;;  %v6800_v55 = vmov 0   ;;  %v6806_v56 = vmov 0 }
 0x597   :  { %5041 = vrcp.f32 %v1158_v23  ;;  %v5898_v41 = vmul.f32 %v5032_v61, %v5869_v51  ;;  %v6801_v61 = vmov 1   ;;  %v6807_v56 = vsel %vm5968_vm6, 4294967295, %v6806_v56 }
 0x598   :  { %v5034_v38 = vpop.eup %5033  ;;  %5043 = vrcp.f32 %v1160_v47 }
 0x599   :  { %v5036_v48 = vpop.eup %5035  ;;  %v5895_v36 = vmul.f32 %v5034_v38, %v5875_v17 }
 0x59a   :  { %v5901_v26 = vmul.f32 %v5036_v48, %v5877_v9 }
 0x59b   :  { %v4888_v62 = vpack.i.bf16 %v5895_v36, %v5892_v13 }
 0x59c   :  { %v4893_v45 = vpack.i.bf16 %v5901_v26, %v5898_v41  ;;  %v5038_v51 = vpop.eup %5037 }
 0x59d   :  { %4889 = vrot.lane.b32.xlu1 %v4888_v62, %s5143_s2  ;;  %v5914_v58 = vmul.f32 %v5038_v51, %v5883_v42 }
 0x59e   :  { %4894 = vrot.lane.b32.xlu0 %v4893_v45, %s5143_s2 }
 0x5a0   :  { %v5040_v9 = vpop.eup %5039 }
 0x5a1   :  { %v5042_v50 = vpop.eup %5041  ;;  %v5916_v57 = vmul.f32 %v5040_v9, %v1127_v29  ;;  %v6804_v9 = vmov 0 }
 0x5a2   :  { %v5044_v59 = vpop.eup %5043  ;;  %v5923_v23 = vmul.f32 %v5042_v50, %v5885_v0  ;;  %v5940_v0 = vld [vmem:[%s6634_s4] sm:$0xff]  ;;  %v6805_v9 = vsel %vm5956_vm0, 4294967295, %v6804_v9 }
 0x5a3   :  { %v4898_v60 = vpack.i.bf16 %v5916_v57, %v5914_v58  ;;  %v5925_v5 = vmul.f32 %v5044_v59, %v1128_v1  ;;  %v5945_v1 = vld [vmem:[%s6634_s4 + $0x8] sm:$0xff] }
 0x5a5   :  { %4899 = vrot.lane.b32.xlu1 %v4898_v60, %s5143_s2  ;;  %v4903_v42 = vpack.i.bf16 %v5925_v5, %v5923_v23 }
 0x5a7   :  { %4904 = vrot.lane.b32.xlu0 %v4903_v42, %s5143_s2 }
 0x5a9   :  { %4909 = vrot.lane.b32.xlu1 %v4888_v62, %s5144_s28 }
 0x5ab   :  { %4914 = vrot.lane.b32.xlu0 %v4893_v45, %s5144_s28 }
 0x5ad   :  { %4919 = vrot.lane.b32.xlu1 %v4898_v60, %s5144_s28 }
 0x5af   :  { %4924 = vrot.lane.b32.xlu0 %v4903_v42, %s5144_s28 }
 0x5b1   :  { %1303 = vperm.xlu1 %4928, %v5940_v0  }
 0x5b3   :  { %1308 = vperm.xlu0 %4929, %v5945_v1  }
 0x5b5   :  { %4930 = vset.pattern.permute.xlu1 %v6800_v55 }
 0x5b7   :  { %4931 = vset.pattern.permute.xlu0 %v6801_v61 }
 0x60f   :  { %v4890_v47 = vpop.permute.xlu1 %4889 }
 0x610   :  { %v4892_v38 = vunpack.i.h.bf16 %v4890_v47  ;;  %v4891_v48 = vunpack.i.l.bf16 %v4890_v47  ;;  %v4895_v62 = vpop.permute.xlu0 %4894 }
 0x611   :  { %v4897_v45 = vunpack.i.h.bf16 %v4895_v62  ;;  %v4896_v51 = vunpack.i.l.bf16 %v4895_v62 }
 0x613   :  { %v1195_v50 = vsel %vm6700_vm8, %v4892_v38, %v4897_v45  ;;  %v1199_v59 = vsel %vm6700_vm8, %v4897_v45, %v4892_v38  ;;  %v1194_v60 = vsel %vm6700_vm8, %v4891_v48, %v4896_v51  ;;  %v1198_v42 = vsel %vm6700_vm8, %v4896_v51, %v4891_v48 }
 0x614   :  { %v4549_v47 = vpack.c.bf16 %v1195_v50, %v1194_v60  ;;  %v4552_v62 = vpack.c.bf16 %v1199_v59, %v1198_v42 }
 0x616   :  { %4551 = vmatprep.subr.msk.bf16.mxu0 %vm5956_vm0, %v4549_v47 }
 0x617   :  { %v4900_v14 = vpop.permute.xlu1 %4899  ;;  %4554 = vmatpush1.bf16.msk.msra.mxu0 %vm5968_vm6, %v4552_v62 }
 0x618   :  { %v4902_v38 = vunpack.i.h.bf16 %v4900_v14  ;;  %v4901_v45 = vunpack.i.l.bf16 %v4900_v14 }
 0x619   :  { %v4905_v29 = vpop.permute.xlu0 %4904 }
 0x61a   :  { %v4907_v44 = vunpack.i.h.bf16 %v4905_v29  ;;  %v4906_v17 = vunpack.i.l.bf16 %v4905_v29 }
 0x61b   :  { %v4910_v30 = vpop.permute.xlu1 %4909 }
 0x61c   :  { %v1197_v48 = vsel %vm6700_vm8, %v4902_v38, %v4907_v44  ;;  %v1201_v51 = vsel %vm6700_vm8, %v4907_v44, %v4902_v38  ;;  %v1196_v50 = vsel %vm6700_vm8, %v4901_v45, %v4906_v17  ;;  %v1200_v59 = vsel %vm6700_vm8, %v4906_v17, %v4901_v45  ;;  %vm3979_vm8 = vmneg %vm6809_vm11 }
 0x61d   :  { %v4555_v60 = vpack.c.bf16 %v1197_v48, %v1196_v50  ;;  %v4558_v42 = vpack.c.bf16 %v1201_v51, %v1200_v59  ;;  %v4915_v47 = vpop.permute.xlu0 %4914  ;;  %v4912_v14 = vunpack.i.h.bf16 %v4910_v30  ;;  %v4911_v29 = vunpack.i.l.bf16 %v4910_v30  ;;  %vm6006_vm11 = vmpackc.low %vm3979_vm8, %vm3979_vm8 }
 0x61e   :  { %v4917_v62 = vunpack.i.h.bf16 %v4915_v47  ;;  %v4916_v27 = vunpack.i.l.bf16 %v4915_v47  ;;  %v6808_v17 = vpack.c.bf16 %v5901_v26, %v5898_v41  ;;  %v6810_v59 = vpack.c.bf16 %v5895_v36, %v5892_v13 }
 0x61f   :  { %4557 = vmatprep.subr.msk.bf16.mxu0 %vm5956_vm0, %v4555_v60  ;;  %v4920_v39 = vpop.permute.xlu1 %4919  ;;  %v6812_v41 = vpack.c.bf16 %v5925_v5, %v5923_v23  ;;  %v6815_v23 = vpack.c.bf16 %v5916_v57, %v5914_v58  ;;  %v6816_v5 = vmov 0  ;;  %v1275_v57 = vld [vmem:[%s6638_s8] sm:$0xff]  ;;  %vm6827_vm0 = vnez %v6748_v54 }
 0x620   :  { %4560 = vmatpush1.bf16.msk.msra.mxu0 %vm5968_vm6, %v4558_v42  ;;  %v4922_v38 = vunpack.i.h.bf16 %v4920_v39  ;;  %v4921_v45 = vunpack.i.l.bf16 %v4920_v39  ;;  %v1236_v30 = vsel %vm6703_vm10, %v4917_v62, %v4912_v14  ;;  %v1235_v48 = vsel %vm6703_vm10, %v4916_v27, %v4911_v29  ;;  %vm3981_vm6 = vmneg %vm6811_vm12 }
 0x621   :  { %v4925_v44 = vpop.permute.xlu0 %4924  ;;  %4562 = vmatprep.subr.bf16.mxu0 %v6808_v17  ;;  %v6813_v39 = vmov 0  ;;  %v1232_v26 = vsel %vm6703_vm10, %v4912_v14, %v4917_v62  ;;  %v1231_v60 = vsel %vm6703_vm10, %v4911_v29, %v4916_v27  ;;  %v4569_v42 = vpack.c.bf16 %v1236_v30, %v1235_v48  ;;  %vm6021_vm8 = vmpackc.low %vm3981_vm6, %vm3981_vm6  ;;  %v1276_v62 = vld [vmem:[%s6638_s8 + $0x8] sm:$0xff] }
 0x622   :  { %v4927_v51 = vunpack.i.h.bf16 %v4925_v44  ;;  %v4926_v50 = vunpack.i.l.bf16 %v4925_v44  ;;  %v6814_v39 = vsel %vm6006_vm11, 4294967295, %v6813_v39  ;;  %v6817_v5 = vsel %vm6021_vm8, 4294967295, %v6816_v5 }
 0x623   :  { %v4572_v47 = vpack.c.bf16 %v1232_v26, %v1231_v60  ;;  %vm1311_vm6 = vcmask 785408   ;;  %v1470_v26 = vld [vmem:[%s6636_s6] sm:$0xff] }
 0x624   :  { %4564 = vmatpush1.bf16.msra.mxu0 %v6810_v59  ;;  %v1238_v13 = vsel %vm6703_vm10, %v4927_v51, %v4922_v38  ;;  %v1237_v36 = vsel %vm6703_vm10, %v4926_v50, %v4921_v45  ;;  %v1234_v27 = vsel %vm6703_vm10, %v4922_v38, %v4927_v51  ;;  %v1233_v14 = vsel %vm6703_vm10, %v4921_v45, %v4926_v50 }
 0x625   :  { %4566 = vmatprep.subr.bf16.mxu0 %v6812_v41  ;;  %v4575_v29 = vpack.c.bf16 %v1238_v13, %v1237_v36  ;;  %v4578_v58 = vpack.c.bf16 %v1234_v27, %v1233_v14  ;;  %vm6708_vm10 = vcmask 130048   ;;  %v1471_v14 = vld [vmem:[%s6636_s6 + $0x8] sm:$0xff] }
 0x628   :  { %4568 = vmatpush1.bf16.msra.mxu0 %v6815_v23 }
 0x629   :  { %4571 = vmatprep.subr.msk.bf16.mxu0 %vm6006_vm11, %v4569_v42 }
 0x62c   :  { %4574 = vmatpush1.bf16.msk.msra.mxu0 %vm6021_vm8, %v4572_v47 }
 0x62d   :  { %4577 = vmatprep.subr.msk.bf16.mxu0 %vm6006_vm11, %v4575_v29  ;;  %vm6821_vm11 = vcmask 31744  }
 0x630   :  { %4580 = vmatpush1.bf16.msk.msra.mxu0 %vm6021_vm8, %v4578_v58  ;;  %v1304_v44 = vpop.permute.xlu1 %1303  ;;  %vm6820_vm8 = vnez %v6718_v12 }
 0x632   :  { %v1309_v48 = vpop.permute.xlu0 %1308 }
 0x633   :  { %3725 = vmatmul.mubr.msk.f32.vlgmr.msra.gmra.mrb[44].mxu0 %vm1311_vm6, %v1275_v57 }
 0x634   :  { %1388 = vmatprep.mubr.f32.mxu0 %v6795_v32 }
 0x637   :  { %3726 = vmatmul.mubr.msk.f32.gmra.mrb[46].mxu0 %vm1311_vm6, %v1276_v62  ;;  %vm6818_vm6 = vcmask 1043456  }
 0x638   :  { %4431 = vmatprep.mubr.msk.f32.mxu0 %vm6708_vm10, %v1470_v26  ;;  %vm6819_vm12 = vmmov %vm6818_vm6 }
 0x706   :  { %v1384_v17 = vpop.f32.mrb[44].mxu0 }
 0x707   :  { %v1386_v38 = vpop.f32.mrb[45].mxu0  ;;  %v1385_v30 = vadd.f32 %v1384_v17, %v1304_v44 }
 0x708   :  { %v1387_v45 = vadd.f32 %v1386_v38, %v1304_v44 }
 0x70a   :  { %v1390_v51 = vpop.f32.mrb[46].mxu0  ;;  %1459 = vmatprep.mubr.f32.mxu1 %v1387_v45 }
 0x70b   :  { %v1392_v50 = vpop.f32.mrb[47].mxu0  ;;  %1460 = vmatmul.mubr.f32.vlgmr.msra.gmra.mrb[20].mxu1 %v1385_v30  ;;  %v1391_v41 = vadd.f32 %v1390_v51, %v1309_v48 }
 0x70c   :  { %v1393_v59 = vadd.f32 %v1392_v50, %v1309_v48 }
 0x70e   :  { %1464 = vmatprep.mubr.f32.mxu1 %v1393_v59 }
 0x70f   :  { %1465 = vmatmul.mubr.f32.gmra.mrb[22].mxu1 %v1391_v41 }
 0x710   :  { %4438 = vmatprep.mubr.msk.f32.mxu1 %vm6708_vm10, %v1470_v26 }
 0x7de   :  { %v4179_v60 = vpop.f32.mrb[20].mxu1 }
 0x7df   :  { %v4180_v42 = vpop.f32.mrb[21].mxu1 }
 0x7e0   :  { %v4181_v13 = vadd.f32 %v4180_v42, %v4179_v60 }
 0x7e2   :  { %v4182_v36 = vpop.f32.mrb[22].mxu1 }
 0x7e3   :  { %v4183_v23 = vpop.f32.mrb[23].mxu1 }
 0x7e4   :  { %v4184_v47 = vadd.f32 %v4183_v23, %v4182_v36 }
 0x7e6   :  { %v4613_v27 = vpack.c.bf16 %v4184_v47, %v4181_v13 }
 0x7e8   :  { %4614 = vmatprep.subr.bf16.mxu0 %v4613_v27 }
 0x7e9   :  { %4616 = vmatpush3.bf16.msra.mxu0 %v4613_v27 }
 0x7ea   :  { %3761 = vmatprep.subr.msk.mxu0 %vm6818_vm6, %v5509_v7  ;;  %vm6824_vm6 = vnez %v6742_v49 }
 0x7ec   :  { %4432 = vmatmul.mubr.msk.f32.vlgmr.msra.gmra.mrb[48].mxu0 %vm6708_vm10, %v1471_v14  ;;  %vm6826_vm10 = vnez %v6746_v53 }
 0x7ed   :  { %3762 = vmatpush1.msk.msra.mxu0 %vm6819_vm12, %v5517_v8  ;;  %1624 = vmatprep.mubr.f32.mxu0 %v6795_v32  ;;  %vm6822_vm12 = vmmov %vm6821_vm11 }
 0x7ee   :  { %4618 = vmatprep.subr.msk.bf16.mxu0 %vm6820_vm8, %v6785_v63 }
 0x8bf   :  { %v4433_v29 = vpop.f32.mrb[48].mxu0 }
 0x8c0   :  { %v1545_v58 = vpop.f32.mrb[49].mxu0 }
 0x8c1   :  { %3763 = vmatmul.mubr.msk.f32.vlgmr.msra.gmra.mrb[50].mxu0 %vm6821_vm11, %v1545_v58  ;;  %vm6823_vm11 = vnez %v6740_v46 }
 0x8c2   :  { %1630 = vmatprep.mubr.f32.mxu0 %v6795_v32  ;;  %4620 = vmatpush3.bf16.msk.msra.mxu0 %vm5268_vm1, %v6785_v63 }
 0x8c3   :  { %4622 = vmatprep.subr.msk.bf16.mxu0 %vm6749_vm7, %v6785_v63 }
 0x8c5   :  { %3764 = vmatmul.mubr.msk.f32.gmra.mrb[52].mxu0 %vm6822_vm12, %v4433_v29  ;;  %vm6825_vm12 = vnez %v6744_v52 }
 0x8c6   :  { %4624 = vmatpush3.bf16.msk.msra.mxu0 %vm6750_vm9, %v6785_v63 }
 0x8c7   :  { %4626 = vmatprep.subr.msk.bf16.mxu0 %vm6751_vm3, %v6785_v63 }
 0x8ca   :  { %4628 = vmatpush3.bf16.msk.msra.mxu0 %vm6752_vm13, %v6785_v63 }
 0x8cb   :  { %4630 = vmatprep.subr.msk.bf16.mxu0 %vm6753_vm14, %v6785_v63 }
 0x8ce   :  { %4632 = vmatpush3.bf16.msk.msra.mxu0 %vm6754_vm2, %v6785_v63 }
 0x8cf   :  { %4634 = vmatprep.subr.msk.bf16.mxu0 %vm6755_vm4, %v6785_v63 }
 0x8d2   :  { %4636 = vmatpush3.bf16.msk.msra.mxu0 %vm6756_vm5, %v6785_v63 }
 0x8d3   :  { %4638 = vmatprep.subr.msk.bf16.mxu0 %vm6757_vm15, %v6785_v63 }
 0x8d6   :  { %4640 = vmatpush3.bf16.msk.msra.mxu0 %vm6823_vm11, %v6785_v63 }
 0x8d7   :  { %4642 = vmatprep.subr.msk.bf16.mxu0 %vm6824_vm6, %v6785_v63 }
 0x8da   :  { %4644 = vmatpush3.bf16.msk.msra.mxu0 %vm6825_vm12, %v6785_v63 }
 0x8db   :  { %4646 = vmatprep.subr.msk.bf16.mxu0 %vm6826_vm10, %v6785_v63  ;;  %vm6829_vm10 = vcmask 130048  }
 0x8de   :  { %4648 = vmatpush3.bf16.msk.msra.mxu0 %vm6827_vm0, %v6785_v63  ;;  %vm6828_vm0 = vcmask 1043456  }
 0x8df   :  { %vm6830_vm12 = vmmov %vm6828_vm0 }
 0x994   :  { %v1626_v57 = vpop.f32.mrb[50].mxu0 }
 0x995   :  { %v6109_v62 = vsub.f32 %v1385_v30, %v1626_v57  ;;  %v1628_v44 = vpop.f32.mrb[51].mxu0 }
 0x996   :  { %v6111_v17 = vsub.f32 %v1387_v45, %v1628_v44 }
 0x997   :  { %v1641_v51 = vmul.f32 %v6109_v62, %v6109_v62 }
 0x998   :  { %v1642_v38 = vmul.f32 %v6111_v17, %v6111_v17  ;;  %v1632_v48 = vpop.f32.mrb[52].mxu0 }
 0x999   :  { %v6117_v50 = vsub.f32 %v1391_v41, %v1632_v48  ;;  %v1634_v26 = vpop.f32.mrb[53].mxu0  ;;  %v490_v41 = vld [vmem:[%s6633_s3] sm:$0xff] }
 0x99a   :  { %v6119_v60 = vsub.f32 %v1393_v59, %v1634_v26  ;;  %1709 = vmatprep.mubr.f32.mxu0 %v1642_v38  ;;  %1799 = vperm.xlu1 %4930, %v490_v41   ;;  %v491_v59 = vld [vmem:[%s6633_s3 + $0x8] sm:$0xff] }
 0x99b   :  { %1710 = vmatmul.mubr.f32.vlgmr.msra.gmra.mrb[54].mxu0 %v1641_v51  ;;  %v1643_v45 = vmul.f32 %v6117_v50, %v6117_v50  ;;  %1897 = vperm.xlu0 %4931, %v490_v41  }
 0x99c   :  { %v1644_v30 = vmul.f32 %v6119_v60, %v6119_v60 }
 0x99e   :  { %1714 = vmatprep.mubr.f32.mxu0 %v1644_v30  ;;  %1804 = vperm.xlu1 %4930, %v491_v59  }
 0x99f   :  { %1715 = vmatmul.mubr.f32.gmra.mrb[56].mxu0 %v1643_v45  ;;  %4954 = vset.pattern.permute.xlu0 %v6800_v55 }
 0x9a0   :  { %2061 = vmatprep.mubr.f32.mxu0 %v6795_v32 }
 0x9a2   :  { %4932 = vset.pattern.permute.xlu1 %v6801_v61 }
 0x9a3   :  { %1901 = vperm.xlu1 %4932, %v491_v59  }
 0x9a7   :  { %4953 = vset.pattern.permute.xlu1 %v6800_v55 }
 0xa19   :  { %v1800_v38 = vpop.permute.xlu1 %1799 }
 0xa1a   :  { %v1898_v41 = vpop.permute.xlu0 %1897 }
 0xa6e   :  { %v4221_v42 = vpop.f32.mrb[54].mxu0 }
 0xa6f   :  { %v4222_v13 = vpop.f32.mrb[55].mxu0 }
 0xa70   :  { %v4223_v36 = vadd.f32 %v4222_v13, %v4221_v42 }
 0xa72   :  { %v4224_v23 = vpop.f32.mrb[56].mxu0 }
 0xa73   :  { %v4225_v47 = vpop.f32.mrb[57].mxu0 }
 0xa74   :  { %v4226_v27 = vadd.f32 %v4225_v47, %v4224_v23 }
 0xa76   :  { %v4649_v29 = vpack.c.bf16 %v4226_v27, %v4223_v36 }
 0xa78   :  { %4650 = vmatprep.subr.bf16.mxu1 %v4649_v29 }
 0xa79   :  { %4652 = vmatpush3.bf16.msra.mxu1 %v4649_v29 }
 0xa7a   :  { %3799 = vmatprep.subr.msk.mxu1 %vm6828_vm0, %v5509_v7  ;;  %vm6831_vm0 = vcmask 31744  }
 0xa7c   :  { %4439 = vmatmul.mubr.msk.f32.vlgmr.msra.gmra.mrb[24].mxu1 %vm6829_vm10, %v1471_v14  ;;  %v1805_v14 = vpop.permute.xlu1 %1804  ;;  %vm6832_vm10 = vmmov %vm6831_vm0 }
 0xa7d   :  { %3800 = vmatpush1.msk.msra.mxu1 %vm6830_vm12, %v5517_v8  ;;  %1879 = vmatprep.mubr.f32.mxu1 %v6795_v32  ;;  %vm6833_vm12 = vnez %v6744_v52 }
 0xa7e   :  { %4670 = vmatprep.subr.msk.bf16.mxu1 %vm6820_vm8, %v6785_v63 }
 0xa80   :  { %v1902_v27 = vpop.permute.xlu1 %1901 }
 0xb4f   :  { %v4440_v55 = vpop.f32.mrb[24].mxu1 }
 0xb50   :  { %v1786_v58 = vpop.f32.mrb[25].mxu1  ;;  %v1792_v57 = vadd.f32 1e-05, %v4440_v55 }
 0xb51   :  { %v1787_v44 = vadd.f32 1e-05, %v1786_v58 }
 0xb53   :  { %5045 = vrsqrt.f32 %v1787_v44 }
 0xb54   :  { %5047 = vrsqrt.f32 %v1792_v57 }
 0xb5d   :  { %v5046_v48 = vpop.eup %5045 }
 0xb5e   :  { %v1807_v51 = vmul.f32 %v5046_v48, %v1800_v38  ;;  %v5048_v26 = vpop.eup %5047 }
 0xb5f   :  { %v1808_v30 = vmul.f32 %v5048_v26, %v1805_v14 }
 0xb60   :  { %3801 = vmatmul.mubr.msk.f32.vlgmr.msra.gmra.mrb[26].mxu1 %vm6831_vm0, %v1807_v51  ;;  %vm6834_vm0 = vnez %v6746_v53 }
 0xb61   :  { %1885 = vmatprep.mubr.f32.mxu1 %v6795_v32  ;;  %4672 = vmatpush3.bf16.msk.msra.mxu1 %vm5268_vm1, %v6785_v63 }
 0xb62   :  { %4674 = vmatprep.subr.msk.bf16.mxu1 %vm6749_vm7, %v6785_v63 }
 0xb64   :  { %3802 = vmatmul.mubr.msk.f32.gmra.mrb[28].mxu1 %vm6832_vm10, %v1808_v30  ;;  %vm6835_vm10 = vnez %v6748_v54 }
 0xb65   :  { %4676 = vmatpush3.bf16.msk.msra.mxu1 %vm6750_vm9, %v6785_v63 }
 0xb66   :  { %4678 = vmatprep.subr.msk.bf16.mxu1 %vm6751_vm3, %v6785_v63 }
 0xb69   :  { %4680 = vmatpush3.bf16.msk.msra.mxu1 %vm6752_vm13, %v6785_v63 }
 0xb6a   :  { %4682 = vmatprep.subr.msk.bf16.mxu1 %vm6753_vm14, %v6785_v63 }
 0xb6d   :  { %4684 = vmatpush3.bf16.msk.msra.mxu1 %vm6754_vm2, %v6785_v63 }
 0xb6e   :  { %4686 = vmatprep.subr.msk.bf16.mxu1 %vm6755_vm4, %v6785_v63 }
 0xb71   :  { %4688 = vmatpush3.bf16.msk.msra.mxu1 %vm6756_vm5, %v6785_v63 }
 0xb72   :  { %4690 = vmatprep.subr.msk.bf16.mxu1 %vm6757_vm15, %v6785_v63 }
 0xb75   :  { %4692 = vmatpush3.bf16.msk.msra.mxu1 %vm6823_vm11, %v6785_v63  ;;  %vm6840_vm11 = vnez %v6805_v9 }
 0xb76   :  { %4694 = vmatprep.subr.msk.bf16.mxu1 %vm6824_vm6, %v6785_v63 }
 0xb79   :  { %4696 = vmatpush3.bf16.msk.msra.mxu1 %vm6833_vm12, %v6785_v63 }
 0xb7a   :  { %4698 = vmatprep.subr.msk.bf16.mxu1 %vm6834_vm0, %v6785_v63 }
 0xb7d   :  { %4700 = vmatpush3.bf16.msk.msra.mxu1 %vm6835_vm10, %v6785_v63  ;;  %vm6836_vm10 = vcmp.lt.s32.totalorder %v5230_v2, 1 }
 0xb7e   :  { %vm6837_vm0 = vmmov %vm6836_vm10 }
 0xb7f   :  { %vm6838_vm12 = vmmov %vm6837_vm0 }
 0xb80   :  { %vm6839_vm6 = vmmov %vm6837_vm0 }
 0xc33   :  { %v1881_v45 = vpop.f32.mrb[26].mxu1 }
 0xc34   :  { %v1892_v59 = vmul.f32 %v1881_v45, %v6109_v62  ;;  %v1883_v42 = vpop.f32.mrb[27].mxu1 }
 0xc35   :  { %v1893_v13 = vmul.f32 %v1883_v42, %v6111_v17 }
 0xc36   :  { %v1904_v36 = vadd.f32 %v1898_v41, %v1892_v59 }
 0xc37   :  { %v1905_v23 = vadd.f32 %v1898_v41, %v1893_v13  ;;  %v1887_v47 = vpop.f32.mrb[28].mxu1 }
 0xc38   :  { %v1908_v29 = vsub.f32 0.0, %v1904_v36  ;;  %v1894_v55 = vmul.f32 %v1887_v47, %v6117_v50  ;;  %v1889_v58 = vpop.f32.mrb[29].mxu1 }
 0xc39   :  { %v1909_v57 = vsub.f32 0.0, %v1905_v23  ;;  %v1895_v44 = vmul.f32 %v1889_v58, %v6119_v60 }
 0xc3a   :  { %v1912_v38 = vmul.f32 1.442695, %v1908_v29  ;;  %v1906_v48 = vadd.f32 %v1902_v27, %v1894_v55 }
 0xc3b   :  { %v1914_v51 = vmul.f32 1.442695, %v1909_v57  ;;  %v1907_v26 = vadd.f32 %v1902_v27, %v1895_v44 }
 0xc3c   :  { %5049 = vpow2.f32 %v1912_v38  ;;  %v1910_v62 = vsub.f32 0.0, %v1906_v48 }
 0xc3d   :  { %5051 = vpow2.f32 %v1914_v51  ;;  %v1911_v14 = vsub.f32 0.0, %v1907_v26 }
 0xc3e   :  { %v1916_v17 = vmul.f32 1.442695, %v1910_v62 }
 0xc3f   :  { %v1918_v30 = vmul.f32 1.442695, %v1911_v14 }
 0xc40   :  { %5053 = vpow2.f32 %v1916_v17 }
 0xc41   :  { %5055 = vpow2.f32 %v1918_v30 }
 0xc46   :  { %v5050_v45 = vpop.eup %5049 }
 0xc47   :  { %v5052_v41 = vpop.eup %5051  ;;  %v1920_v59 = vadd.f32 1.0, %v5050_v45 }
 0xc48   :  { %v1921_v50 = vadd.f32 1.0, %v5052_v41 }
 0xc49   :  { %5057 = vrcp.f32 %v1920_v59 }
 0xc4a   :  { %v5054_v42 = vpop.eup %5053  ;;  %5059 = vrcp.f32 %v1921_v50 }
 0xc4b   :  { %v5056_v13 = vpop.eup %5055  ;;  %v1922_v60 = vadd.f32 1.0, %v5054_v42 }
 0xc4c   :  { %v1923_v47 = vadd.f32 1.0, %v5056_v13 }
 0xc4d   :  { %5061 = vrcp.f32 %v1922_v60 }
 0xc4e   :  { %5063 = vrcp.f32 %v1923_v47 }
 0xc53   :  { %v5058_v27 = vpop.eup %5057 }
 0xc54   :  { %v5060_v29 = vpop.eup %5059  ;;  %v1928_v57 = vmul.f32 %v5058_v27, %v1904_v36 }
 0xc55   :  { %v1929_v38 = vmul.f32 %v5060_v29, %v1905_v23 }
 0xc57   :  { %v5062_v55 = vpop.eup %5061 }
 0xc58   :  { %v5064_v58 = vpop.eup %5063  ;;  %v1930_v44 = vmul.f32 %v5062_v55, %v1906_v48 }
 0xc59   :  { %v1931_v51 = vmul.f32 %v5064_v58, %v1907_v26 }
 0xc5a   :  { %v4933_v62 = vpack.i.bf16 %v1930_v44, %v1928_v57  ;;  %v4661_v14 = vpack.c.bf16 %v1930_v44, %v1928_v57 }
 0xc5b   :  { %v4938_v17 = vpack.i.bf16 %v1931_v51, %v1929_v38  ;;  %v4659_v30 = vpack.c.bf16 %v1931_v51, %v1929_v38 }
 0xc5c   :  { %4934 = vrot.lane.b32.xlu1 %v4933_v62, %s5143_s2 }
 0xc5d   :  { %4939 = vrot.lane.b32.xlu0 %v4938_v17, %s5143_s2 }
 0xc60   :  { %4944 = vrot.lane.b32.xlu1 %v4933_v62, %s5144_s28 }
 0xc61   :  { %4949 = vrot.lane.b32.xlu0 %v4938_v17, %s5144_s28 }
 0xc64   :  { %2500 = vperm.xlu1 %4953, %v5940_v0  }
 0xc65   :  { %2504 = vperm.xlu0 %4954, %v5945_v1  }
 0xc68   :  { %4955 = vset.pattern.permute.xlu1 %v6801_v61 }
 0xc69   :  { %2597 = vperm.xlu1 %4955, %v5940_v0  }
 0xc6d   :  { %2601 = vperm.xlu1 %4955, %v5945_v1  }
 0xcce   :  { %v4935_v36 = vpop.permute.xlu1 %4934 }
 0xccf   :  { %v4937_v23 = vunpack.i.h.bf16 %v4935_v36  ;;  %v4936_v48 = vunpack.i.l.bf16 %v4935_v36  ;;  %v4940_v26 = vpop.permute.xlu0 %4939 }
 0xcd0   :  { %v4942_v45 = vunpack.i.h.bf16 %v4940_v26  ;;  %v4941_v41 = vunpack.i.l.bf16 %v4940_v26 }
 0xcd2   :  { %v1941_v59 = vsel %vm6836_vm10, %v4937_v23, %v4942_v45  ;;  %v1943_v50 = vsel %vm6837_vm0, %v4942_v45, %v4937_v23  ;;  %v1940_v42 = vsel %vm6838_vm12, %v4936_v48, %v4941_v41  ;;  %v1942_v61 = vsel %vm6839_vm6, %v4941_v41, %v4936_v48  ;;  %v4945_v13 = vpop.permute.xlu1 %4944  ;;  %v1976_v23 = vld [vmem:[%s6639_s9] sm:$0xff] }
 0xcd3   :  { %v4653_v60 = vpack.c.bf16 %v1941_v59, %v1940_v42  ;;  %v4656_v47 = vpack.c.bf16 %v1943_v50, %v1942_v61  ;;  %v4947_v27 = vunpack.i.h.bf16 %v4945_v13  ;;  %v4946_v29 = vunpack.i.l.bf16 %v4945_v13  ;;  %v4950_v55 = vpop.permute.xlu0 %4949 }
 0xcd4   :  { %v4952_v58 = vunpack.i.h.bf16 %v4950_v55  ;;  %v4951_v57 = vunpack.i.l.bf16 %v4950_v55  ;;  %vm6841_vm10 = vcmp.lt.s32.totalorder %v5230_v2, 127  ;;  %vm6843_vm12 = vnez %v6807_v56 }
 0xcd5   :  { %4655 = vmatprep.subr.msk.bf16.mxu0 %vm6840_vm11, %v4653_v60  ;;  %vm6842_vm0 = vmmov %vm6841_vm10  ;;  %vm6846_vm11 = vnez %v6814_v39 }
 0xcd6   :  { %v1959_v44 = vsel %vm6841_vm10, %v4952_v58, %v4947_v27  ;;  %v1958_v38 = vsel %vm6842_vm0, %v4951_v57, %v4946_v29  ;;  %4658 = vmatpush1.bf16.msk.msra.mxu0 %vm6843_vm12, %v4656_v47  ;;  %vm6844_vm6 = vmmov %vm6842_vm0  ;;  %vm6847_vm10 = vnez %v6817_v5 }
 0xcd7   :  { %4660 = vmatprep.subr.bf16.mxu0 %v4659_v30  ;;  %v1957_v51 = vsel %vm6844_vm6, %v4947_v27, %v4952_v58  ;;  %vm6845_vm15 = vmmov %vm6842_vm0  ;;  %v4663_v17 = vpack.c.bf16 %v1959_v44, %v1958_v38  ;;  %vm6714_vm0 = vcmask 392192   ;;  %vm6850_vm6 = vnez %v6763_v6  ;;  %v6858_v58 = vld [vmem:[#allocation10_spill] sm:$0xff]  ;;  %v6865_v6 = vld [vmem:[#allocation9_spill] sm:$0xff] }
 0xcd8   :  { %v1956_v62 = vsel %vm6845_vm15, %v4946_v29, %v4951_v57  ;;  %vm6848_vm15 = vnez %v6761_v4  ;;  %v6851_v41 = vsel %vm6850_vm6, %v5669_v10, 0.0  ;;  %v6861_v4 = vld [vmem:[#allocation7_spill] sm:$0xff] }
 0xcd9   :  { %v4666_v36 = vpack.c.bf16 %v1957_v51, %v1956_v62  ;;  %v6849_v48 = vsel %vm6848_vm15, %v5664_v3, 0.0  ;;  %v6856_v47 = vsel %vm6848_vm15, %v5674_v11, 0.0  ;;  %v6863_v51 = vld [vmem:[#allocation11_spill] sm:$0xff]  ;;  %vm6870_vm15 = vcmask 1043456  }
 0xcda   :  { %4662 = vmatpush1.bf16.msra.mxu0 %v4661_v14  ;;  %v1977_v14 = vld [vmem:[%s6639_s9 + $0x8] sm:$0xff] }
 0xcdb   :  { %4665 = vmatprep.subr.msk.bf16.mxu0 %vm6846_vm11, %v4663_v17  ;;  %vm6854_vm11 = vnez %v6767_v20  ;;  %v6281_v20 = vld [vmem:[%s6637_s7] sm:$0xff] }
 0xcdc   :  { %v6855_v61 = vsel %vm6854_vm11, %v5697_v24, 0.0  ;;  %v6859_v24 = vld [vmem:[#allocation6_spill] sm:$0xff]  ;;  %v6862_v11 = vsel %vm6854_vm11, %v6861_v4, 0.0  ;;  %vm6868_vm11 = vcmask 130048  }
 0xcde   :  { %4668 = vmatpush1.bf16.msk.msra.mxu0 %vm6847_vm10, %v4666_v36  ;;  %vm6852_vm10 = vnez %v6765_v18 }
 0xcdf   :  { %v6853_v50 = vsel %vm6852_vm10, %v5692_v21, 0.0  ;;  %v6857_v21 = vsel %vm6850_vm6, %v5679_v15, 0.0  ;;  %v6860_v44 = vsel %vm6852_vm10, %v6859_v24, 0.0  ;;  %v6866_v15 = vld [vmem:[#allocation12_spill] sm:$0xff]  ;;  %vm6869_vm10 = vmmov %vm6868_vm11 }
 0xce0   :  { %vm6871_vm6 = vmmov %vm6869_vm10 }
 0xce1   :  { %3803 = vmatmul.mubr.msk.f32.vlgmr.msra.gmra.mrb[0].mxu0 %vm6714_vm0, %v1976_v23 }
 0xce2   :  { %2067 = vmatprep.mubr.f32.mxu0 %v6795_v32 }
 0xce5   :  { %3804 = vmatmul.mubr.msk.f32.gmra.mrb[2].mxu0 %vm6714_vm0, %v1977_v14  ;;  %v6867_v14 = vld [vmem:[#allocation13_spill] sm:$0xff]  ;;  %vm6879_vm0 = vnez %v6746_v53 }
 0xce6   :  { %4445 = vmatprep.mubr.msk.f32.mxu0 %vm6868_vm11, %v6281_v20  ;;  %vm6872_vm11 = vmmov %vm6870_vm15 }
 0xdb4   :  { %v2063_v30 = vpop.f32.mrb[0].mxu0 }
 0xdb5   :  { %v2078_v26 = vsub.f32 %v2063_v30, %v6849_v48  ;;  %v2065_v45 = vpop.f32.mrb[1].mxu0 }
 0xdb6   :  { %v2079_v59 = vsub.f32 %v2065_v45, %v6851_v41 }
 0xdb7   :  { %v2086_v42 = vsub.f32 %v2078_v26, %v6853_v50 }
 0xdb8   :  { %v2087_v13 = vsub.f32 %v2079_v59, %v6855_v61  ;;  %v2069_v60 = vpop.f32.mrb[2].mxu0 }
 0xdb9   :  { %v2090_v3 = vmul.f32 %v2086_v42, %v5712_v33  ;;  %v2080_v27 = vsub.f32 %v2069_v60, %v6856_v47  ;;  %v2071_v10 = vpop.f32.mrb[3].mxu0  ;;  %v6290_v42 = vld [vmem:[%s6637_s7 + $0x8] sm:$0xff] }
 0xdba   :  { %v2091_v29 = vmul.f32 %v2087_v13, %v5714_v35  ;;  %v2081_v55 = vsub.f32 %v2071_v10, %v6857_v21  ;;  %v6864_v35 = vld [vmem:[#allocation8_spill] sm:$0xff] }
 0xdbb   :  { %v2094_v57 = vadd.f32 %v2090_v3, %v6858_v58  ;;  %v2088_v33 = vsub.f32 %v2080_v27, %v6860_v44 }
 0xdbc   :  { %v2089_v38 = vsub.f32 %v2081_v55, %v6862_v11  ;;  %v2095_v62 = vadd.f32 %v2091_v29, %v6863_v51 }
 0xdbd   :  { %v2092_v17 = vmul.f32 %v2088_v33, %v6864_v35 }
 0xdbe   :  { %v2093_v36 = vmul.f32 %v2089_v38, %v6865_v6  ;;  %2162 = vmatprep.mubr.f32.mxu1 %v2095_v62 }
 0xdbf   :  { %2163 = vmatmul.mubr.f32.vlgmr.msra.gmra.mrb[30].mxu1 %v2094_v57  ;;  %v2096_v23 = vadd.f32 %v2092_v17, %v6866_v15 }
 0xdc0   :  { %v2097_v18 = vadd.f32 %v2093_v36, %v6867_v14 }
 0xdc2   :  { %2167 = vmatprep.mubr.f32.mxu1 %v2097_v18 }
 0xdc3   :  { %2168 = vmatmul.mubr.f32.gmra.mrb[32].mxu1 %v2096_v23 }
 0xdc4   :  { %4452 = vmatprep.mubr.msk.f32.mxu1 %vm6869_vm10, %v6281_v20  ;;  %vm6873_vm10 = vcmask 31744  }
 0xe92   :  { %v4263_v30 = vpop.f32.mrb[30].mxu1 }
 0xe93   :  { %v4264_v48 = vpop.f32.mrb[31].mxu1 }
 0xe94   :  { %v4265_v26 = vadd.f32 %v4264_v48, %v4263_v30  ;;  %v2505_v48 = vpop.permute.xlu0 %2504 }
 0xe96   :  { %v4266_v45 = vpop.f32.mrb[32].mxu1 }
 0xe97   :  { %v4267_v41 = vpop.f32.mrb[33].mxu1 }
 0xe98   :  { %v4268_v59 = vadd.f32 %v4267_v41, %v4266_v45 }
 0xe9a   :  { %v4701_v50 = vpack.c.bf16 %v4268_v59, %v4265_v26 }
 0xe9c   :  { %4702 = vmatprep.subr.bf16.mxu0 %v4701_v50 }
 0xe9d   :  { %4704 = vmatpush3.bf16.msra.mxu0 %v4701_v50 }
 0xe9e   :  { %3839 = vmatprep.subr.msk.mxu0 %vm6870_vm15, %v5509_v7  ;;  %vm6874_vm15 = vmmov %vm6873_vm10 }
 0xea0   :  { %4446 = vmatmul.mubr.msk.f32.vlgmr.msra.gmra.mrb[58].mxu0 %vm6871_vm6, %v6290_v42  ;;  %vm6875_vm6 = vnez %v6738_v43 }
 0xea1   :  { %3840 = vmatpush1.msk.msra.mxu0 %vm6872_vm11, %v5517_v8  ;;  %2326 = vmatprep.mubr.f32.mxu0 %v6795_v32  ;;  %vm6876_vm11 = vnez %v6740_v46 }
 0xea2   :  { %4706 = vmatprep.subr.msk.bf16.mxu0 %vm6820_vm8, %v6785_v63 }
 0xf73   :  { %v4447_v61 = vpop.f32.mrb[58].mxu0 }
 0xf74   :  { %v2247_v13 = vpop.f32.mrb[59].mxu0 }
 0xf75   :  { %3841 = vmatmul.mubr.msk.f32.vlgmr.msra.gmra.mrb[60].mxu0 %vm6873_vm10, %v2247_v13  ;;  %vm6877_vm10 = vnez %v6742_v49 }
 0xf76   :  { %2332 = vmatprep.mubr.f32.mxu0 %v6795_v32  ;;  %4708 = vmatpush3.bf16.msk.msra.mxu0 %vm5268_vm1, %v6785_v63 }
 0xf77   :  { %4710 = vmatprep.subr.msk.bf16.mxu0 %vm6749_vm7, %v6785_v63 }
 0xf79   :  { %3842 = vmatmul.mubr.msk.f32.gmra.mrb[62].mxu0 %vm6874_vm15, %v4447_v61  ;;  %vm6878_vm15 = vnez %v6744_v52 }
 0xf7a   :  { %4712 = vmatpush3.bf16.msk.msra.mxu0 %vm6750_vm9, %v6785_v63 }
 0xf7b   :  { %4714 = vmatprep.subr.msk.bf16.mxu0 %vm6751_vm3, %v6785_v63 }
 0xf7e   :  { %4716 = vmatpush3.bf16.msk.msra.mxu0 %vm6752_vm13, %v6785_v63 }
 0xf7f   :  { %4718 = vmatprep.subr.msk.bf16.mxu0 %vm6753_vm14, %v6785_v63 }
 0xf82   :  { %4720 = vmatpush3.bf16.msk.msra.mxu0 %vm6754_vm2, %v6785_v63 }
 0xf83   :  { %4722 = vmatprep.subr.msk.bf16.mxu0 %vm6755_vm4, %v6785_v63 }
 0xf86   :  { %4724 = vmatpush3.bf16.msk.msra.mxu0 %vm6756_vm5, %v6785_v63  ;;  %vm6880_vm5 = vnez %v6748_v54 }
 0xf87   :  { %4726 = vmatprep.subr.msk.bf16.mxu0 %vm6875_vm6, %v6785_v63 }
 0xf8a   :  { %4728 = vmatpush3.bf16.msk.msra.mxu0 %vm6876_vm11, %v6785_v63  ;;  %vm6891_vm11 = vnez %v6805_v9 }
 0xf8b   :  { %4730 = vmatprep.subr.msk.bf16.mxu0 %vm6877_vm10, %v6785_v63 }
 0xf8e   :  { %4732 = vmatpush3.bf16.msk.msra.mxu0 %vm6878_vm15, %v6785_v63 }
 0xf8f   :  { %4734 = vmatprep.subr.msk.bf16.mxu0 %vm6879_vm0, %v6785_v63  ;;  %vm6881_vm0 = vcmask 130048  }
 0xf90   :  { %vm6883_vm15 = vmmov %vm6881_vm0 }
 0xf92   :  { %4736 = vmatpush3.bf16.msk.msra.mxu0 %vm6880_vm5, %v6785_v63  ;;  %vm6882_vm5 = vcmask 1043456  }
 0xf93   :  { %vm6884_vm10 = vmmov %vm6882_vm5 }
0x1048   :  { %v2328_v60 = vpop.f32.mrb[60].mxu0 }
0x1049   :  { %v2339_v3 = vsub.f32 %v2094_v57, %v2328_v60  ;;  %v2330_v47 = vpop.f32.mrb[61].mxu0 }
0x104a   :  { %v2340_v27 = vsub.f32 %v2095_v62, %v2330_v47 }
0x104b   :  { %v2343_v21 = vmul.f32 %v2339_v3, %v2339_v3 }
0x104c   :  { %v2344_v10 = vmul.f32 %v2340_v27, %v2340_v27  ;;  %v2334_v29 = vpop.f32.mrb[62].mxu0 }
0x104d   :  { %v2341_v55 = vsub.f32 %v2096_v23, %v2334_v29  ;;  %v2336_v58 = vpop.f32.mrb[63].mxu0  ;;  %v2501_v23 = vpop.permute.xlu1 %2500 }
0x104e   :  { %v2342_v24 = vsub.f32 %v2097_v18, %v2336_v58  ;;  %2411 = vmatprep.mubr.f32.mxu0 %v2344_v10 }
0x104f   :  { %2412 = vmatmul.mubr.f32.vlgmr.msra.gmra.mrb[64].mxu0 %v2343_v21  ;;  %v2345_v33 = vmul.f32 %v2341_v55, %v2341_v55 }
0x1050   :  { %v2346_v44 = vmul.f32 %v2342_v24, %v2342_v24 }
0x1051   :  { %v2598_v45 = vpop.permute.xlu1 %2597 }
0x1052   :  { %2416 = vmatprep.mubr.f32.mxu0 %v2346_v44 }
0x1053   :  { %2417 = vmatmul.mubr.f32.gmra.mrb[66].mxu0 %v2345_v33 }
0x1054   :  { %4459 = vmatprep.mubr.msk.f32.mxu0 %vm6881_vm0, %v6281_v20 }
0x1055   :  { %v2602_v44 = vpop.permute.xlu1 %2601 }
0x1122   :  { %v4305_v4 = vpop.f32.mrb[64].mxu0 }
0x1123   :  { %v4306_v11 = vpop.f32.mrb[65].mxu0 }
0x1124   :  { %v4307_v57 = vadd.f32 %v4306_v11, %v4305_v4 }
0x1126   :  { %v4308_v38 = vpop.f32.mrb[66].mxu0 }
0x1127   :  { %v4309_v51 = vpop.f32.mrb[67].mxu0 }
0x1128   :  { %v4310_v62 = vadd.f32 %v4309_v51, %v4308_v38 }
0x112a   :  { %v4737_v35 = vpack.c.bf16 %v4310_v62, %v4307_v57 }
0x112c   :  { %4738 = vmatprep.subr.bf16.mxu1 %v4737_v35 }
0x112d   :  { %4740 = vmatpush3.bf16.msra.mxu1 %v4737_v35 }
0x112e   :  { %3877 = vmatprep.subr.msk.mxu1 %vm6882_vm5, %v5509_v7  ;;  %vm6885_vm5 = vcmask 31744  }
0x112f   :  { %vm6886_vm0 = vmmov %vm6885_vm5 }
0x1130   :  { %4453 = vmatmul.mubr.msk.f32.vlgmr.msra.gmra.mrb[34].mxu1 %vm6883_vm15, %v6290_v42 }
0x1131   :  { %3878 = vmatpush1.msk.msra.mxu1 %vm6884_vm10, %v5517_v8  ;;  %2579 = vmatprep.mubr.f32.mxu1 %v6795_v32  ;;  %vm6887_vm10 = vcmp.lt.s32.totalorder %v5230_v2, 1 }
0x1132   :  { %vm6888_vm15 = vmmov %vm6887_vm10 }
0x1203   :  { %v4454_v17 = vpop.f32.mrb[34].mxu1 }
0x1204   :  { %v2488_v6 = vpop.f32.mrb[35].mxu1  ;;  %v2494_v36 = vadd.f32 1e-05, %v4454_v17 }
0x1205   :  { %v2489_v15 = vadd.f32 1e-05, %v2488_v6 }
0x1207   :  { %5065 = vrsqrt.f32 %v2489_v15 }
0x1208   :  { %5067 = vrsqrt.f32 %v2494_v36 }
0x1211   :  { %v5066_v14 = vpop.eup %5065 }
0x1212   :  { %v2507_v18 = vmul.f32 %v5066_v14, %v2501_v23  ;;  %v5068_v30 = vpop.eup %5067 }
0x1213   :  { %v2508_v26 = vmul.f32 %v5068_v30, %v2505_v48 }
0x1214   :  { %3879 = vmatmul.mubr.msk.f32.vlgmr.msra.gmra.mrb[36].mxu1 %vm6885_vm5, %v2507_v18  ;;  %vm6889_vm5 = vmmov %vm6887_vm10 }
0x1215   :  { %2585 = vmatprep.mubr.f32.mxu1 %v6795_v32 }
0x1218   :  { %3880 = vmatmul.mubr.msk.f32.gmra.mrb[38].mxu1 %vm6886_vm0, %v2508_v26  ;;  %vm6890_vm0 = vmmov %vm6889_vm5 }
0x1219   :  { %2768 = vmatprep.mubr.f32.mxu1 %v6795_v32 }
0x12e7   :  { %v2581_v41 = vpop.f32.mrb[36].mxu1 }
0x12e8   :  { %v2592_v59 = vmul.f32 %v2581_v41, %v2339_v3  ;;  %v2583_v50 = vpop.f32.mrb[37].mxu1 }
0x12e9   :  { %v2593_v61 = vmul.f32 %v2583_v50, %v2340_v27 }
0x12ea   :  { %v2604_v13 = vadd.f32 %v2598_v45, %v2592_v59 }
0x12eb   :  { %v2605_v60 = vadd.f32 %v2598_v45, %v2593_v61  ;;  %v2587_v47 = vpop.f32.mrb[38].mxu1 }
0x12ec   :  { %v2608_v10 = vsub.f32 0.0, %v2604_v13  ;;  %v2594_v29 = vmul.f32 %v2587_v47, %v2341_v55  ;;  %v2589_v21 = vpop.f32.mrb[39].mxu1 }
0x12ed   :  { %v2609_v58 = vsub.f32 0.0, %v2605_v60  ;;  %v2595_v33 = vmul.f32 %v2589_v21, %v2342_v24 }
0x12ee   :  { %v2612_v4 = vmul.f32 1.442695, %v2608_v10  ;;  %v2606_v11 = vadd.f32 %v2602_v44, %v2594_v29  ;;  %v5146_v29 = vmov 5  }
0x12ef   :  { %v2614_v57 = vmul.f32 1.442695, %v2609_v58  ;;  %v2607_v38 = vadd.f32 %v2602_v44, %v2595_v33  ;;  %4976 = vset.pattern.permute.xlu0 %v5146_v29  ;;  %4977 = vset.pattern.permute.xlu1 %v5146_v29 }
0x12f0   :  { %5069 = vpow2.f32 %v2612_v4  ;;  %v2610_v51 = vsub.f32 0.0, %v2606_v11 }
0x12f1   :  { %5071 = vpow2.f32 %v2614_v57  ;;  %v2611_v62 = vsub.f32 0.0, %v2607_v38 }
0x12f2   :  { %v2616_v3 = vmul.f32 1.442695, %v2610_v51 }
0x12f3   :  { %v2618_v35 = vmul.f32 1.442695, %v2611_v62 }
0x12f4   :  { %5073 = vpow2.f32 %v2616_v3 }
0x12f5   :  { %5075 = vpow2.f32 %v2618_v35 }
0x12fa   :  { %v5070_v27 = vpop.eup %5069 }
0x12fb   :  { %v5072_v17 = vpop.eup %5071  ;;  %v2620_v6 = vadd.f32 1.0, %v5070_v27 }
0x12fc   :  { %v2621_v55 = vadd.f32 1.0, %v5072_v17 }
0x12fd   :  { %5077 = vrcp.f32 %v2620_v6 }
0x12fe   :  { %v5074_v36 = vpop.eup %5073  ;;  %5079 = vrcp.f32 %v2621_v55 }
0x12ff   :  { %v5076_v15 = vpop.eup %5075  ;;  %v2622_v24 = vadd.f32 1.0, %v5074_v36 }
0x1300   :  { %v2623_v23 = vadd.f32 1.0, %v5076_v15 }
0x1301   :  { %5081 = vrcp.f32 %v2622_v24 }
0x1302   :  { %5083 = vrcp.f32 %v2623_v23 }
0x1307   :  { %v5078_v14 = vpop.eup %5077 }
0x1308   :  { %v5080_v18 = vpop.eup %5079  ;;  %v2628_v26 = vmul.f32 %v5078_v14, %v2604_v13  ;;  %v2676_v14 = vld [vmem:[%s6640_s10] sm:$0xff] }
0x1309   :  { %v2629_v41 = vmul.f32 %v5080_v18, %v2605_v60  ;;  %v2677_v18 = vld [vmem:[%s6640_s10 + $0x8] sm:$0xff] }
0x130b   :  { %v5082_v30 = vpop.eup %5081 }
0x130c   :  { %v5084_v48 = vpop.eup %5083  ;;  %v2630_v45 = vmul.f32 %v5082_v30, %v2606_v11 }
0x130d   :  { %v2631_v59 = vmul.f32 %v5084_v48, %v2607_v38 }
0x130e   :  { %v4956_v50 = vpack.i.bf16 %v2630_v45, %v2628_v26  ;;  %v4749_v61 = vpack.c.bf16 %v2630_v45, %v2628_v26  ;;  %v6906_v26 = vld [vmem:[#allocation14_spill] sm:$0xff] }
0x130f   :  { %v4961_v47 = vpack.i.bf16 %v2631_v59, %v2629_v41  ;;  %v4747_v10 = vpack.c.bf16 %v2631_v59, %v2629_v41  ;;  %v2781_v45 = vadd.f32 1.0, %v6906_v26 }
0x1310   :  { %4957 = vrot.lane.b32.xlu0 %v4956_v50, %s5143_s2 }
0x1311   :  { %4962 = vrot.lane.b32.xlu1 %v4961_v47, %s5143_s2 }
0x1314   :  { %4967 = vrot.lane.b32.xlu0 %v4956_v50, %s5144_s28  ;;  %v6907_v50 = vld [vmem:[#allocation15_spill] sm:$0xff] }
0x1315   :  { %4972 = vrot.lane.b32.xlu1 %v4961_v47, %s5144_s28 }
0x1318   :  { %2691 = vperm.xlu0 %4976, %v5940_v0  }
0x1319   :  { %2695 = vperm.xlu1 %4977, %v5945_v1  }
0x1382   :  { %v4958_v13 = vpop.permute.xlu0 %4957 }
0x1383   :  { %v4960_v60 = vunpack.i.h.bf16 %v4958_v13  ;;  %v4959_v21 = vunpack.i.l.bf16 %v4958_v13  ;;  %v4963_v58 = vpop.permute.xlu1 %4962 }
0x1384   :  { %v4965_v44 = vunpack.i.h.bf16 %v4963_v58  ;;  %v4964_v33 = vunpack.i.l.bf16 %v4963_v58 }
0x1386   :  { %v2641_v4 = vsel %vm6887_vm10, %v4960_v60, %v4965_v44  ;;  %v2643_v11 = vsel %vm6888_vm15, %v4965_v44, %v4960_v60  ;;  %v2640_v57 = vsel %vm6889_vm5, %v4959_v21, %v4964_v33  ;;  %v2642_v0 = vsel %vm6890_vm0, %v4964_v33, %v4959_v21  ;;  %v4968_v38 = vpop.permute.xlu0 %4967  ;;  %v6908_v21 = vld [vmem:[#allocation16_spill] sm:$0xff] }
0x1387   :  { %v4741_v1 = vpack.c.bf16 %v2641_v4, %v2640_v57  ;;  %v4744_v51 = vpack.c.bf16 %v2643_v11, %v2642_v0  ;;  %v4970_v62 = vunpack.i.h.bf16 %v4968_v38  ;;  %v4969_v3 = vunpack.i.l.bf16 %v4968_v38  ;;  %v4973_v35 = vpop.permute.xlu1 %4972  ;;  %v6909_v11 = vld [vmem:[#allocation17_spill] sm:$0xff] }
0x1388   :  { %v4975_v27 = vunpack.i.h.bf16 %v4973_v35  ;;  %v4974_v17 = vunpack.i.l.bf16 %v4973_v35  ;;  %vm6892_vm10 = vcmp.lt.s32.totalorder %v5230_v2, 127  ;;  %v2783_v58 = vadd.f32 1.0, %v6908_v21 }
0x1389   :  { %4743 = vmatprep.subr.msk.bf16.mxu1 %vm6891_vm11, %v4741_v1  ;;  %vm6893_vm15 = vmmov %vm6892_vm10  ;;  %vm6896_vm11 = vnez %v6814_v39  ;;  %v2784_v57 = vadd.f32 1.0, %v6909_v11 }
0x138a   :  { %v2659_v6 = vsel %vm6892_vm10, %v4975_v27, %v4970_v62  ;;  %v2658_v55 = vsel %vm6893_vm15, %v4974_v17, %v4969_v3  ;;  %4746 = vmatpush1.bf16.msk.msra.mxu1 %vm6843_vm12, %v4744_v51  ;;  %vm6894_vm5 = vmmov %vm6892_vm10  ;;  %vm6897_vm10 = vnez %v6817_v5  ;;  %vm6898_vm15 = vcmask 392192  }
0x138b   :  { %4748 = vmatprep.subr.bf16.mxu1 %v4747_v10  ;;  %v2657_v36 = vsel %vm6894_vm5, %v4970_v62, %v4975_v27  ;;  %vm6895_vm0 = vmmov %vm6894_vm5  ;;  %v4751_v24 = vpack.c.bf16 %v2659_v6, %v2658_v55  ;;  %vm6905_vm12 = vnez %v6748_v54 }
0x138c   :  { %v2656_v15 = vsel %vm6895_vm0, %v4969_v3, %v4974_v17  ;;  %vm6899_vm5 = vmmov %vm6898_vm15  ;;  %vm6900_vm0 = vnez %v6736_v40 }
0x138d   :  { %v4754_v23 = vpack.c.bf16 %v2657_v36, %v2656_v15 }
0x138e   :  { %4750 = vmatpush1.bf16.msra.mxu1 %v4749_v61  ;;  %v2782_v61 = vadd.f32 1.0, %v6907_v50 }
0x138f   :  { %4753 = vmatprep.subr.msk.bf16.mxu1 %vm6896_vm11, %v4751_v24  ;;  %vm6904_vm11 = vnez %v6746_v53 }
0x1392   :  { %4756 = vmatpush1.bf16.msk.msra.mxu1 %vm6897_vm10, %v4754_v23  ;;  %vm6903_vm10 = vnez %v6744_v52 }
0x1393   :  { %4758 = vmatprep.subr.msk.bf16.mxu1 %vm6820_vm8, %v6785_v63 }
0x1395   :  { %3881 = vmatmul.mubr.msk.f32.vlgmr.msra.gmra.mrb[40].mxu1 %vm6898_vm15, %v2676_v14  ;;  %vm6901_vm15 = vnez %v6740_v46 }
0x1396   :  { %2774 = vmatprep.mubr.f32.mxu1 %v6795_v32  ;;  %4760 = vmatpush3.bf16.msk.msra.mxu1 %vm5268_vm1, %v6785_v63 }
0x1397   :  { %4762 = vmatprep.subr.msk.bf16.mxu1 %vm6749_vm7, %v6785_v63  ;;  %v2692_v30 = vpop.permute.xlu0 %2691 }
0x1398   :  { %v2696_v10 = vpop.permute.xlu1 %2695 }
0x1399   :  { %3882 = vmatmul.mubr.msk.f32.gmra.mrb[42].mxu1 %vm6899_vm5, %v2677_v18  ;;  %vm6902_vm5 = vnez %v6742_v49 }
0x139a   :  { %4764 = vmatpush3.bf16.msk.msra.mxu1 %vm6750_vm9, %v6785_v63 }
0x139b   :  { %4766 = vmatprep.subr.msk.bf16.mxu1 %vm6751_vm3, %v6785_v63 }
0x139e   :  { %4768 = vmatpush3.bf16.msk.msra.mxu1 %vm6752_vm13, %v6785_v63 }
0x139f   :  { %4770 = vmatprep.subr.msk.bf16.mxu1 %vm6753_vm14, %v6785_v63 }
0x13a2   :  { %4772 = vmatpush3.bf16.msk.msra.mxu1 %vm6754_vm2, %v6785_v63 }
0x13a3   :  { %4774 = vmatprep.subr.msk.bf16.mxu1 %vm6755_vm4, %v6785_v63 }
0x13a6   :  { %4776 = vmatpush3.bf16.msk.msra.mxu1 %vm6900_vm0, %v6785_v63 }
0x13a7   :  { %4778 = vmatprep.subr.msk.bf16.mxu1 %vm6875_vm6, %v6785_v63 }
0x13aa   :  { %4780 = vmatpush3.bf16.msk.msra.mxu1 %vm6901_vm15, %v6785_v63 }
0x13ab   :  { %4782 = vmatprep.subr.msk.bf16.mxu1 %vm6902_vm5, %v6785_v63 }
0x13ae   :  { %4784 = vmatpush3.bf16.msk.msra.mxu1 %vm6903_vm10, %v6785_v63 }
0x13af   :  { %4786 = vmatprep.subr.msk.bf16.mxu1 %vm6904_vm11, %v6785_v63  ;;  %vm6911_vm11 = vcmask 1043456  }
0x13b0   :  { %vm6913_vm5 = vmmov %vm6911_vm11 }
0x13b2   :  { %4788 = vmatpush3.bf16.msk.msra.mxu1 %vm6905_vm12, %v6785_v63  ;;  %vm6910_vm12 = vcmask 130048  }
0x13b3   :  { %vm6912_vm10 = vmmov %vm6910_vm12 }
0x1468   :  { %v2770_v48 = vpop.f32.mrb[40].mxu1 }
0x1469   :  { %v2771_v41 = vadd.f32 %v2770_v48, %v2692_v30  ;;  %v2772_v59 = vpop.f32.mrb[41].mxu1 }
0x146a   :  { %v2773_v47 = vadd.f32 %v2772_v59, %v2692_v30 }
0x146b   :  { %v2785_v29 = vmul.f32 %v2781_v45, %v2771_v41 }
0x146c   :  { %v2786_v13 = vmul.f32 %v2782_v61, %v2773_v47  ;;  %v2776_v60 = vpop.f32.mrb[42].mxu1 }
0x146d   :  { %v2789_v44 = vadd.f32 %v2785_v29, %v6906_v26  ;;  %v2777_v33 = vadd.f32 %v2776_v60, %v2696_v10  ;;  %v2778_v4 = vpop.f32.mrb[43].mxu1  ;;  %v5148_v26 = vmov 3  }
0x146e   :  { %v2779_v0 = vadd.f32 %v2778_v4, %v2696_v10  ;;  %v2790_v38 = vadd.f32 %v2786_v13, %v6907_v50 }
0x146f   :  { %v2787_v1 = vmul.f32 %v2783_v58, %v2777_v33 }
0x1470   :  { %v2788_v51 = vmul.f32 %v2784_v57, %v2779_v0  ;;  %2857 = vmatprep.mubr.f32.mxu1 %v2790_v38 }
0x1471   :  { %2858 = vmatmul.mubr.f32.vlgmr.msra.gmra.mrb[44].mxu1 %v2789_v44  ;;  %v2791_v62 = vadd.f32 %v2787_v1, %v6908_v21 }
0x1472   :  { %v2792_v3 = vadd.f32 %v2788_v51, %v6909_v11 }
0x1474   :  { %2862 = vmatprep.mubr.f32.mxu1 %v2792_v3 }
0x1475   :  { %2863 = vmatmul.mubr.f32.gmra.mrb[46].mxu1 %v2791_v62 }
0x1476   :  { %4466 = vmatprep.mubr.msk.f32.mxu1 %vm6910_vm12, %v6281_v20  ;;  %vm6914_vm12 = vcmask 31744  }
0x1544   :  { %v4347_v35 = vpop.f32.mrb[44].mxu1 }
0x1545   :  { %v4348_v27 = vpop.f32.mrb[45].mxu1 }
0x1546   :  { %v4349_v17 = vadd.f32 %v4348_v27, %v4347_v35 }
0x1548   :  { %v4350_v6 = vpop.f32.mrb[46].mxu1 }
0x1549   :  { %v4351_v55 = vpop.f32.mrb[47].mxu1 }
0x154a   :  { %v4352_v36 = vadd.f32 %v4351_v55, %v4350_v6 }
0x154c   :  { %v4789_v15 = vpack.c.bf16 %v4352_v36, %v4349_v17 }
0x154e   :  { %4790 = vmatprep.subr.bf16.mxu0 %v4789_v15 }
0x154f   :  { %4792 = vmatpush3.bf16.msra.mxu0 %v4789_v15 }
0x1550   :  { %3917 = vmatprep.subr.msk.mxu0 %vm6911_vm11, %v5509_v7  ;;  %vm6915_vm11 = vmmov %vm6914_vm12 }
0x1552   :  { %4460 = vmatmul.mubr.msk.f32.vlgmr.msra.gmra.mrb[68].mxu0 %vm6912_vm10, %v6290_v42 }
0x1553   :  { %3918 = vmatpush1.msk.msra.mxu0 %vm6913_vm5, %v5517_v8  ;;  %3021 = vmatprep.mubr.f32.mxu0 %v6795_v32 }
0x1554   :  { %4794 = vmatprep.subr.msk.bf16.mxu0 %vm6820_vm8, %v6785_v63 }
0x1625   :  { %v4461_v20 = vpop.f32.mrb[68].mxu0 }
0x1626   :  { %v2942_v24 = vpop.f32.mrb[69].mxu0 }
0x1627   :  { %3919 = vmatmul.mubr.msk.f32.vlgmr.msra.gmra.mrb[70].mxu0 %vm6914_vm12, %v2942_v24  ;;  %vm6930_vm12 = vcmp.lt.s32.totalorder %v5230_v2, 127 }
0x1628   :  { %3027 = vmatprep.mubr.f32.mxu0 %v6795_v32  ;;  %4796 = vmatpush3.bf16.msk.msra.mxu0 %vm5268_vm1, %v6785_v63  ;;  %vm6916_vm1 = vnez %v6742_v49  ;;  %v5147_v49 = vmov 2  }
0x1629   :  { %4798 = vmatprep.subr.msk.bf16.mxu0 %vm6749_vm7, %v6785_v63  ;;  %vm6917_vm7 = vnez %v6744_v52  ;;  %4978 = vset.pattern.permute.xlu1 %v5147_v49  ;;  %v6521_v52 = vld [vmem:[%s6634_s4] sm:$0xff] }
0x162a   :  { %4979 = vset.pattern.permute.xlu0 %v5147_v49  ;;  %3195 = vperm.xlu1 %4978, %v6521_v52  }
0x162b   :  { %3920 = vmatmul.mubr.msk.f32.gmra.mrb[72].mxu0 %vm6915_vm11, %v4461_v20 }
0x162c   :  { %4800 = vmatpush3.bf16.msk.msra.mxu0 %vm6750_vm9, %v6785_v63  ;;  %vm6918_vm9 = vnez %v6746_v53  ;;  %v6527_v53 = vld [vmem:[%s6634_s4 + $0x8] sm:$0xff] }
0x162d   :  { %4802 = vmatprep.subr.msk.bf16.mxu0 %vm6751_vm3, %v6785_v63  ;;  %vm6919_vm3 = vnez %v6748_v54  ;;  %3199 = vperm.xlu0 %4979, %v6527_v53  }
0x162e   :  { %4980 = vset.pattern.permute.xlu1 %v5148_v26 }
0x162f   :  { %3292 = vperm.xlu1 %4980, %v6521_v52  }
0x1630   :  { %4804 = vmatpush3.bf16.msk.msra.mxu0 %vm6752_vm13, %v6785_v63  ;;  %vm6920_vm13 = vmmov %vm6913_vm5 }
0x1631   :  { %4806 = vmatprep.subr.msk.bf16.mxu0 %vm6753_vm14, %v6785_v63  ;;  %vm6921_vm14 = vmmov %vm6912_vm10 }
0x1633   :  { %3296 = vperm.xlu1 %4980, %v6527_v53  }
0x1634   :  { %4808 = vmatpush3.bf16.msk.msra.mxu0 %vm6754_vm2, %v6785_v63  ;;  %vm6922_vm2 = vmmov %vm6913_vm5  ;;  %vm6929_vm5 = vnez %v6805_v9  ;;  %v5107_v9 = vld [vmem:[%s6630_s0 + $0x8] sm:$0xff] }
0x1635   :  { %4810 = vmatprep.subr.msk.bf16.mxu0 %vm6755_vm4, %v6785_v63  ;;  %vm6923_vm4 = vmmov %vm6915_vm11 }
0x1636   :  { %vm6924_vm8 = vmmov %vm6923_vm4 }
0x1637   :  { %vm6931_vm11 = vmmov %vm6930_vm12 }
0x1638   :  { %4812 = vmatpush3.bf16.msk.msra.mxu0 %vm6900_vm0, %v6785_v63 }
0x1639   :  { %4814 = vmatprep.subr.msk.bf16.mxu0 %vm6875_vm6, %v6785_v63  ;;  %vm6925_vm6 = vcmp.lt.s32.totalorder %v5230_v2, 1  ;;  %v5109_v2 = vld [vmem:[%s6630_s0] sm:$0xff] }
0x163a   :  { %vm6926_vm10 = vmmov %vm6925_vm6 }
0x163b   :  { %vm6927_vm0 = vmmov %vm6925_vm6 }
0x163c   :  { %4816 = vmatpush3.bf16.msk.msra.mxu0 %vm6901_vm15, %v6785_v63  ;;  %vm6928_vm15 = vmmov %vm6927_vm0 }
0x163d   :  { %4818 = vmatprep.subr.msk.bf16.mxu0 %vm6916_vm1, %v6785_v63  ;;  %vm6932_vm1 = vnez %v6807_v56  ;;  %v5108_v56 = vld [vmem:[%s6630_s0 + $0x18] sm:$0xff] }
0x1640   :  { %4820 = vmatpush3.bf16.msk.msra.mxu0 %vm6917_vm7, %v6785_v63  ;;  %vm6933_vm7 = vmmov %vm6931_vm11 }
0x1641   :  { %4822 = vmatprep.subr.msk.bf16.mxu0 %vm6918_vm9, %v6785_v63  ;;  %vm6934_vm9 = vmmov %vm6933_vm7 }
0x1644   :  { %4824 = vmatpush3.bf16.msk.msra.mxu0 %vm6919_vm3, %v6785_v63  ;;  %vm6935_vm3 = vnez %v6814_v39 }
0x16ac   :  { %v3200_v10 = vpop.permute.xlu0 %3199 }
0x16fa   :  { %v3023_v12 = vpop.f32.mrb[70].mxu0 }
0x16fb   :  { %v3034_v16 = vsub.f32 %v2789_v44, %v3023_v12  ;;  %v3025_v19 = vpop.f32.mrb[71].mxu0 }
0x16fc   :  { %v3035_v22 = vsub.f32 %v2790_v38, %v3025_v19 }
0x16fd   :  { %v3038_v31 = vmul.f32 %v3034_v16, %v3034_v16 }
0x16fe   :  { %v3039_v25 = vmul.f32 %v3035_v22, %v3035_v22  ;;  %v3029_v28 = vpop.f32.mrb[72].mxu0 }
0x16ff   :  { %v3036_v34 = vsub.f32 %v2791_v62, %v3029_v28  ;;  %v3031_v37 = vpop.f32.mrb[73].mxu0 }
0x1700   :  { %v3037_v40 = vsub.f32 %v2792_v3, %v3031_v37  ;;  %3106 = vmatprep.mubr.f32.mxu0 %v3039_v25 }
0x1701   :  { %3107 = vmatmul.mubr.f32.vlgmr.msra.gmra.mrb[74].mxu0 %v3038_v31  ;;  %v3040_v46 = vmul.f32 %v3036_v34, %v3036_v34 }
0x1702   :  { %v3041_v43 = vmul.f32 %v3037_v40, %v3037_v40 }
0x1704   :  { %3111 = vmatprep.mubr.f32.mxu0 %v3041_v43 }
0x1705   :  { %3112 = vmatmul.mubr.f32.gmra.mrb[76].mxu0 %v3040_v46 }
0x17d4   :  { %v4389_v54 = vpop.f32.mrb[74].mxu0 }
0x17d5   :  { %v4390_v63 = vpop.f32.mrb[75].mxu0 }
0x17d6   :  { %v4391_v23 = vadd.f32 %v4390_v63, %v4389_v54 }
0x17d8   :  { %v4392_v14 = vpop.f32.mrb[76].mxu0 }
0x17d9   :  { %v4393_v18 = vpop.f32.mrb[77].mxu0 }
0x17da   :  { %v4394_v30 = vadd.f32 %v4393_v18, %v4392_v14  ;;  %v5149_v18 = vmov 6  }
0x17db   :  { %5002 = vset.pattern.permute.xlu1 %v5149_v18  ;;  %5001 = vset.pattern.permute.xlu0 %v5149_v18 }
0x17dc   :  { %v4825_v48 = vpack.c.bf16 %v4394_v30, %v4391_v23  ;;  %v5150_v30 = vmov 7  }
0x17de   :  { %4826 = vmatprep.subr.bf16.mxu1 %v4825_v48 }
0x17df   :  { %4828 = vmatpush3.bf16.msra.mxu1 %v4825_v48 }
0x17e0   :  { %3955 = vmatprep.subr.msk.mxu1 %vm6920_vm13, %v5509_v7  ;;  %v3196_v7 = vpop.permute.xlu1 %3195  ;;  %vm6936_vm13 = vnez %v6817_v5  ;;  %v5113_v5 = vld [vmem:[%s6630_s0 + $0x20] sm:$0xff] }
0x17e2   :  { %4467 = vmatmul.mubr.msk.f32.vlgmr.msra.gmra.mrb[48].mxu1 %vm6921_vm14, %v6290_v42  ;;  %vm6937_vm14 = vcmask 392192  }
0x17e3   :  { %3956 = vmatpush1.msk.msra.mxu1 %vm6922_vm2, %v5517_v8  ;;  %3274 = vmatprep.mubr.f32.mxu1 %v6795_v32  ;;  %vm6938_vm2 = vmmov %vm6937_vm14 }
0x17e4   :  { %v3293_v13 = vpop.permute.xlu1 %3292 }
0x17e8   :  { %v3297_v51 = vpop.permute.xlu1 %3296 }
0x18b5   :  { %v4468_v45 = vpop.f32.mrb[48].mxu1 }
0x18b6   :  { %v3183_v41 = vpop.f32.mrb[49].mxu1  ;;  %v3189_v59 = vadd.f32 1e-05, %v4468_v45 }
0x18b7   :  { %v3184_v50 = vadd.f32 1e-05, %v3183_v41 }
0x18b9   :  { %5085 = vrsqrt.f32 %v3184_v50 }
0x18ba   :  { %5087 = vrsqrt.f32 %v3189_v59 }
0x18c3   :  { %v5086_v61 = vpop.eup %5085 }
0x18c4   :  { %v3202_v42 = vmul.f32 %v5086_v61, %v3196_v7  ;;  %v5088_v47 = vpop.eup %5087 }
0x18c5   :  { %v3203_v8 = vmul.f32 %v5088_v47, %v3200_v10 }
0x18c6   :  { %3957 = vmatmul.mubr.msk.f32.vlgmr.msra.gmra.mrb[50].mxu1 %vm6923_vm4, %v3202_v42  ;;  %vm6939_vm4 = vcmask 261120  }
0x18c7   :  { %3280 = vmatprep.mubr.f32.mxu1 %v6795_v32 }
0x18ca   :  { %3958 = vmatmul.mubr.msk.f32.gmra.mrb[52].mxu1 %vm6924_vm8, %v3203_v8  ;;  %vm6940_vm8 = vmmov %vm6939_vm4 }
0x18cb   :  { %3463 = vmatprep.mubr.f32.mxu1 %v6795_v32 }
0x1999   :  { %v3276_v29 = vpop.f32.mrb[50].mxu1 }
0x199a   :  { %v3287_v60 = vmul.f32 %v3276_v29, %v3034_v16  ;;  %v3278_v21 = vpop.f32.mrb[51].mxu1 }
0x199b   :  { %v3288_v58 = vmul.f32 %v3278_v21, %v3035_v22 }
0x199c   :  { %v3299_v44 = vadd.f32 %v3293_v13, %v3287_v60 }
0x199d   :  { %v3300_v33 = vadd.f32 %v3293_v13, %v3288_v58  ;;  %v3282_v4 = vpop.f32.mrb[52].mxu1 }
0x199e   :  { %v3303_v11 = vsub.f32 0.0, %v3299_v44  ;;  %v3289_v57 = vmul.f32 %v3282_v4, %v3036_v34  ;;  %v3284_v0 = vpop.f32.mrb[53].mxu1 }
0x199f   :  { %v3304_v38 = vsub.f32 0.0, %v3300_v33  ;;  %v3290_v1 = vmul.f32 %v3284_v0, %v3037_v40 }
0x19a0   :  { %v3307_v62 = vmul.f32 1.442695, %v3303_v11  ;;  %v3301_v3 = vadd.f32 %v3297_v51, %v3289_v57  ;;  %v4845_v57 = vpack.c.bf16 %v5108_v56, %v5107_v9 }
0x19a1   :  { %v3309_v35 = vmul.f32 1.442695, %v3304_v38  ;;  %v3302_v27 = vadd.f32 %v3297_v51, %v3290_v1  ;;  %v5110_v38 = vld [vmem:[%s6630_s0 + $0x10] sm:$0xff]  ;;  %v3371_v1 = vld [vmem:[%s6641_s11] sm:$0xff]  ;;  %v5111_v51 = vld [vmem:[%s6630_s0 + $0x28] sm:$0xff] }
0x19a2   :  { %5089 = vpow2.f32 %v3307_v62  ;;  %v3305_v17 = vsub.f32 0.0, %v3301_v3  ;;  %v4847_v39 = vpack.c.bf16 %v5110_v38, %v5109_v2  ;;  %v5112_v62 = vld [vmem:[%s6630_s0 + $0x38] sm:$0xff] }
0x19a3   :  { %5091 = vpow2.f32 %v3309_v35  ;;  %v3306_v6 = vsub.f32 0.0, %v3302_v27  ;;  %v5114_v35 = vld [vmem:[%s6630_s0 + $0x30] sm:$0xff] }
0x19a4   :  { %v3311_v55 = vmul.f32 1.442695, %v3305_v17  ;;  %v3372_v17 = vld [vmem:[%s6641_s11 + $0x8] sm:$0xff]  ;;  %s5151_s11 = smov [#allocation3]  }
0x19a5   :  { %v3313_v36 = vmul.f32 1.442695, %v3306_v6  ;;  %v3476_v6 = vld [vmem:[%s6642_s12] sm:$0xff]  ;;  %s3582_s10 = sshll.u32 %s5151_s11, 4  ;;  %s3583_s10 = int_to_ptr.vmem [resolvable:$true] %s3582_s10 }
0x19a6   :  { %5093 = vpow2.f32 %v3311_v55  ;;  %v3477_v55 = vld [vmem:[%s6642_s12 + $0x8] sm:$0xff]  ;;  %s5115_s12 = scalar_lea.vmem %s3583_s10, 512  ;;  %p5120_p1 = scmp.lt.s32.totalorder %s3583_s10, %s3583_s10 }
0x19a7   :  { %5095 = vpow2.f32 %v3313_v36  ;;  %p5116_p0 = scmp.ne.s32.totalorder %s3583_s10, %s5115_s12  ;;  %p5121_p2 = scmp.lt.s32.totalorder %s5115_s12, %s5115_s12 }
0x19a9   :  { %p5122_p3 = por %p5121_p2, %p5120_p1 }
0x19ab   :  { %p5123_p4 = pnand %p5122_p3, %p5116_p0 }
0x19ac   :  { %v5090_v15 = vpop.eup %5089 }
0x19ad   :  { %v5092_v20 = vpop.eup %5091  ;;  %v3315_v24 = vadd.f32 1.0, %v5090_v15 }
0x19ae   :  { %v3316_v12 = vadd.f32 1.0, %v5092_v20 }
0x19af   :  { %5097 = vrcp.f32 %v3315_v24 }
0x19b0   :  { %v5094_v16 = vpop.eup %5093  ;;  %5099 = vrcp.f32 %v3316_v12 }
0x19b1   :  { %v5096_v19 = vpop.eup %5095  ;;  %v3317_v22 = vadd.f32 1.0, %v5094_v16 }
0x19b2   :  { %v3318_v25 = vadd.f32 1.0, %v5096_v19 }
0x19b3   :  { %5101 = vrcp.f32 %v3317_v22 }
0x19b4   :  { %5103 = vrcp.f32 %v3318_v25 }
0x19b9   :  { %v5098_v28 = vpop.eup %5097 }
0x19ba   :  { %v5100_v31 = vpop.eup %5099  ;;  %v3323_v40 = vmul.f32 %v5098_v28, %v3299_v44 }
0x19bb   :  { %v3324_v46 = vmul.f32 %v5100_v31, %v3300_v33 }
0x19bd   :  { %v5102_v34 = vpop.eup %5101 }
0x19be   :  { %v5104_v37 = vpop.eup %5103  ;;  %v3325_v43 = vmul.f32 %v5102_v34, %v3301_v3  ;;  %v4849_v3 = vpack.c.bf16 %v5112_v62, %v5111_v51 }
0x19bf   :  { %v3326_v49 = vmul.f32 %v5104_v37, %v3302_v27  ;;  %v4851_v27 = vpack.c.bf16 %v5114_v35, %v5113_v5 }
0x19c0   :  { %v4981_v54 = vpack.i.bf16 %v3325_v43, %v3323_v40  ;;  %v4837_v63 = vpack.c.bf16 %v3325_v43, %v3323_v40 }
0x19c1   :  { %v4986_v23 = vpack.i.bf16 %v3326_v49, %v3324_v46  ;;  %v4835_v14 = vpack.c.bf16 %v3326_v49, %v3324_v46 }
0x19c2   :  { %4982 = vrot.lane.b32.xlu0 %v4981_v54, %s5143_s2 }
0x19c3   :  { %4987 = vrot.lane.b32.xlu1 %v4986_v23, %s5143_s2 }
0x19c6   :  { %4992 = vrot.lane.b32.xlu0 %v4981_v54, %s5144_s28 }
0x19c7   :  { %4997 = vrot.lane.b32.xlu1 %v4986_v23, %s5144_s28 }
0x19ca   :  { %3386 = vperm.xlu0 %5001, %v6521_v52  }
0x19cb   :  { %3390 = vperm.xlu1 %5002, %v6527_v53  }
0x19ce   :  { %5004 = vset.pattern.permute.xlu0 %v5150_v30 }
0x19cf   :  { %5003 = vset.pattern.permute.xlu1 %v5150_v30  ;;  %3483 = vperm.xlu0 %5004, %v6527_v53  }
0x19d0   :  { %3479 = vperm.xlu1 %5003, %v6521_v52  }
0x1a34   :  { %v4983_v48 = vpop.permute.xlu0 %4982 }
0x1a35   :  { %v4985_v26 = vunpack.i.h.bf16 %v4983_v48  ;;  %v4984_v45 = vunpack.i.l.bf16 %v4983_v48  ;;  %v4988_v41 = vpop.permute.xlu1 %4987 }
0x1a36   :  { %v4990_v59 = vunpack.i.h.bf16 %v4988_v41  ;;  %v4989_v50 = vunpack.i.l.bf16 %v4988_v41 }
0x1a38   :  { %v3336_v7 = vsel %vm6925_vm6, %v4985_v26, %v4990_v59  ;;  %v3338_v61 = vsel %vm6926_vm10, %v4990_v59, %v4985_v26  ;;  %v3335_v42 = vsel %vm6927_vm0, %v4984_v45, %v4989_v50  ;;  %v3337_v52 = vsel %vm6928_vm15, %v4989_v50, %v4984_v45  ;;  %v4993_v47 = vpop.permute.xlu0 %4992 }
0x1a39   :  { %v4829_v53 = vpack.c.bf16 %v3336_v7, %v3335_v42  ;;  %v4832_v10 = vpack.c.bf16 %v3338_v61, %v3337_v52  ;;  %v4995_v8 = vunpack.i.h.bf16 %v4993_v47  ;;  %v4994_v29 = vunpack.i.l.bf16 %v4993_v47  ;;  %v4998_v13 = vpop.permute.xlu1 %4997 }
0x1a3a   :  { %v5000_v60 = vunpack.i.h.bf16 %v4998_v13  ;;  %v4999_v21 = vunpack.i.l.bf16 %v4998_v13 }
0x1a3b   :  { %4831 = vmatprep.subr.msk.bf16.mxu1 %vm6929_vm5, %v4829_v53 }
0x1a3c   :  { %v3354_v58 = vsel %vm6930_vm12, %v5000_v60, %v4995_v8  ;;  %v3353_v44 = vsel %vm6931_vm11, %v4999_v21, %v4994_v29  ;;  %4834 = vmatpush1.bf16.msk.msra.mxu1 %vm6932_vm1, %v4832_v10  ;;  %v3352_v33 = vsel %vm6933_vm7, %v4995_v8, %v5000_v60  ;;  %v3351_v4 = vsel %vm6934_vm9, %v4994_v29, %v4999_v21 }
0x1a3d   :  { %4836 = vmatprep.subr.bf16.mxu1 %v4835_v14  ;;  %v4839_v11 = vpack.c.bf16 %v3354_v58, %v3353_v44  ;;  %v4842_v0 = vpack.c.bf16 %v3352_v33, %v3351_v4 }
0x1a40   :  { %4838 = vmatpush1.bf16.msra.mxu1 %v4837_v63 }
0x1a41   :  { %4841 = vmatprep.subr.msk.bf16.mxu1 %vm6935_vm3, %v4839_v11 }
0x1a44   :  { %4844 = vmatpush1.bf16.msk.msra.mxu1 %vm6936_vm13, %v4842_v0 }
0x1a45   :  { %4846 = vmatprep.subr.bf16.mxu1 %v4845_v57 }
0x1a47   :  { %3959 = vmatmul.mubr.msk.f32.vlgmr.msra.gmra.mrb[54].mxu1 %vm6937_vm14, %v3371_v1 }
0x1a48   :  { %4848 = vmatpush1.bf16.msra.mxu1 %v4847_v39  ;;  %3469 = vmatprep.mubr.f32.mxu1 %v6795_v32 }
0x1a49   :  { %4850 = vmatprep.subr.bf16.mxu1 %v4849_v3  ;;  %v3387_v15 = vpop.permute.xlu0 %3386 }
0x1a4a   :  { %v3391_v36 = vpop.permute.xlu1 %3390 }
0x1a4b   :  { %3960 = vmatmul.mubr.msk.f32.gmra.mrb[56].mxu1 %vm6938_vm2, %v3372_v17 }
0x1a4c   :  { %4852 = vmatpush1.bf16.msra.mxu1 %v4851_v27  ;;  %3556 = vmatprep.mubr.f32.mxu1 %v6795_v32 }
0x1a4e   :  { %v3484_v16 = vpop.permute.xlu0 %3483 }
0x1a4f   :  { %3961 = vmatmul.mubr.msk.f32.vlgmr.msra.gmra.mrb[54].mxu1 %vm6939_vm4, %v3476_v6  ;;  %v3480_v20 = vpop.permute.xlu1 %3479  ;;  %v4857_v28 = vadd.f32 %v3484_v16, %v3391_v36 }
0x1a50   :  { %3562 = vmatprep.mubr.f32.mxu1 %v6795_v32  ;;  %v4853_v24 = vadd.f32 %v3480_v20, %v3387_v15 }
0x1a53   :  { %3962 = vmatmul.mubr.msk.f32.gmra.mrb[56].mxu1 %vm6940_vm8, %v3477_v55 }
0x1b22   :  { %v3558_v12 = vpop.f32.mrb[54].mxu1 }
0x1b23   :  { %v4854_v19 = vadd.f32 %v4853_v24, %v3558_v12  ;;  %v3560_v22 = vpop.f32.mrb[55].mxu1 }
0x1b24   :  { %v4856_v25 = vadd.f32 %v4853_v24, %v3560_v22 }
0x1b25   :  { %3573 = vst [vmem:[#allocation3] sm:$0xff] %v4854_v19 }
0x1b26   :  { %3574 = vst [vmem:[#allocation3 + $0x8] sm:$0xff] %v4856_v25  ;;  %v3564_v32 = vpop.f32.mrb[56].mxu1 }
0x1b27   :  { %v4858_v31 = vadd.f32 %v4857_v28, %v3564_v32  ;;  %v3566_v34 = vpop.f32.mrb[57].mxu1 }
0x1b28   :  { %v4860_v37 = vadd.f32 %v4857_v28, %v3566_v34 }
0x1b29   :  { %3575 = vst [vmem:[#allocation3 + $0x10] sm:$0xff] %v4858_v31 }
0x1b2a   :  { %3576 = vst [vmem:[#allocation3 + $0x18] sm:$0xff] %v4860_v37 }
0x1b2b   :  { %5126 = shalt.err (!%p5123_p4)
}
0x1b2c   :  { %s5127_s18 = scalar_lea.hbm %s6643_s13, 512 }
0x1b2d   :  { %p5128_p5 = scmp.ne.s32.totalorder %s6643_s13, %s5127_s18  ;;  %p5131_p6 = scmp.lt.u32.totalorder %s5127_s18, %s6643_s13 }
0x1b2f   :  { %p5133_p7 = pnand %p5131_p6, %p5128_p5 }
0x1b31   :  { %5136 = shalt.err (!%p5133_p7)
}
0x1b32   :  { %s5152_s20 = smov 256   ;;  %s5153_s8 = smov 16  }
0x1b33   :  { %3588 = dma.vmem_to_hbm [thread:$0]  %s3583_s10, 512, %s6643_s13, [#allocation4], %s5152_s20, %s5152_s20, %s5153_s8  }
0x1b34   :  { %5137 = dma.done.wait [#allocation4], 512  }
0x1b35   :  { %5138 = vsyncadd [#allocation4], 4294966784 }
0x1b36   :  { %3592 = vsyncpa [#allocation4], 1 }

</bundles_post_ra>
